<compile_context>
chip_gen: v5e
topology: v5e:2x2
jax: 0.10.0
libtpu: 0.0.40
codegen_flags: <defaults>
</compile_context>

<pallas_src>
import functools

import numpy as np
import jax
import jax.numpy as jnp
from jax.experimental import pallas as pl
from jax.experimental.pallas import tpu as pltpu


# ----------------------------------------------------------------------------
# Pallas kernel 1: Conv2d(Cin, 8, 7) + MaxPool2d(2,2) + ReLU
#   out[cout, m] = relu( max_off( W @ A_off )[cout, m] + b[cout] )
#   (Cout on sublanes, pooled voxels on lanes -> lane-dense output)
# ----------------------------------------------------------------------------
def _conv_pool_relu_kernel(w_ref, b_ref, a_ref, o_ref):
    w = w_ref[...]
    m = jnp.dot(w, a_ref[0], preferred_element_type=jnp.float32)
    m = jnp.maximum(m, jnp.dot(w, a_ref[1], preferred_element_type=jnp.float32))
    m = jnp.maximum(m, jnp.dot(w, a_ref[2], preferred_element_type=jnp.float32))
    m = jnp.maximum(m, jnp.dot(w, a_ref[3], preferred_element_type=jnp.float32))
    o_ref[...] = jnp.maximum(m + b_ref[...], 0.0)


def pallas_conv1_pool_relu(x, w1mat, b1col, kh=7, kw=7):
    """x: (N, Cin, H, W) f32;  w1mat: (8, kh*kw*Cin);  b1col: (8, 1).

    Returns (p1, (S1h, S1w)) with p1 of shape (8, N*S1h*S1w),
    column order n*S1h*S1w + r*S1w + c.
    """
    N, Cin, H, W = x.shape
    Cout, K = w1mat.shape
    Ho, Wo = H - kh + 1, W - kw + 1
    Hp, Wp = Ho // 2, Wo // 2
    M = N * Hp * Wp

    # im2col for the four 2x2 pool offsets; 64 deduped strided slices of the
    # input, assembled with one stack per offset + one outer stack.
    x_c = jnp.transpose(x, (1, 0, 2, 3))          # (Cin, N, H, W), tiny
    cache = {}

    def tap(a, b):
        if (a, b) not in cache:
            cache[(a, b)] = x_c[:, :, a:a + 2 * Hp:2, b:b + 2 * Wp:2]
        return cache[(a, b)]

    offs = []
    for di in range(2):
        for dj in range(2):
            taps = [tap(ih + di, iw + dj) for ih in range(kh) for iw in range(kw)]
            offs.append(jnp.stack(taps, axis=0).reshape(K, M))
    a_all = jnp.stack(offs, axis=0)               # (4, K, M), unpadded

    out = pl.pallas_call(
        _conv_pool_relu_kernel,
        out_shape=jax.ShapeDtypeStruct((Cout, M), jnp.float32),
        grid=(1,),
        in_specs=[
            pl.BlockSpec((Cout, K), lambda i: (0, 0)),
            pl.BlockSpec((Cout, 1), lambda i: (0, 0)),
            pl.BlockSpec((4, K, M), lambda i: (0, 0, 0)),
        ],
        out_specs=pl.BlockSpec((Cout, M), lambda i: (0, 0)),
    )(w1mat, b1col, a_all)
    return out, (Hp, Wp)


# ----------------------------------------------------------------------------
# Pallas kernel 2: fused localization head
#   conv2(8->10,k5)+MaxPool2d(2,2)+ReLU  ->  fc1(40->1024)+ReLU
#   -> fc2(1024->32)+ReLU -> fc3(32->4) -> Hardtanh(0, clip_max)
#   Activations stay in (features, batch) layout; every layer is one MXU dot.
# ----------------------------------------------------------------------------
def _loc_head_kernel(p1_ref, w2_ref, b2_ref, w3_ref, b3_ref, w4_ref, b4_ref,
                     w5_ref, b5_ref, o_ref, *, clip_max):
    p1 = p1_ref[...]                                              # (648, N)
    o2 = jnp.dot(w2_ref[...], p1, preferred_element_type=jnp.float32)  # (160, N)
    f2 = o2.shape[0] // 4                                         # 40 (mult of 8)
    m = jnp.maximum(jnp.maximum(o2[0:f2], o2[f2:2 * f2]),
                    jnp.maximum(o2[2 * f2:3 * f2], o2[3 * f2:4 * f2]))
    p2 = jnp.maximum(m + b2_ref[...], 0.0)                        # (40, N)
    h1 = jnp.maximum(
        jnp.dot(w3_ref[...], p2, preferred_element_type=jnp.float32) + b3_ref[...],
        0.0)                                                      # (1024, N)
    h2 = jnp.maximum(
        jnp.dot(w4_ref[...], h1, preferred_element_type=jnp.float32) + b4_ref[...],
        0.0)                                                      # (32, N)
    o = jnp.dot(w5_ref[...], h2, preferred_element_type=jnp.float32) + b5_ref[...]
    o_ref[...] = jnp.clip(o, 0.0, clip_max)                       # (4, N)


def pallas_loc_head(p1feat, params, clip_max):
    KF, N = p1feat.shape
    w2, b2 = params["conv2_wbig"], params["conv2_bcol"]
    w3, b3 = params["fc1_w"], params["fc1_bcol"]
    w4, b4 = params["fc2_w"], params["fc2_bcol"]
    w5, b5 = params["fc3_w"], params["fc3_bcol"]
    out = pl.pallas_call(
        functools.partial(_loc_head_kernel, clip_max=clip_max),
        out_shape=jax.ShapeDtypeStruct((4, N), jnp.float32),
        grid=(1,),
        in_specs=[
            pl.BlockSpec(p1feat.shape, lambda i: (0, 0)),
            pl.BlockSpec(w2.shape, lambda i: (0, 0)),
            pl.BlockSpec(b2.shape, lambda i: (0, 0)),
            pl.BlockSpec(w3.shape, lambda i: (0, 0)),
            pl.BlockSpec(b3.shape, lambda i: (0, 0)),
            pl.BlockSpec(w4.shape, lambda i: (0, 0)),
            pl.BlockSpec(b4.shape, lambda i: (0, 0)),
            pl.BlockSpec(w5.shape, lambda i: (0, 0)),
            pl.BlockSpec(b5.shape, lambda i: (0, 0)),
        ],
        out_specs=pl.BlockSpec((4, N), lambda i: (0, 0)),
    )(p1feat, w2, b2, w3, b3, w4, b4, w5, b5)
    return out                                                     # (4, N)


# ----------------------------------------------------------------------------
# Pallas kernel 3: per-sample bilinear crop-resample, all samples in one step
#   out = (R @ img @ C^T) * mask + (1 - mask) * img_min
# ----------------------------------------------------------------------------
def _crop_resample_kernel(imin_ref, r_ref, img_ref, ct_ref, mask_ref, o_ref):
    imin = imin_ref[0]
    tmp = jnp.einsum('nij,njk->nik', r_ref[...], img_ref[...],
                     preferred_element_type=jnp.float32)
    samp = jnp.einsum('nij,njk->nik', tmp, ct_ref[...],
                      preferred_element_type=jnp.float32)
    mask = mask_ref[...]
    o_ref[...] = samp * mask + (1.0 - mask) * imin


def pallas_crop_resample(Rm, img0, Ct, mask, img_min):
    """Rm: (N,H,H), img0: (N,H,W), Ct: (N,W,W), mask: (N,H,W) -> (N,H,W)."""
    N, H, W = img0.shape
    imin = jnp.reshape(img_min.astype(jnp.float32), (1,))
    return pl.pallas_call(
        _crop_resample_kernel,
        out_shape=jax.ShapeDtypeStruct((N, H, W), jnp.float32),
        grid=(1,),
        in_specs=[
            pl.BlockSpec(memory_space=pltpu.MemorySpace.SMEM),
            pl.BlockSpec((N, H, H), lambda i: (0, 0, 0)),
            pl.BlockSpec((N, H, W), lambda i: (0, 0, 0)),
            pl.BlockSpec((N, W, W), lambda i: (0, 0, 0)),
            pl.BlockSpec((N, H, W), lambda i: (0, 0, 0)),
        ],
        out_specs=pl.BlockSpec((N, H, W), lambda i: (0, 0, 0)),
    )(imin, Rm, img0, Ct, mask)


# ----------------------------------------------------------------------------
# Glue: per-axis bilinear interpolation matrix (affine_grid + grid_sample,
#       align_corners=False, padding_mode='zeros'), built with cheap one-hots.
# ----------------------------------------------------------------------------
def _interp_matrix(lo, hi, scale, offset, out_len, src_len):
    idx = jnp.arange(out_len, dtype=jnp.float32)
    lo_f = lo.astype(jnp.float32)
    hi_f = hi.astype(jnp.float32)
    L = jnp.maximum(hi_f - lo_f + 1.0, 1.0)              # crop extent (>=1 guard)
    base = -1.0 + (2.0 * (idx - lo_f) + 1.0) / L         # affine_grid base coord
    g = scale * base + offset                            # theta applied
    src = ((g + 1.0) * src_len - 1.0) * 0.5              # grid_sample unnormalize
    s0 = jnp.floor(src)
    f = src - s0
    s0i = s0.astype(jnp.int32)
    s1i = s0i + 1
    in_rng = ((idx >= lo_f) & (idx <= hi_f)).astype(jnp.float32)
    cols = jnp.arange(src_len, dtype=jnp.int32)
    oh0 = (cols[None, :] == s0i[:, None]).astype(jnp.float32)   # OOB tap -> zero
    oh1 = (cols[None, :] == s1i[:, None]).astype(jnp.float32)
    mat = ((1.0 - f)[:, None] * oh0 + f[:, None] * oh1) * in_rng[:, None]
    return mat, in_rng


# ----------------------------------------------------------------------------
# Parameter init (shapes / special init matching net_2.__init__) and the
# one-time re-layout into kernel formats (hoisted out of the forward).
# ----------------------------------------------------------------------------
def init_raw_params(key, channel_dim, patch_size):
    f_in = 10 * int(patch_size[0] / 4 - 4) * int(patch_size[1] / 4 - 4)
    ks = jax.random.split(key, 8)
    return {
        "conv1_w": jax.random.normal(ks[0], (8, channel_dim, 7, 7), jnp.float32) * 0.05,
        "conv1_b": jax.random.normal(ks[1], (8,), jnp.float32) * 0.05,
        "conv2_w": jax.random.normal(ks[2], (10, 8, 5, 5), jnp.float32) * 0.05,
        "conv2_b": jax.random.normal(ks[3], (10,), jnp.float32) * 0.05,
        "fc1_w": jax.random.normal(ks[4], (1024, f_in), jnp.float32) * 0.05,
        "fc1_b": jax.random.normal(ks[5], (1024,), jnp.float32) * 0.05,
        "fc2_w": jax.random.normal(ks[6], (32, 1024), jnp.float32) * 0.05,
        "fc2_b": jax.random.normal(ks[7], (32,), jnp.float32) * 0.05,
        # fc_loc[4]: weight zeroed, bias = [0, ps0/2, 0, ps1/2]
        "fc3_w": jnp.zeros((4, 32), jnp.float32),
        "fc3_b": jnp.array([0.0, patch_size[0] / 2.0, 0.0, patch_size[1] / 2.0],
                           jnp.float32),
    }


def prepare_params(tp, channel_dim, patch_size):
    """One-time re-layout of torch-style weights into kernel-ready formats."""
    H, W = patch_size
    S1h, S1w = (H - 6) // 2, (W - 6) // 2            # conv1 pooled spatial
    S2h, S2w = (S1h - 4) // 2, (S1w - 4) // 2        # conv2 pooled spatial
    npos = S2h * S2w
    f2 = 10 * npos                                   # fc_loc input features
    kf = 8 * S1h * S1w                               # flattened conv1 features

    # conv1 weight -> (8, 7*7*Cin), K ordered (ih, iw, ci) to match the im2col.
    w1 = np.asarray(tp["conv1_w"], np.float32)
    conv1_wmat = jnp.asarray(w1.transpose(0, 2, 3, 1).reshape(8, 7 * 7 * channel_dim))
    conv1_bcol = jnp.asarray(np.asarray(tp["conv1_b"], np.float32).reshape(8, 1))

    # conv2 folded with MaxPool2d(2,2): rows = off*f2 + co*npos + pos,
    # cols = ci*(S1h*S1w) + r*S1w + c.
    w2 = np.asarray(tp["conv2_w"], np.float32)       # (10, 8, 5, 5)
    w2big = np.zeros((4 * f2, kf), np.float32)
    co = np.arange(10)
    for pi in range(2):
        for pj in range(2):
            off = pi * 2 + pj
            for oi in range(S2h):
                for oj in range(S2w):
                    pos = oi * S2w + oj
                    for ci in range(8):
                        for di in range(5):
                            for dj in range(5):
                                r = 2 * oi + pi + di
                                c = 2 * oj + pj + dj
                                col = ci * (S1h * S1w) + r * S1w + c
                                rows = off * f2 + co * npos + pos
                                w2big[rows, col] = w2[:, ci, di, dj]
    conv2_wbig = jnp.asarray(w2big)
    conv2_bcol = jnp.asarray(
        np.repeat(np.asarray(tp["conv2_b"], np.float32), npos).reshape(f2, 1))

    return {
        "conv1_wmat": conv1_wmat, "conv1_bcol": conv1_bcol,
        "conv2_wbig": conv2_wbig, "conv2_bcol": conv2_bcol,
        "fc1_w": jnp.asarray(np.asarray(tp["fc1_w"], np.float32)),
        "fc1_bcol": jnp.asarray(np.asarray(tp["fc1_b"], np.float32).reshape(-1, 1)),
        "fc2_w": jnp.asarray(np.asarray(tp["fc2_w"], np.float32)),
        "fc2_bcol": jnp.asarray(np.asarray(tp["fc2_b"], np.float32).reshape(-1, 1)),
        "fc3_w": jnp.asarray(np.asarray(tp["fc3_w"], np.float32)),
        "fc3_bcol": jnp.asarray(np.asarray(tp["fc3_b"], np.float32).reshape(-1, 1)),
    }


# ----------------------------------------------------------------------------
# Forward pass of net_2
# ----------------------------------------------------------------------------
def net2_forward(params, im_tensor, patch_size, mode="normal"):
    x = im_tensor.astype(jnp.float32)
    N, C, H, W = x.shape

    # localization stage 1 (Pallas call 1): conv1 + maxpool + relu
    p1, (S1h, S1w) = pallas_conv1_pool_relu(x, params["conv1_wmat"],
                                            params["conv1_bcol"])
    # single tiny transpose to the (features, batch) layout for the fused head
    p1feat = (p1.reshape(8, N, S1h, S1w)
                .transpose(0, 2, 3, 1)
                .reshape(8 * S1h * S1w, N))

    # localization stage 2 + fc_loc (Pallas call 2): conv2+pool+relu + 3 Linears
    sz = pallas_loc_head(p1feat, params, clip_max=float(patch_size[0] - 1))  # (4,N)
    s0, s1, s2, s3 = sz[0], sz[1], sz[2], sz[3]

    Hf, Wf = float(H), float(W)
    if mode == "normal":
        t00 = (s1 - s0) / Hf + 1e-20
        t02 = (s1 + s0) / Hf - 1.0
        t11 = (s3 - s2) / Wf + 1e-20
        t12 = (s3 + s2) / Wf - 1.0
    elif mode == "security":
        addx = int(H * 0.2)
        addy = int(W * 0.2)
        condx = (s1 - s0) < (Hf - addx)
        t02_a = jnp.where(
            s0 < addx / 2, (s1 + addx - s0) / Hf - 1.0,
            jnp.where(s1 > Hf - addx / 2,
                      (Hf + s0 - addx + Hf - s1) / Hf - 1.0,
                      (s1 + s0) / Hf - 1.0))
        t00 = jnp.where(condx, (s1 - s0 + addx) / Hf + 1e-20, (s1 - s0) / Hf + 1e-20)
        t02 = jnp.where(condx, t02_a, (s1 + s0) / Hf - 1.0)
        condy = (s3 - s2) < (Wf - addy)
        t12_a = jnp.where(
            s2 < addy / 2, (s3 + addy - s2) / Wf - 1.0,
            jnp.where(s3 > Wf - addy / 2,
                      (Wf + s2 - addy + Wf - s3) / Wf - 1.0,
                      (s3 + s2) / Wf - 1.0))
        t11 = jnp.where(condy, (s3 - s2 + addy) / Wf + 1e-20, (s3 - s2) / Wf + 1e-20)
        t12 = jnp.where(condy, t12_a, (s3 + s2) / Wf - 1.0)
    else:
        raise ValueError(f"unknown mode: {mode}")

    zeros = jnp.zeros_like(t00)
    theta_crop = jnp.stack(
        [jnp.stack([t00, zeros, t02], axis=-1),
         jnp.stack([zeros, t11, t12], axis=-1)], axis=1)          # (N, 2, 3)

    # per-sample crop + bilinear resample (Pallas call 3).
    # TODO(synk): F.affine_grid/grid_sample with data-dependent output size has
    # no static-shape equivalent; realized exactly as a full-size masked
    # resample using per-sample row/column interpolation matrices.
    y0, y1 = jnp.floor(s2), jnp.floor(s3)
    x0, x1 = jnp.floor(s0), jnp.floor(s1)
    Rm, row_in = jax.vmap(
        lambda lo, hi, sc, of: _interp_matrix(lo, hi, sc, of, H, H))(y0, y1, t11, t12)
    Cm, col_in = jax.vmap(
        lambda lo, hi, sc, of: _interp_matrix(lo, hi, sc, of, W, W))(x0, x1, t00, t02)
    Ct = jnp.swapaxes(Cm, 1, 2)
    mask = row_in[:, :, None] * col_in[:, None, :]                # (N, H, W)
    img_min = jnp.min(x)

    crop0 = pallas_crop_resample(Rm, x[:, 0, :, :], Ct, mask, img_min)  # (N,H,W)

    # TODO(synk): the PyTorch slice-assign into img_crop[i, 0, ...] is only
    # well-defined for channel_dim == 1; only channel 0 is written here,
    # remaining channels keep im_tensor.min() (same as the zeros+min init).
    if C == 1:
        img_crop = crop0[:, None, :, :]
    else:
        img_crop = jnp.full((N, C, H, W), img_min, jnp.float32).at[:, 0].set(crop0)
    return img_crop, theta_crop


if __name__ == "__main__":
    key = jax.random.PRNGKey(0)
    kx, kp = jax.random.split(key)

    batch, channel_dim = 2, 1
    patch_size = (24, 24)
    im_tensor = jax.random.normal(kx, (batch, channel_dim) + patch_size,
                                  dtype=jnp.float32)
    raw_params = init_raw_params(kp, channel_dim, patch_size)
    params = prepare_params(raw_params, channel_dim, patch_size)

    fwd = jax.jit(net2_forward, static_argnames=("patch_size", "mode"))
    img_crop, theta_crop = fwd(params, im_tensor, patch_size=patch_size,
                               mode="normal")
    img_crop = jax.block_until_ready(img_crop)
    theta_crop = jax.block_until_ready(theta_crop)

    assert img_crop.shape == im_tensor.shape
    assert theta_crop.shape == (batch, 2, 3)
    assert bool(jnp.all(jnp.isfinite(img_crop)))
    print("KERNEL_OK")
</pallas_src>

<mosaic_0001>
module attributes {stable_mosaic.version = 11 : i64} {
  func.func @_conv_pool_relu_kernel(%arg0: i32, %arg1: memref<8x49xf32, #tpu.memory_space<vmem>>, %arg2: memref<8x1xf32, #tpu.memory_space<vmem>>, %arg3: memref<4x49x162xf32, #tpu.memory_space<vmem>>, %arg4: memref<8x162xf32, #tpu.memory_space<vmem>>) attributes {dimension_semantics = [#tpu.dimension_semantics<arbitrary>], iteration_bounds = array<i64: 1>, scalar_prefetch = 0 : i64, scratch_operands = 0 : i64, tpu.core_type = #tpu.core_type<tc>, window_params = [{pipeline_mode = #tpu.pipeline_mode<synchronous>, transform_indices = @transform_0, window_bounds = array<i64: 8, 49>}, {pipeline_mode = #tpu.pipeline_mode<synchronous>, transform_indices = @transform_1, window_bounds = array<i64: 8, 1>}, {pipeline_mode = #tpu.pipeline_mode<synchronous>, transform_indices = @transform_2, window_bounds = array<i64: 4, 49, 162>}, {pipeline_mode = #tpu.pipeline_mode<synchronous>, transform_indices = @transform_3, window_bounds = array<i64: 8, 162>}]} {
    %c0 = arith.constant 0 : index
    %c0_0 = arith.constant 0 : index
    %0 = vector.load %arg1[%c0, %c0_0] : memref<8x49xf32, #tpu.memory_space<vmem>>, vector<8x49xf32>
    %c0_1 = arith.constant 0 : index
    %c0_2 = arith.constant 0 : index
    %c0_3 = arith.constant 0 : index
    %1 = vector.load %arg3[%c0_1, %c0_2, %c0_3] : memref<4x49x162xf32, #tpu.memory_space<vmem>>, vector<1x49x162xf32>
    %2 = vector.shape_cast %1 : vector<1x49x162xf32> to vector<49x162xf32>
    %cst = arith.constant dense<0.000000e+00> : vector<8x162xf32>
    %3 = tpu.matmul %0, %2, %cst {dimension_numbers = #tpu.dot_dimension_numbers<[1], [0], [0], [1], [0, 0, 1, 1], [], []>} : vector<8x49xf32>, vector<49x162xf32>, vector<8x162xf32> -> vector<8x162xf32>
    %c1 = arith.constant 1 : index
    %c0_4 = arith.constant 0 : index
    %c0_5 = arith.constant 0 : index
    %4 = vector.load %arg3[%c1, %c0_4, %c0_5] : memref<4x49x162xf32, #tpu.memory_space<vmem>>, vector<1x49x162xf32>
    %5 = vector.shape_cast %4 : vector<1x49x162xf32> to vector<49x162xf32>
    %cst_6 = arith.constant dense<0.000000e+00> : vector<8x162xf32>
    %6 = tpu.matmul %0, %5, %cst_6 {dimension_numbers = #tpu.dot_dimension_numbers<[1], [0], [0], [1], [0, 0, 1, 1], [], []>} : vector<8x49xf32>, vector<49x162xf32>, vector<8x162xf32> -> vector<8x162xf32>
    %7 = arith.maximumf %3, %6 : vector<8x162xf32>
    %c2 = arith.constant 2 : index
    %c0_7 = arith.constant 0 : index
    %c0_8 = arith.constant 0 : index
    %8 = vector.load %arg3[%c2, %c0_7, %c0_8] : memref<4x49x162xf32, #tpu.memory_space<vmem>>, vector<1x49x162xf32>
    %9 = vector.shape_cast %8 : vector<1x49x162xf32> to vector<49x162xf32>
    %cst_9 = arith.constant dense<0.000000e+00> : vector<8x162xf32>
    %10 = tpu.matmul %0, %9, %cst_9 {dimension_numbers = #tpu.dot_dimension_numbers<[1], [0], [0], [1], [0, 0, 1, 1], [], []>} : vector<8x49xf32>, vector<49x162xf32>, vector<8x162xf32> -> vector<8x162xf32>
    %11 = arith.maximumf %7, %10 : vector<8x162xf32>
    %c3 = arith.constant 3 : index
    %c0_10 = arith.constant 0 : index
    %c0_11 = arith.constant 0 : index
    %12 = vector.load %arg3[%c3, %c0_10, %c0_11] : memref<4x49x162xf32, #tpu.memory_space<vmem>>, vector<1x49x162xf32>
    %13 = vector.shape_cast %12 : vector<1x49x162xf32> to vector<49x162xf32>
    %cst_12 = arith.constant dense<0.000000e+00> : vector<8x162xf32>
    %14 = tpu.matmul %0, %13, %cst_12 {dimension_numbers = #tpu.dot_dimension_numbers<[1], [0], [0], [1], [0, 0, 1, 1], [], []>} : vector<8x49xf32>, vector<49x162xf32>, vector<8x162xf32> -> vector<8x162xf32>
    %15 = arith.maximumf %11, %14 : vector<8x162xf32>
    %c0_13 = arith.constant 0 : index
    %c0_14 = arith.constant 0 : index
    %16 = vector.load %arg2[%c0_13, %c0_14] : memref<8x1xf32, #tpu.memory_space<vmem>>, vector<8x1xf32>
    %17 = vector.broadcast %16 : vector<8x1xf32> to vector<8x162xf32>
    %18 = arith.addf %15, %17 : vector<8x162xf32>
    %cst_15 = arith.constant 0.000000e+00 : f32
    %19 = vector.broadcast %cst_15 : f32 to vector<8x162xf32>
    %20 = arith.maximumf %18, %19 : vector<8x162xf32>
    %c0_16 = arith.constant 0 : index
    %c0_17 = arith.constant 0 : index
    %21 = vector.load %arg4[%c0_16, %c0_17] : memref<8x162xf32, #tpu.memory_space<vmem>>, vector<8x162xf32>
    tpu.vector_store %arg4[%c0_16, %c0_17], %20 {strides = array<i32>} : memref<8x162xf32, #tpu.memory_space<vmem>>, vector<8x162xf32>,
    return
  }
  func.func @transform_0(%arg0: i32) -> (i32, i32) {
    %c0_i32 = arith.constant 0 : i32
    %c0_i32_0 = arith.constant 0 : i32
    %c0_i32_1 = arith.constant 0 : i32
    return %c0_i32, %c0_i32_0 : i32, i32
  }
  func.func @transform_1(%arg0: i32) -> (i32, i32) {
    %c0_i32 = arith.constant 0 : i32
    %c0_i32_0 = arith.constant 0 : i32
    %c0_i32_1 = arith.constant 0 : i32
    return %c0_i32, %c0_i32_0 : i32, i32
  }
  func.func @transform_2(%arg0: i32) -> (i32, i32, i32) {
    %c0_i32 = arith.constant 0 : i32
    %c0_i32_0 = arith.constant 0 : i32
    %c0_i32_1 = arith.constant 0 : i32
    %c0_i32_2 = arith.constant 0 : i32
    return %c0_i32, %c0_i32_0, %c0_i32_1 : i32, i32, i32
  }
  func.func @transform_3(%arg0: i32) -> (i32, i32) {
    %c0_i32 = arith.constant 0 : i32
    %c0_i32_0 = arith.constant 0 : i32
    %c0_i32_1 = arith.constant 0 : i32
    return %c0_i32, %c0_i32_0 : i32, i32
  }
}

module attributes {stable_mosaic.version = 11 : i64} {
  func.func @_loc_head_kernel(%arg0: i32, %arg1: memref<648x2xf32, #tpu.memory_space<vmem>>, %arg2: memref<160x648xf32, #tpu.memory_space<vmem>>, %arg3: memref<40x1xf32, #tpu.memory_space<vmem>>, %arg4: memref<1024x40xf32, #tpu.memory_space<vmem>>, %arg5: memref<1024x1xf32, #tpu.memory_space<vmem>>, %arg6: memref<32x1024xf32, #tpu.memory_space<vmem>>, %arg7: memref<32x1xf32, #tpu.memory_space<vmem>>, %arg8: memref<4x32xf32, #tpu.memory_space<vmem>>, %arg9: memref<4x1xf32, #tpu.memory_space<vmem>>, %arg10: memref<4x2xf32, #tpu.memory_space<vmem>>) attributes {dimension_semantics = [#tpu.dimension_semantics<arbitrary>], iteration_bounds = array<i64: 1>, scalar_prefetch = 0 : i64, scratch_operands = 0 : i64, tpu.core_type = #tpu.core_type<tc>, window_params = [{pipeline_mode = #tpu.pipeline_mode<synchronous>, transform_indices = @transform_0, window_bounds = array<i64: 648, 2>}, {pipeline_mode = #tpu.pipeline_mode<synchronous>, transform_indices = @transform_1, window_bounds = array<i64: 160, 648>}, {pipeline_mode = #tpu.pipeline_mode<synchronous>, transform_indices = @transform_2, window_bounds = array<i64: 40, 1>}, {pipeline_mode = #tpu.pipeline_mode<synchronous>, transform_indices = @transform_3, window_bounds = array<i64: 1024, 40>}, {pipeline_mode = #tpu.pipeline_mode<synchronous>, transform_indices = @transform_4, window_bounds = array<i64: 1024, 1>}, {pipeline_mode = #tpu.pipeline_mode<synchronous>, transform_indices = @transform_5, window_bounds = array<i64: 32, 1024>}, {pipeline_mode = #tpu.pipeline_mode<synchronous>, transform_indices = @transform_6, window_bounds = array<i64: 32, 1>}, {pipeline_mode = #tpu.pipeline_mode<synchronous>, transform_indices = @transform_7, window_bounds = array<i64: 4, 32>}, {pipeline_mode = #tpu.pipeline_mode<synchronous>, transform_indices = @transform_8, window_bounds = array<i64: 4, 1>}, {pipeline_mode = #tpu.pipeline_mode<synchronous>, transform_indices = @transform_9, window_bounds = array<i64: 4, 2>}]} {
    %c0 = arith.constant 0 : index
    %c0_0 = arith.constant 0 : index
    %0 = vector.load %arg1[%c0, %c0_0] : memref<648x2xf32, #tpu.memory_space<vmem>>, vector<648x2xf32>
    %c0_1 = arith.constant 0 : index
    %c0_2 = arith.constant 0 : index
    %1 = vector.load %arg2[%c0_1, %c0_2] : memref<160x648xf32, #tpu.memory_space<vmem>>, vector<160x648xf32>
    %cst = arith.constant dense<0.000000e+00> : vector<160x2xf32>
    %2 = tpu.matmul %1, %0, %cst {dimension_numbers = #tpu.dot_dimension_numbers<[1], [0], [0], [1], [0, 0, 1, 1], [], []>} : vector<160x648xf32>, vector<648x2xf32>, vector<160x2xf32> -> vector<160x2xf32>
    %3 = vector.extract_strided_slice %2 {offsets = [0, 0], sizes = [40, 2], strides = [1, 1]} : vector<160x2xf32> to vector<40x2xf32>
    %4 = vector.extract_strided_slice %2 {offsets = [40, 0], sizes = [40, 2], strides = [1, 1]} : vector<160x2xf32> to vector<40x2xf32>
    %5 = arith.maximumf %3, %4 : vector<40x2xf32>
    %6 = vector.extract_strided_slice %2 {offsets = [80, 0], sizes = [40, 2], strides = [1, 1]} : vector<160x2xf32> to vector<40x2xf32>
    %7 = vector.extract_strided_slice %2 {offsets = [120, 0], sizes = [40, 2], strides = [1, 1]} : vector<160x2xf32> to vector<40x2xf32>
    %8 = arith.maximumf %6, %7 : vector<40x2xf32>
    %9 = arith.maximumf %5, %8 : vector<40x2xf32>
    %c0_3 = arith.constant 0 : index
    %c0_4 = arith.constant 0 : index
    %10 = vector.load %arg3[%c0_3, %c0_4] : memref<40x1xf32, #tpu.memory_space<vmem>>, vector<40x1xf32>
    %11 = vector.broadcast %10 : vector<40x1xf32> to vector<40x2xf32>
    %12 = arith.addf %9, %11 : vector<40x2xf32>
    %cst_5 = arith.constant 0.000000e+00 : f32
    %13 = vector.broadcast %cst_5 : f32 to vector<40x2xf32>
    %14 = arith.maximumf %12, %13 : vector<40x2xf32>
    %c0_6 = arith.constant 0 : index
    %c0_7 = arith.constant 0 : index
    %15 = vector.load %arg4[%c0_6, %c0_7] : memref<1024x40xf32, #tpu.memory_space<vmem>>, vector<1024x40xf32>
    %cst_8 = arith.constant dense<0.000000e+00> : vector<1024x2xf32>
    %16 = tpu.matmul %15, %14, %cst_8 {dimension_numbers = #tpu.dot_dimension_numbers<[1], [0], [0], [1], [0, 0, 1, 1], [], []>} : vector<1024x40xf32>, vector<40x2xf32>, vector<1024x2xf32> -> vector<1024x2xf32>
    %c0_9 = arith.constant 0 : index
    %c0_10 = arith.constant 0 : index
    %17 = vector.load %arg5[%c0_9, %c0_10] : memref<1024x1xf32, #tpu.memory_space<vmem>>, vector<1024x1xf32>
    %18 = vector.broadcast %17 : vector<1024x1xf32> to vector<1024x2xf32>
    %19 = arith.addf %16, %18 : vector<1024x2xf32>
    %cst_11 = arith.constant 0.000000e+00 : f32
    %20 = vector.broadcast %cst_11 : f32 to vector<1024x2xf32>
    %21 = arith.maximumf %19, %20 : vector<1024x2xf32>
    %c0_12 = arith.constant 0 : index
    %c0_13 = arith.constant 0 : index
    %22 = vector.load %arg6[%c0_12, %c0_13] : memref<32x1024xf32, #tpu.memory_space<vmem>>, vector<32x1024xf32>
    %cst_14 = arith.constant dense<0.000000e+00> : vector<32x2xf32>
    %23 = tpu.matmul %22, %21, %cst_14 {dimension_numbers = #tpu.dot_dimension_numbers<[1], [0], [0], [1], [0, 0, 1, 1], [], []>} : vector<32x1024xf32>, vector<1024x2xf32>, vector<32x2xf32> -> vector<32x2xf32>
    %c0_15 = arith.constant 0 : index
    %c0_16 = arith.constant 0 : index
    %24 = vector.load %arg7[%c0_15, %c0_16] : memref<32x1xf32, #tpu.memory_space<vmem>>, vector<32x1xf32>
    %25 = vector.broadcast %24 : vector<32x1xf32> to vector<32x2xf32>
    %26 = arith.addf %23, %25 : vector<32x2xf32>
    %cst_17 = arith.constant 0.000000e+00 : f32
    %27 = vector.broadcast %cst_17 : f32 to vector<32x2xf32>
    %28 = arith.maximumf %26, %27 : vector<32x2xf32>
    %c0_18 = arith.constant 0 : index
    %c0_19 = arith.constant 0 : index
    %29 = vector.load %arg8[%c0_18, %c0_19] : memref<4x32xf32, #tpu.memory_space<vmem>>, vector<4x32xf32>
    %cst_20 = arith.constant dense<0.000000e+00> : vector<4x2xf32>
    %30 = tpu.matmul %29, %28, %cst_20 {dimension_numbers = #tpu.dot_dimension_numbers<[1], [0], [0], [1], [0, 0, 1, 1], [], []>} : vector<4x32xf32>, vector<32x2xf32>, vector<4x2xf32> -> vector<4x2xf32>
    %c0_21 = arith.constant 0 : index
    %c0_22 = arith.constant 0 : index
    %31 = vector.load %arg9[%c0_21, %c0_22] : memref<4x1xf32, #tpu.memory_space<vmem>>, vector<4x1xf32>
    %32 = vector.broadcast %31 : vector<4x1xf32> to vector<4x2xf32>
    %33 = arith.addf %30, %32 : vector<4x2xf32>
    %cst_23 = arith.constant 0.000000e+00 : f32
    %cst_24 = arith.constant 2.300000e+01 : f32
    %34 = vector.broadcast %cst_23 : f32 to vector<4x2xf32>
    %35 = arith.maximumf %34, %33 : vector<4x2xf32>
    %36 = vector.broadcast %cst_24 : f32 to vector<4x2xf32>
    %37 = arith.minimumf %36, %35 : vector<4x2xf32>
    %c0_25 = arith.constant 0 : index
    %c0_26 = arith.constant 0 : index
    %38 = vector.load %arg10[%c0_25, %c0_26] : memref<4x2xf32, #tpu.memory_space<vmem>>, vector<4x2xf32>
    tpu.vector_store %arg10[%c0_25, %c0_26], %37 {strides = array<i32>} : memref<4x2xf32, #tpu.memory_space<vmem>>, vector<4x2xf32>,
    return
  }
  func.func @transform_0(%arg0: i32) -> (i32, i32) {
    %c0_i32 = arith.constant 0 : i32
    %c0_i32_0 = arith.constant 0 : i32
    %c0_i32_1 = arith.constant 0 : i32
    return %c0_i32, %c0_i32_0 : i32, i32
  }
  func.func @transform_1(%arg0: i32) -> (i32, i32) {
    %c0_i32 = arith.constant 0 : i32
    %c0_i32_0 = arith.constant 0 : i32
    %c0_i32_1 = arith.constant 0 : i32
    return %c0_i32, %c0_i32_0 : i32, i32
  }
  func.func @transform_2(%arg0: i32) -> (i32, i32) {
    %c0_i32 = arith.constant 0 : i32
    %c0_i32_0 = arith.constant 0 : i32
    %c0_i32_1 = arith.constant 0 : i32
    return %c0_i32, %c0_i32_0 : i32, i32
  }
  func.func @transform_3(%arg0: i32) -> (i32, i32) {
    %c0_i32 = arith.constant 0 : i32
    %c0_i32_0 = arith.constant 0 : i32
    %c0_i32_1 = arith.constant 0 : i32
    return %c0_i32, %c0_i32_0 : i32, i32
  }
  func.func @transform_4(%arg0: i32) -> (i32, i32) {
    %c0_i32 = arith.constant 0 : i32
    %c0_i32_0 = arith.constant 0 : i32
    %c0_i32_1 = arith.constant 0 : i32
    return %c0_i32, %c0_i32_0 : i32, i32
  }
  func.func @transform_5(%arg0: i32) -> (i32, i32) {
    %c0_i32 = arith.constant 0 : i32
    %c0_i32_0 = arith.constant 0 : i32
    %c0_i32_1 = arith.constant 0 : i32
    return %c0_i32, %c0_i32_0 : i32, i32
  }
  func.func @transform_6(%arg0: i32) -> (i32, i32) {
    %c0_i32 = arith.constant 0 : i32
    %c0_i32_0 = arith.constant 0 : i32
    %c0_i32_1 = arith.constant 0 : i32
    return %c0_i32, %c0_i32_0 : i32, i32
  }
  func.func @transform_7(%arg0: i32) -> (i32, i32) {
    %c0_i32 = arith.constant 0 : i32
    %c0_i32_0 = arith.constant 0 : i32
    %c0_i32_1 = arith.constant 0 : i32
    return %c0_i32, %c0_i32_0 : i32, i32
  }
  func.func @transform_8(%arg0: i32) -> (i32, i32) {
    %c0_i32 = arith.constant 0 : i32
    %c0_i32_0 = arith.constant 0 : i32
    %c0_i32_1 = arith.constant 0 : i32
    return %c0_i32, %c0_i32_0 : i32, i32
  }
  func.func @transform_9(%arg0: i32) -> (i32, i32) {
    %c0_i32 = arith.constant 0 : i32
    %c0_i32_0 = arith.constant 0 : i32
    %c0_i32_1 = arith.constant 0 : i32
    return %c0_i32, %c0_i32_0 : i32, i32
  }
}

module attributes {stable_mosaic.version = 11 : i64} {
  func.func @_crop_resample_kernel(%arg0: i32, %arg1: memref<1xf32, #tpu.memory_space<smem>>, %arg2: memref<2x24x24xf32, #tpu.memory_space<vmem>>, %arg3: memref<2x24x24xf32, #tpu.memory_space<vmem>>, %arg4: memref<2x24x24xf32, #tpu.memory_space<vmem>>, %arg5: memref<2x24x24xf32, #tpu.memory_space<vmem>>, %arg6: memref<2x24x24xf32, #tpu.memory_space<vmem>>) attributes {dimension_semantics = [#tpu.dimension_semantics<arbitrary>], iteration_bounds = array<i64: 1>, scalar_prefetch = 0 : i64, scratch_operands = 0 : i64, tpu.core_type = #tpu.core_type<tc>, window_params = [{transform_indices = @transform_0, window_bounds = array<i64: 1>}, {pipeline_mode = #tpu.pipeline_mode<synchronous>, transform_indices = @transform_1, window_bounds = array<i64: 2, 24, 24>}, {pipeline_mode = #tpu.pipeline_mode<synchronous>, transform_indices = @transform_2, window_bounds = array<i64: 2, 24, 24>}, {pipeline_mode = #tpu.pipeline_mode<synchronous>, transform_indices = @transform_3, window_bounds = array<i64: 2, 24, 24>}, {pipeline_mode = #tpu.pipeline_mode<synchronous>, transform_indices = @transform_4, window_bounds = array<i64: 2, 24, 24>}, {pipeline_mode = #tpu.pipeline_mode<synchronous>, transform_indices = @transform_5, window_bounds = array<i64: 2, 24, 24>}]} {
    %c0 = arith.constant 0 : index
    %0 = memref.load %arg1[%c0] : memref<1xf32, #tpu.memory_space<smem>>
    %c0_0 = arith.constant 0 : index
    %c0_1 = arith.constant 0 : index
    %c0_2 = arith.constant 0 : index
    %1 = vector.load %arg2[%c0_0, %c0_1, %c0_2] : memref<2x24x24xf32, #tpu.memory_space<vmem>>, vector<2x24x24xf32>
    %c0_3 = arith.constant 0 : index
    %c0_4 = arith.constant 0 : index
    %c0_5 = arith.constant 0 : index
    %2 = vector.load %arg3[%c0_3, %c0_4, %c0_5] : memref<2x24x24xf32, #tpu.memory_space<vmem>>, vector<2x24x24xf32>
    "tpu.trace_start"() <{level = 10 : i32, message = "nij,njk->nik"}> : () -> ()
    %cst = arith.constant dense<0.000000e+00> : vector<2x24x24xf32>
    %3 = tpu.matmul %1, %2, %cst {dimension_numbers = #tpu.dot_dimension_numbers<[2], [1], [1], [2], [0, 0, 0, 1, 1, 2], [0], [0]>} : vector<2x24x24xf32>, vector<2x24x24xf32>, vector<2x24x24xf32> -> vector<2x24x24xf32>
    "tpu.trace_stop"() : () -> ()
    %c0_6 = arith.constant 0 : index
    %c0_7 = arith.constant 0 : index
    %c0_8 = arith.constant 0 : index
    %4 = vector.load %arg4[%c0_6, %c0_7, %c0_8] : memref<2x24x24xf32, #tpu.memory_space<vmem>>, vector<2x24x24xf32>
    "tpu.trace_start"() <{level = 10 : i32, message = "nij,njk->nik"}> : () -> ()
    %cst_9 = arith.constant dense<0.000000e+00> : vector<2x24x24xf32>
    %5 = tpu.matmul %3, %4, %cst_9 {dimension_numbers = #tpu.dot_dimension_numbers<[2], [1], [1], [2], [0, 0, 0, 1, 1, 2], [0], [0]>} : vector<2x24x24xf32>, vector<2x24x24xf32>, vector<2x24x24xf32> -> vector<2x24x24xf32>
    "tpu.trace_stop"() : () -> ()
    %c0_10 = arith.constant 0 : index
    %c0_11 = arith.constant 0 : index
    %c0_12 = arith.constant 0 : index
    %6 = vector.load %arg5[%c0_10, %c0_11, %c0_12] : memref<2x24x24xf32, #tpu.memory_space<vmem>>, vector<2x24x24xf32>
    %7 = arith.mulf %5, %6 : vector<2x24x24xf32>
    %cst_13 = arith.constant 1.000000e+00 : f32
    %8 = vector.broadcast %cst_13 : f32 to vector<2x24x24xf32>
    %9 = arith.subf %8, %6 : vector<2x24x24xf32>
    %10 = vector.broadcast %0 : f32 to vector<2x24x24xf32>
    %11 = arith.mulf %9, %10 : vector<2x24x24xf32>
    %12 = arith.addf %7, %11 : vector<2x24x24xf32>
    %c0_14 = arith.constant 0 : index
    %c0_15 = arith.constant 0 : index
    %c0_16 = arith.constant 0 : index
    %13 = vector.load %arg6[%c0_14, %c0_15, %c0_16] : memref<2x24x24xf32, #tpu.memory_space<vmem>>, vector<2x24x24xf32>
    tpu.vector_store %arg6[%c0_14, %c0_15, %c0_16], %12 {strides = array<i32>} : memref<2x24x24xf32, #tpu.memory_space<vmem>>, vector<2x24x24xf32>,
    return
  }
  func.func @transform_0(%arg0: i32) -> i32 {
    %c0_i32 = arith.constant 0 : i32
    %c0_i32_0 = arith.constant 0 : i32
    return %c0_i32 : i32
  }
  func.func @transform_1(%arg0: i32) -> (i32, i32, i32) {
    %c0_i32 = arith.constant 0 : i32
    %c0_i32_0 = arith.constant 0 : i32
    %c0_i32_1 = arith.constant 0 : i32
    %c0_i32_2 = arith.constant 0 : i32
    return %c0_i32, %c0_i32_0, %c0_i32_1 : i32, i32, i32
  }
  func.func @transform_2(%arg0: i32) -> (i32, i32, i32) {
    %c0_i32 = arith.constant 0 : i32
    %c0_i32_0 = arith.constant 0 : i32
    %c0_i32_1 = arith.constant 0 : i32
    %c0_i32_2 = arith.constant 0 : i32
    return %c0_i32, %c0_i32_0, %c0_i32_1 : i32, i32, i32
  }
  func.func @transform_3(%arg0: i32) -> (i32, i32, i32) {
    %c0_i32 = arith.constant 0 : i32
    %c0_i32_0 = arith.constant 0 : i32
    %c0_i32_1 = arith.constant 0 : i32
    %c0_i32_2 = arith.constant 0 : i32
    return %c0_i32, %c0_i32_0, %c0_i32_1 : i32, i32, i32
  }
  func.func @transform_4(%arg0: i32) -> (i32, i32, i32) {
    %c0_i32 = arith.constant 0 : i32
    %c0_i32_0 = arith.constant 0 : i32
    %c0_i32_1 = arith.constant 0 : i32
    %c0_i32_2 = arith.constant 0 : i32
    return %c0_i32, %c0_i32_0, %c0_i32_1 : i32, i32, i32
  }
  func.func @transform_5(%arg0: i32) -> (i32, i32, i32) {
    %c0_i32 = arith.constant 0 : i32
    %c0_i32_0 = arith.constant 0 : i32
    %c0_i32_1 = arith.constant 0 : i32
    %c0_i32_2 = arith.constant 0 : i32
    return %c0_i32, %c0_i32_0, %c0_i32_1 : i32, i32, i32
  }
}

</mosaic_0001>

<bundles_post_ra>
// kernel: net2_forward.3
= control target key start
LH: loop header
LB: loop body
LE: loop exit
PB: predicated region body
PF: predicated region fallthrough
CT: control target
= control target key end

     0   :  { %vm33_vm0 = vcmask 1040384   ;;  %vm29_vm1 = vcmask 400384   ;;  %v346_v58 = vmov 0   ;;  %vm280_vm2 = vcmask 277504   ;;  %s563_s2 = inlined_call_operand.vmem [shape: f32[4,49,162], index: 2, kind: input, shape index: {}]   ;;  %s564_s0 = inlined_call_operand.vmem [shape: f32[8,49], index: 0, kind: input, shape index: {}]   ;;  %s565_s1 = inlined_call_operand.vmem [shape: f32[8,1], index: 1, kind: input, shape index: {}]   ;;  %s566_s3 = inlined_call_operand.vmem [shape: f32[8,162], index: 3, kind: output, shape index: {}]  }
   0x1   :  { %v27_v0 = vld [vmem:[%s563_s2 + $0x60] sm:$0x1]  ;;  %v28_v1 = vld [vmem:[%s563_s2 + $0x68] sm:$0x1]  ;;  %v302_v2 = vld [vmem:[%s563_s2 + $0xd0] sm:$0x1]  ;;  %345 = vset.pattern.permute.xlu0 %v346_v58 }
   0x2   :  { %286 = vmatpush.msk.msra.mxu0 %vm33_vm0, %v27_v0  ;;  %288 = vmatpush.msk.msra.mxu1 %vm33_vm0, %v28_v1  ;;  %v303_v3 = vld [vmem:[%s563_s2 + $0xd8] sm:$0x1]  ;;  %v25_v4 = vld [vmem:[%s563_s2 + $0x50] sm:$0xff]  ;;  %v300_v6 = vld [vmem:[%s563_s2 + $0xc0] sm:$0xff] }
   0x3   :  { %v26_v5 = vld [vmem:[%s563_s2 + $0x58] sm:$0xff]  ;;  %304 = vmatpush.msk.msra.mxu2 %vm33_vm0, %v302_v2  ;;  %306 = vmatpush.msk.msra.mxu3 %vm33_vm0, %v303_v3  ;;  %v301_v7 = vld [vmem:[%s563_s2 + $0xc8] sm:$0xff]  ;;  %v23_v8 = vld [vmem:[%s563_s2 + $0x40] sm:$0xff] }
   0x4   :  { %50 = vmatpush.msra.mxu0 %v25_v4  ;;  %70 = vmatpush.msra.mxu1 %v26_v5  ;;  %v24_v9 = vld [vmem:[%s563_s2 + $0x48] sm:$0xff]  ;;  %v298_v10 = vld [vmem:[%s563_s2 + $0xb0] sm:$0xff]  ;;  %v299_v11 = vld [vmem:[%s563_s2 + $0xb8] sm:$0xff] }
   0x5   :  { %111 = vmatpush.msra.mxu2 %v300_v6  ;;  %131 = vmatpush.msra.mxu3 %v301_v7  ;;  %v21_v12 = vld [vmem:[%s563_s2 + $0x30] sm:$0xff]  ;;  %v22_v13 = vld [vmem:[%s563_s2 + $0x38] sm:$0xff]  ;;  %v296_v14 = vld [vmem:[%s563_s2 + $0xa0] sm:$0xff] }
   0x6   :  { %51 = vmatpush.msra.mxu0 %v23_v8  ;;  %71 = vmatpush.msra.mxu1 %v24_v9  ;;  %v297_v15 = vld [vmem:[%s563_s2 + $0xa8] sm:$0xff]  ;;  %v19_v16 = vld [vmem:[%s563_s2 + $0x20] sm:$0xff]  ;;  %v294_v18 = vld [vmem:[%s563_s2 + $0x90] sm:$0xff] }
   0x7   :  { %112 = vmatpush.msra.mxu2 %v298_v10  ;;  %132 = vmatpush.msra.mxu3 %v299_v11  ;;  %v20_v17 = vld [vmem:[%s563_s2 + $0x28] sm:$0xff]  ;;  %v295_v19 = vld [vmem:[%s563_s2 + $0x98] sm:$0xff]  ;;  %v17_v20 = vld [vmem:[%s563_s2 + $0x10] sm:$0xff] }
   0x8   :  { %52 = vmatpush.msra.mxu0 %v21_v12  ;;  %72 = vmatpush.msra.mxu1 %v22_v13  ;;  %v18_v21 = vld [vmem:[%s563_s2 + $0x18] sm:$0xff]  ;;  %v292_v22 = vld [vmem:[%s563_s2 + $0x80] sm:$0xff]  ;;  %v293_v23 = vld [vmem:[%s563_s2 + $0x88] sm:$0xff] }
   0x9   :  { %113 = vmatpush.msra.mxu2 %v296_v14  ;;  %133 = vmatpush.msra.mxu3 %v297_v15  ;;  %v15_v24 = vld [vmem:[%s563_s2] sm:$0xff]  ;;  %v16_v25 = vld [vmem:[%s563_s2 + $0x8] sm:$0xff]  ;;  %v290_v26 = vld [vmem:[%s563_s2 + $0x70] sm:$0xff] }
   0xa   :  { %53 = vmatpush.msra.mxu0 %v19_v16  ;;  %73 = vmatpush.msra.mxu1 %v20_v17  ;;  %v291_v27 = vld [vmem:[%s563_s2 + $0x78] sm:$0xff]  ;;  %v320_v28 = vld [vmem:[%s563_s2 + $0x140] sm:$0x1]  ;;  %v321_v29 = vld [vmem:[%s563_s2 + $0x148] sm:$0x1] }
   0xb   :  { %114 = vmatpush.msra.mxu2 %v294_v18  ;;  %134 = vmatpush.msra.mxu3 %v295_v19  ;;  %v338_v30 = vld [vmem:[%s563_s2 + $0x1b0] sm:$0x1]  ;;  %v339_v31 = vld [vmem:[%s563_s2 + $0x1b8] sm:$0x1]  ;;  %v336_v34 = vld [vmem:[%s563_s2 + $0x1a0] sm:$0xff] }
   0xc   :  { %54 = vmatpush.msra.mxu0 %v17_v20  ;;  %74 = vmatpush.msra.mxu1 %v18_v21  ;;  %v318_v32 = vld [vmem:[%s563_s2 + $0x130] sm:$0xff]  ;;  %v319_v33 = vld [vmem:[%s563_s2 + $0x138] sm:$0xff]  ;;  %v337_v35 = vld [vmem:[%s563_s2 + $0x1a8] sm:$0xff] }
   0xd   :  { %115 = vmatpush.msra.mxu2 %v292_v22  ;;  %135 = vmatpush.msra.mxu3 %v293_v23  ;;  %v14_v36 = vld [vmem:[%s564_s0] sm:$0xff]  ;;  %v317_v38 = vld [vmem:[%s563_s2 + $0x128] sm:$0xff]  ;;  %v334_v39 = vld [vmem:[%s563_s2 + $0x190] sm:$0xff] }
   0xe   :  { %55 = vmatpush.msra.mxu0 %v15_v24  ;;  %75 = vmatpush.msra.mxu1 %v16_v25  ;;  %v316_v37 = vld [vmem:[%s563_s2 + $0x120] sm:$0xff]  ;;  %v335_v40 = vld [vmem:[%s563_s2 + $0x198] sm:$0xff]  ;;  %v314_v41 = vld [vmem:[%s563_s2 + $0x110] sm:$0xff] }
   0xf   :  { %116 = vmatpush.msra.mxu2 %v290_v26  ;;  %136 = vmatpush.msra.mxu3 %v291_v27  ;;  %v315_v42 = vld [vmem:[%s563_s2 + $0x118] sm:$0xff]  ;;  %v332_v43 = vld [vmem:[%s563_s2 + $0x180] sm:$0xff]  ;;  %v333_v44 = vld [vmem:[%s563_s2 + $0x188] sm:$0xff] }
  0x10   :  { %322 = vmatpush.msk.msrb.mxu0 %vm33_vm0, %v320_v28  ;;  %324 = vmatpush.msk.msrb.mxu1 %vm33_vm0, %v321_v29  ;;  %v312_v45 = vld [vmem:[%s563_s2 + $0x100] sm:$0xff]  ;;  %v313_v46 = vld [vmem:[%s563_s2 + $0x108] sm:$0xff]  ;;  %v330_v47 = vld [vmem:[%s563_s2 + $0x170] sm:$0xff] }
  0x11   :  { %340 = vmatpush.msk.msrb.mxu2 %vm33_vm0, %v338_v30  ;;  %342 = vmatpush.msk.msrb.mxu3 %vm33_vm0, %v339_v31  ;;  %v331_v48 = vld [vmem:[%s563_s2 + $0x178] sm:$0xff]  ;;  %v310_v49 = vld [vmem:[%s563_s2 + $0xf0] sm:$0xff]  ;;  %v328_v51 = vld [vmem:[%s563_s2 + $0x160] sm:$0xff] }
  0x12   :  { %174 = vmatpush.msrb.mxu0 %v318_v32  ;;  %194 = vmatpush.msrb.mxu1 %v319_v33  ;;  %v311_v50 = vld [vmem:[%s563_s2 + $0xf8] sm:$0xff]  ;;  %v329_v52 = vld [vmem:[%s563_s2 + $0x168] sm:$0xff]  ;;  %v308_v53 = vld [vmem:[%s563_s2 + $0xe0] sm:$0xff] }
  0x13   :  { %237 = vmatpush.msrb.mxu2 %v336_v34  ;;  %257 = vmatpush.msrb.mxu3 %v337_v35  ;;  %v309_v54 = vld [vmem:[%s563_s2 + $0xe8] sm:$0xff]  ;;  %v326_v55 = vld [vmem:[%s563_s2 + $0x150] sm:$0xff]  ;;  %v327_v56 = vld [vmem:[%s563_s2 + $0x158] sm:$0xff] }
  0x14   :  { %305 = vmatmul.msk.f32.vlgmr.msra.gmra.mxu2 %vm29_vm1, %v14_v36  ;;  %307 = vmatmul.msk.f32.vlgmr.msra.gmra.mxu3 %vm29_vm1, %v14_v36  ;;  %v269_v57 = vld [vmem:[%s565_s1] sm:$0xff] }
  0x15   :  { %175 = vmatpush.msrb.mxu0 %v316_v37  ;;  %195 = vmatpush.msrb.mxu1 %v317_v38 }
  0x16   :  { %238 = vmatpush.msrb.mxu2 %v334_v39  ;;  %258 = vmatpush.msrb.mxu3 %v335_v40 }
  0x17   :  { %287 = vmatmul.msk.f32.vlgmr.msra.gmra.mxu0 %vm29_vm1, %v14_v36  ;;  %289 = vmatmul.msk.f32.vlgmr.msra.gmra.mxu1 %vm29_vm1, %v14_v36 }
  0x18   :  { %176 = vmatpush.msrb.mxu0 %v314_v41  ;;  %196 = vmatpush.msrb.mxu1 %v315_v42 }
  0x19   :  { %239 = vmatpush.msrb.mxu2 %v332_v43  ;;  %259 = vmatpush.msrb.mxu3 %v333_v44 }
  0x1a   :  { %177 = vmatpush.msrb.mxu0 %v312_v45  ;;  %197 = vmatpush.msrb.mxu1 %v313_v46 }
  0x1b   :  { %240 = vmatpush.msrb.mxu2 %v330_v47  ;;  %260 = vmatpush.msrb.mxu3 %v331_v48 }
  0x1c   :  { %178 = vmatpush.msrb.mxu0 %v310_v49  ;;  %198 = vmatpush.msrb.mxu1 %v311_v50 }
  0x1d   :  { %241 = vmatpush.msrb.mxu2 %v328_v51  ;;  %261 = vmatpush.msrb.mxu3 %v329_v52 }
  0x1e   :  { %179 = vmatpush.msrb.mxu0 %v308_v53  ;;  %199 = vmatpush.msrb.mxu1 %v309_v54 }
  0x1f   :  { %242 = vmatpush.msrb.mxu2 %v326_v55  ;;  %262 = vmatpush.msrb.mxu3 %v327_v56 }
  0x20   :  { %323 = vmatmul.msk.f32.vlgmr.msrb.gmra.mxu0 %vm29_vm1, %v14_v36  ;;  %325 = vmatmul.msk.f32.vlgmr.msrb.gmra.mxu1 %vm29_vm1, %v14_v36 }
  0x21   :  { %341 = vmatmul.msk.f32.vlgmr.msrb.gmra.mxu2 %vm29_vm1, %v14_v36  ;;  %343 = vmatmul.msk.f32.vlgmr.msrb.gmra.mxu3 %vm29_vm1, %v14_v36 }
  0x22   :  { %272 = vperm.xlu0 %345, %v269_v57  }
  0x94   :  { %v57_v59 = vpop.f32.mrf.mxu0  ;;  %v77_v60 = vpop.f32.mrf.mxu1 }
  0x95   :  { %v273_v5 = vpop.permute.xlu0 %272 }
  0x97   :  { %v118_v61 = vpop.f32.mrf.mxu2  ;;  %v138_v62 = vpop.f32.mrf.mxu3 }
  0x98   :  { %v141_v1 = vmax.f32 %v57_v59, %v118_v61  ;;  %v142_v2 = vmax.f32 %v77_v60, %v138_v62 }
  0x9d   :  { %v181_v63 = vpop.f32.mrf.mxu0  ;;  %v201_v0 = vpop.f32.mrf.mxu1 }
  0x9e   :  { %v204_v3 = vmax.f32 %v141_v1, %v181_v63  ;;  %v205_v4 = vmax.f32 %v142_v2, %v201_v0 }
  0xa4   :  { %v244_v6 = vpop.f32.mrf.mxu2  ;;  %v264_v7 = vpop.f32.mrf.mxu3 }
  0xa5   :  { %v267_v8 = vmax.f32 %v204_v3, %v244_v6  ;;  %v268_v9 = vmax.f32 %v205_v4, %v264_v7 }
  0xa7   :  { %v275_v10 = vadd.f32 %v273_v5, %v267_v8  ;;  %v276_v11 = vadd.f32 %v273_v5, %v268_v9 }
  0xa9   :  { %v277_v12 = vmax.f32 %v275_v10, 0.0  ;;  %v278_v13 = vmax.f32 %v276_v11, 0.0 }
  0xab   :  { %279 = vst [vmem:[%s566_s3] sm:$0xff] %v277_v12 }
  0xac   :  { %281 = vst.msk [vmem:[%s566_s3 + $0x8] sm:$0xff] %vm280_vm2, %v278_v13 }

// kernel: net2_forward.5
= control target key start
LH: loop header
LB: loop body
LE: loop exit
PB: predicated region body
PF: predicated region fallthrough
CT: control target
= control target key end

     0   :  { %vm35_vm0 = vcmask 195584   ;;  %s407_s0 = inlined_call_operand.<no memory space> [shape: f32[1], index: 0, kind: input, shape index: {}]   ;;  %s408_s1 = inlined_call_operand.vmem [shape: f32[2,24,24], index: 1, kind: input, shape index: {}]   ;;  %s409_s2 = inlined_call_operand.vmem [shape: f32[2,24,24], index: 2, kind: input, shape index: {}]   ;;  %s410_s3 = inlined_call_operand.vmem [shape: f32[2,24,24], index: 3, kind: input, shape index: {}]   ;;  %s411_s4 = inlined_call_operand.vmem [shape: f32[2,24,24], index: 4, kind: input, shape index: {}]   ;;  %s412_s5 = inlined_call_operand.hbm [shape: f32[2,24,24], index: 5, kind: output, shape index: {}]  }
   0x1   :  { %v31_v0 = vld [vmem:[%s409_s2 + $0x10] sm:$0xff]  ;;  %v34_v1 = vld [vmem:[%s409_s2 + $0x28] sm:$0xff]  ;;  %v33_v3 = vld [vmem:[%s409_s2 + $0x20] sm:$0xff] }
   0x2   :  { %v30_v2 = vld [vmem:[%s409_s2 + $0x8] sm:$0xff]  ;;  %58 = vmatpush.msra.mxu0 %v31_v0  ;;  %93 = vmatpush.msra.mxu1 %v34_v1  ;;  %v29_v4 = vld [vmem:[%s409_s2] sm:$0xff]  ;;  %v32_v5 = vld [vmem:[%s409_s2 + $0x18] sm:$0xff] }
   0x3   :  { %v23_v6 = vld [vmem:[%s408_s1] sm:$0xff]  ;;  %v26_v7 = vld [vmem:[%s408_s1 + $0x18] sm:$0xff]  ;;  %v108_v8 = vld [vmem:[%s410_s3 + $0x10] sm:$0xff] }
   0x4   :  { %59 = vmatpush.msra.mxu0 %v30_v2  ;;  %94 = vmatpush.msra.mxu1 %v33_v3  ;;  %v111_v9 = vld [vmem:[%s410_s3 + $0x28] sm:$0xff] }
   0x6   :  { %60 = vmatpush.msra.mxu0 %v29_v4  ;;  %95 = vmatpush.msra.mxu1 %v32_v5 }
   0x7   :  { %11 = vsyncpa [#allocation4], 0  ;;  %237 = vmatmul.msk.f32.vlgmr.msra.gmra.mxu0 %vm35_vm0, %v23_v6  ;;  %240 = vmatmul.msk.f32.vlgmr.msra.gmra.mxu1 %vm35_vm0, %v26_v7  ;;  %v107_v10 = vld [vmem:[%s410_s3 + $0x8] sm:$0xff]  ;;  %v110_v11 = vld [vmem:[%s410_s3 + $0x20] sm:$0xff]  ;;  %v200_v28 = vstv %s407_s0  ;;  %s278_s13 = smov [#allocation3]   ;;  %s279_s17 = smov 128  }
   0x8   :  { %134 = vmatpush.msra.mxu2 %v108_v8  ;;  %169 = vmatpush.msra.mxu3 %v111_v9  ;;  %v24_v12 = vld [vmem:[%s408_s1 + $0x8] sm:$0xff]  ;;  %v27_v13 = vld [vmem:[%s408_s1 + $0x20] sm:$0xff]  ;;  %v25_v14 = vld [vmem:[%s408_s1 + $0x10] sm:$0xff]  ;;  %s223_s14 = sshll.u32 %s278_s13, 4  ;;  %s280_s18 = smov 8   ;;  %s224_s14 = int_to_ptr.vmem [resolvable:$true] %s223_s14 }
   0x9   :  { %v28_v15 = vld [vmem:[%s408_s1 + $0x28] sm:$0xff]  ;;  %v106_v16 = vld [vmem:[%s410_s3] sm:$0xff]  ;;  %v109_v17 = vld [vmem:[%s410_s3 + $0x18] sm:$0xff] }
   0xa   :  { %135 = vmatpush.msra.mxu2 %v107_v10  ;;  %170 = vmatpush.msra.mxu3 %v110_v11  ;;  %v182_v24 = vld [vmem:[%s411_s4] sm:$0xff]  ;;  %v185_v25 = vld [vmem:[%s411_s4 + $0x18] sm:$0xff]  ;;  %v183_v33 = vld [vmem:[%s411_s4 + $0x8] sm:$0xff] }
   0xb   :  { %v194_v26 = vsub.f32 1.0, %v182_v24  ;;  %v197_v27 = vsub.f32 1.0, %v185_v25  ;;  %v186_v34 = vld [vmem:[%s411_s4 + $0x20] sm:$0xff]  ;;  %v195_v39 = vsub.f32 1.0, %v183_v33  ;;  %v184_v45 = vld [vmem:[%s411_s4 + $0x10] sm:$0xff]  ;;  %v187_v46 = vld [vmem:[%s411_s4 + $0x28] sm:$0xff] }
   0xc   :  { %136 = vmatpush.msra.mxu2 %v106_v16  ;;  %171 = vmatpush.msra.mxu3 %v109_v17  ;;  %v198_v40 = vsub.f32 1.0, %v186_v34  ;;  %v196_v51 = vsub.f32 1.0, %v184_v45  ;;  %v199_v52 = vsub.f32 1.0, %v187_v46  ;;  %s225_s4 = sshll.u32 %s412_s5, 4  ;;  %s226_s4 = int_to_ptr.hbm [resolvable:$true] %s225_s4 }
   0xd   :  { %v201_v29 = vmul.f32 %v200_v28, %v194_v26  ;;  %v204_v30 = vmul.f32 %v200_v28, %v197_v27  ;;  %v202_v41 = vmul.f32 %v200_v28, %v195_v39 }
   0xe   :  { %v205_v42 = vmul.f32 %v200_v28, %v198_v40  ;;  %v203_v53 = vmul.f32 %v200_v28, %v196_v51  ;;  %v206_v54 = vmul.f32 %v200_v28, %v199_v52 }
   0xf   :  { %238 = vmatmul.msk.f32.gmra.mxu0 %vm35_vm0, %v24_v12  ;;  %241 = vmatmul.msk.f32.gmra.mxu1 %vm35_vm0, %v27_v13 }
  0x17   :  { %239 = vmatmul.msk.f32.gmra.mxu0 %vm35_vm0, %v25_v14  ;;  %242 = vmatmul.msk.f32.gmra.mxu1 %vm35_vm0, %v28_v15 }
  0x84   :  { %v62_v18 = vpop.f32.mrf.mxu0  ;;  %v97_v19 = vpop.f32.mrf.mxu1 }
  0x85   :  { %243 = vmatmul.msk.f32.vlgmr.msra.gmra.mxu2 %vm35_vm0, %v62_v18  ;;  %246 = vmatmul.msk.f32.vlgmr.msra.gmra.mxu3 %vm35_vm0, %v97_v19 }
  0x8c   :  { %v65_v20 = vpop.f32.mrf.mxu0  ;;  %v100_v21 = vpop.f32.mrf.mxu1 }
  0x8d   :  { %244 = vmatmul.msk.f32.gmra.mxu2 %vm35_vm0, %v65_v20  ;;  %247 = vmatmul.msk.f32.gmra.mxu3 %vm35_vm0, %v100_v21 }
  0x94   :  { %v68_v22 = vpop.f32.mrf.mxu0  ;;  %v103_v23 = vpop.f32.mrf.mxu1 }
  0x95   :  { %245 = vmatmul.msk.f32.gmra.mxu2 %vm35_vm0, %v68_v22  ;;  %248 = vmatmul.msk.f32.gmra.mxu3 %vm35_vm0, %v103_v23 }
 0x108   :  { %v138_v31 = vpop.f32.mrf.mxu2  ;;  %v173_v32 = vpop.f32.mrf.mxu3 }
 0x109   :  { %v188_v35 = vmul.f32 %v182_v24, %v138_v31  ;;  %v191_v36 = vmul.f32 %v185_v25, %v173_v32 }
 0x10b   :  { %v207_v37 = vadd.f32 %v201_v29, %v188_v35  ;;  %v210_v38 = vadd.f32 %v204_v30, %v191_v36 }
 0x10d   :  { %213 = vst.msk [vmem:[#allocation3] sm:$0xff] %vm35_vm0, %v207_v37 }
 0x10e   :  { %216 = vst.msk [vmem:[#allocation3 + $0x18] sm:$0xff] %vm35_vm0, %v210_v38 }
 0x110   :  { %v141_v43 = vpop.f32.mrf.mxu2  ;;  %v176_v44 = vpop.f32.mrf.mxu3 }
 0x111   :  { %v189_v47 = vmul.f32 %v183_v33, %v141_v43  ;;  %v192_v48 = vmul.f32 %v186_v34, %v176_v44 }
 0x113   :  { %v208_v49 = vadd.f32 %v202_v41, %v189_v47  ;;  %v211_v50 = vadd.f32 %v205_v42, %v192_v48 }
 0x115   :  { %214 = vst.msk [vmem:[#allocation3 + $0x8] sm:$0xff] %vm35_vm0, %v208_v49 }
 0x116   :  { %217 = vst.msk [vmem:[#allocation3 + $0x20] sm:$0xff] %vm35_vm0, %v211_v50 }
 0x118   :  { %v144_v55 = vpop.f32.mrf.mxu2  ;;  %v179_v56 = vpop.f32.mrf.mxu3 }
 0x119   :  { %v190_v57 = vmul.f32 %v184_v45, %v144_v55  ;;  %v193_v58 = vmul.f32 %v187_v46, %v179_v56 }
 0x11b   :  { %v209_v59 = vadd.f32 %v203_v53, %v190_v57  ;;  %v212_v60 = vadd.f32 %v206_v54, %v193_v58 }
 0x11d   :  { %215 = vst.msk [vmem:[#allocation3 + $0x10] sm:$0xff] %vm35_vm0, %v209_v59 }
 0x11e   :  { %218 = vst.msk [vmem:[#allocation3 + $0x28] sm:$0xff] %vm35_vm0, %v212_v60 }
 0x11f   :  { %231 = dma.vmem_to_hbm [thread:$0]  %s224_s14, 768, %s226_s4, [#allocation4], %s279_s17, %s279_s17, %s280_s18  }
 0x120   :  { %276 = dma.done.wait [#allocation4], 768  }
 0x121   :  { %277 = vsyncadd [#allocation4], 4294966528 }
 0x122   :  { %236 = vsyncpa [#allocation4], 1 }

// kernel: net2_forward.4
= control target key start
LH: loop header
LB: loop body
LE: loop exit
PB: predicated region body
PF: predicated region fallthrough
CT: control target
= control target key end

     0   :  { %v3120_v3 = vmov 0   ;;  %vm233_vm0 = vcmask 64512   ;;  %vm1707_vm1 = vcmask 326656   ;;  %vm2920_vm2 = vcmask 261120   ;;  %s5821_s0 = inlined_call_operand.vmem [shape: f32[648,2], index: 0, kind: input, shape index: {}]   ;;  %s5822_s2 = inlined_call_operand.vmem [shape: f32[40,1], index: 2, kind: input, shape index: {}]   ;;  %s5823_s4 = inlined_call_operand.vmem [shape: f32[1024,1], index: 4, kind: input, shape index: {}]   ;;  %s5824_s1 = inlined_call_operand.vmem [shape: f32[160,648], index: 1, kind: input, shape index: {}]   ;;  %s5825_s6 = inlined_call_operand.vmem [shape: f32[32,1], index: 6, kind: input, shape index: {}]   ;;  %s5826_s8 = inlined_call_operand.vmem [shape: f32[4,1], index: 8, kind: input, shape index: {}]   ;;  %s5827_s3 = inlined_call_operand.vmem [shape: f32[1024,40], index: 3, kind: input, shape index: {}]   ;;  %s5828_s5 = inlined_call_operand.vmem [shape: f32[32,1024], index: 5, kind: input, shape index: {}]   ;;  %s5829_s7 = inlined_call_operand.vmem [shape: f32[4,32], index: 7, kind: input, shape index: {}]   ;;  %s5830_s9 = inlined_call_operand.vmem [shape: f32[4,2], index: 9, kind: output, shape index: {}]  }
   0x1   :  { %v47_v0 = vld [vmem:[%s5821_s0 + $0x78] sm:$0xff]  ;;  %3117 = vset.pattern.permute.xlu0 %v3120_v3  ;;  %3118 = vset.pattern.permute.xlu1 %v3120_v3  ;;  %v775_v4 = vld [vmem:[%s5822_s2 + $0x20] sm:$0xff]  ;;  %v46_v5 = vld [vmem:[%s5821_s0 + $0x70] sm:$0xff]  ;;  %vm2946_vm3 = vcmask 11264  }
   0x2   :  { %v63_v1 = vld [vmem:[%s5821_s0 + $0xf8] sm:$0xff]  ;;  %294 = vmatpush.msra.mxu0 %v47_v0  ;;  %v62_v6 = vld [vmem:[%s5821_s0 + $0xf0] sm:$0xff]  ;;  %798 = vperm.xlu0 %3117, %v775_v4   ;;  %v45_v9 = vld [vmem:[%s5821_s0 + $0x68] sm:$0xff] }
   0x3   :  { %v79_v2 = vld [vmem:[%s5821_s0 + $0x178] sm:$0xff]  ;;  %371 = vmatpush.msra.mxu1 %v63_v1  ;;  %v78_v7 = vld [vmem:[%s5821_s0 + $0x170] sm:$0xff]  ;;  %v61_v10 = vld [vmem:[%s5821_s0 + $0xe8] sm:$0xff]  ;;  %3119 = vset.pattern.permute.xlu2 %v3120_v3 }
   0x4   :  { %448 = vmatpush.msra.mxu2 %v79_v2  ;;  %v95_v8 = vld [vmem:[%s5821_s0 + $0x1f8] sm:$0xff]  ;;  %295 = vmatpush.msra.mxu0 %v46_v5  ;;  %v77_v11 = vld [vmem:[%s5821_s0 + $0x168] sm:$0xff]  ;;  %v94_v12 = vld [vmem:[%s5821_s0 + $0x1f0] sm:$0xff] }
   0x5   :  { %372 = vmatpush.msra.mxu1 %v62_v6  ;;  %525 = vmatpush.msra.mxu3 %v95_v8  ;;  %v44_v13 = vld [vmem:[%s5821_s0 + $0x60] sm:$0xff]  ;;  %v93_v16 = vld [vmem:[%s5821_s0 + $0x1e8] sm:$0xff]  ;;  %v43_v17 = vld [vmem:[%s5821_s0 + $0x58] sm:$0xff] }
   0x6   :  { %449 = vmatpush.msra.mxu2 %v78_v7  ;;  %v60_v14 = vld [vmem:[%s5821_s0 + $0xe0] sm:$0xff]  ;;  %296 = vmatpush.msra.mxu0 %v45_v9  ;;  %v59_v18 = vld [vmem:[%s5821_s0 + $0xd8] sm:$0xff]  ;;  %v42_v22 = vld [vmem:[%s5821_s0 + $0x50] sm:$0xff] }
   0x7   :  { %373 = vmatpush.msra.mxu1 %v61_v10  ;;  %v76_v15 = vld [vmem:[%s5821_s0 + $0x160] sm:$0xff]  ;;  %526 = vmatpush.msra.mxu3 %v94_v12  ;;  %v75_v19 = vld [vmem:[%s5821_s0 + $0x158] sm:$0xff]  ;;  %v58_v23 = vld [vmem:[%s5821_s0 + $0xd0] sm:$0xff] }
   0x8   :  { %450 = vmatpush.msra.mxu2 %v77_v11  ;;  %297 = vmatpush.msra.mxu0 %v44_v13  ;;  %v92_v20 = vld [vmem:[%s5821_s0 + $0x1e0] sm:$0xff]  ;;  %v774_v21 = vld [vmem:[%s5822_s2 + $0x18] sm:$0xff]  ;;  %v74_v24 = vld [vmem:[%s5821_s0 + $0x150] sm:$0xff] }
   0x9   :  { %374 = vmatpush.msra.mxu1 %v60_v14  ;;  %527 = vmatpush.msra.mxu3 %v93_v16  ;;  %v91_v25 = vld [vmem:[%s5821_s0 + $0x1d8] sm:$0xff]  ;;  %v41_v26 = vld [vmem:[%s5821_s0 + $0x48] sm:$0xff]  ;;  %v90_v29 = vld [vmem:[%s5821_s0 + $0x1d0] sm:$0xff] }
   0xa   :  { %451 = vmatpush.msra.mxu2 %v76_v15  ;;  %298 = vmatpush.msra.mxu0 %v43_v17  ;;  %v57_v27 = vld [vmem:[%s5821_s0 + $0xc8] sm:$0xff]  ;;  %v773_v30 = vld [vmem:[%s5822_s2 + $0x10] sm:$0xff]  ;;  %v40_v31 = vld [vmem:[%s5821_s0 + $0x40] sm:$0xff] }
   0xb   :  { %375 = vmatpush.msra.mxu1 %v59_v18  ;;  %528 = vmatpush.msra.mxu3 %v92_v20  ;;  %v73_v28 = vld [vmem:[%s5821_s0 + $0x148] sm:$0xff]  ;;  %v56_v32 = vld [vmem:[%s5821_s0 + $0xc0] sm:$0xff]  ;;  %v39_v35 = vld [vmem:[%s5821_s0 + $0x38] sm:$0xff] }
   0xc   :  { %452 = vmatpush.msra.mxu2 %v75_v19  ;;  %793 = vperm.xlu0 %3117, %v774_v21   ;;  %v72_v33 = vld [vmem:[%s5821_s0 + $0x140] sm:$0xff]  ;;  %v89_v34 = vld [vmem:[%s5821_s0 + $0x1c8] sm:$0xff]  ;;  %v55_v36 = vld [vmem:[%s5821_s0 + $0xb8] sm:$0xff] }
   0xd   :  { %299 = vmatpush.msra.mxu0 %v42_v22  ;;  %376 = vmatpush.msra.mxu1 %v58_v23  ;;  %v71_v37 = vld [vmem:[%s5821_s0 + $0x138] sm:$0xff]  ;;  %v88_v38 = vld [vmem:[%s5821_s0 + $0x1c0] sm:$0xff]  ;;  %v940_v39 = vld [vmem:[%s5823_s4 + $0x8] sm:$0xff] }
   0xe   :  { %453 = vmatpush.msra.mxu2 %v74_v24  ;;  %529 = vmatpush.msra.mxu3 %v91_v25  ;;  %v38_v40 = vld [vmem:[%s5821_s0 + $0x30] sm:$0xff]  ;;  %v87_v43 = vld [vmem:[%s5821_s0 + $0x1b8] sm:$0xff]  ;;  %v37_v44 = vld [vmem:[%s5821_s0 + $0x28] sm:$0xff] }
   0xf   :  { %300 = vmatpush.msra.mxu0 %v41_v26  ;;  %377 = vmatpush.msra.mxu1 %v57_v27  ;;  %v54_v41 = vld [vmem:[%s5821_s0 + $0xb0] sm:$0xff]  ;;  %v53_v45 = vld [vmem:[%s5821_s0 + $0xa8] sm:$0xff]  ;;  %v36_v49 = vld [vmem:[%s5821_s0 + $0x20] sm:$0xff] }
  0x10   :  { %454 = vmatpush.msra.mxu2 %v73_v28  ;;  %530 = vmatpush.msra.mxu3 %v90_v29  ;;  %v70_v42 = vld [vmem:[%s5821_s0 + $0x130] sm:$0xff]  ;;  %v69_v46 = vld [vmem:[%s5821_s0 + $0x128] sm:$0xff]  ;;  %v52_v50 = vld [vmem:[%s5821_s0 + $0xa0] sm:$0xff] }
  0x11   :  { %788 = vperm.xlu1 %3118, %v773_v30   ;;  %301 = vmatpush.msra.mxu0 %v40_v31  ;;  %v86_v47 = vld [vmem:[%s5821_s0 + $0x1b0] sm:$0xff]  ;;  %v772_v48 = vld [vmem:[%s5822_s2 + $0x8] sm:$0xff]  ;;  %v68_v51 = vld [vmem:[%s5821_s0 + $0x120] sm:$0xff] }
  0x12   :  { %378 = vmatpush.msra.mxu1 %v56_v32  ;;  %455 = vmatpush.msra.mxu2 %v72_v33  ;;  %v85_v52 = vld [vmem:[%s5821_s0 + $0x1a8] sm:$0xff]  ;;  %v35_v53 = vld [vmem:[%s5821_s0 + $0x18] sm:$0xff]  ;;  %v84_v56 = vld [vmem:[%s5821_s0 + $0x1a0] sm:$0xff] }
  0x13   :  { %531 = vmatpush.msra.mxu3 %v89_v34  ;;  %302 = vmatpush.msra.mxu0 %v39_v35  ;;  %v51_v54 = vld [vmem:[%s5821_s0 + $0x98] sm:$0xff]  ;;  %v943_v57 = vld [vmem:[%s5823_s4 + $0x20] sm:$0xff]  ;;  %v34_v58 = vld [vmem:[%s5821_s0 + $0x10] sm:$0xff] }
  0x14   :  { %379 = vmatpush.msra.mxu1 %v55_v36  ;;  %456 = vmatpush.msra.mxu2 %v71_v37  ;;  %v67_v55 = vld [vmem:[%s5821_s0 + $0x118] sm:$0xff]  ;;  %v50_v59 = vld [vmem:[%s5821_s0 + $0x90] sm:$0xff]  ;;  %v33_v62 = vld [vmem:[%s5821_s0 + $0x8] sm:$0xff] }
  0x15   :  { %532 = vmatpush.msra.mxu3 %v88_v38  ;;  %1074 = vperm.xlu0 %3117, %v940_v39   ;;  %v66_v60 = vld [vmem:[%s5821_s0 + $0x110] sm:$0xff]  ;;  %v83_v61 = vld [vmem:[%s5821_s0 + $0x198] sm:$0xff]  ;;  %v49_v63 = vld [vmem:[%s5821_s0 + $0x88] sm:$0xff] }
  0x16   :  { %303 = vmatpush.msra.mxu0 %v38_v40  ;;  %380 = vmatpush.msra.mxu1 %v54_v41  ;;  %v65_v0 = vld [vmem:[%s5821_s0 + $0x108] sm:$0xff]  ;;  %v82_v1 = vld [vmem:[%s5821_s0 + $0x190] sm:$0xff]  ;;  %v32_v4 = vld [vmem:[%s5821_s0] sm:$0xff] }
  0x17   :  { %457 = vmatpush.msra.mxu2 %v70_v42  ;;  %533 = vmatpush.msra.mxu3 %v87_v43  ;;  %v941_v2 = vld [vmem:[%s5823_s4 + $0x10] sm:$0xff]  ;;  %v48_v5 = vld [vmem:[%s5821_s0 + $0x80] sm:$0xff]  ;;  %v81_v7 = vld [vmem:[%s5821_s0 + $0x188] sm:$0xff] }
  0x18   :  { %304 = vmatpush.msra.mxu0 %v37_v44  ;;  %381 = vmatpush.msra.mxu1 %v53_v45  ;;  %v64_v6 = vld [vmem:[%s5821_s0 + $0x100] sm:$0xff]  ;;  %v114_v9 = vld [vmem:[%s5824_s1 + $0x8] sm:$0xff]  ;;  %v115_v10 = vld [vmem:[%s5824_s1 + $0x10] sm:$0xff] }
  0x19   :  { %458 = vmatpush.msra.mxu2 %v69_v46  ;;  %534 = vmatpush.msra.mxu3 %v86_v47  ;;  %v113_v8 = vld [vmem:[%s5824_s1] sm:$0xff]  ;;  %v116_v12 = vld [vmem:[%s5824_s1 + $0x18] sm:$0xff]  ;;  %v944_v15 = vld [vmem:[%s5823_s4 + $0x28] sm:$0xff] }
  0x1a   :  { %783 = vperm.xlu1 %3118, %v772_v48   ;;  %305 = vmatpush.msra.mxu0 %v36_v49  ;;  %v80_v11 = vld [vmem:[%s5821_s0 + $0x180] sm:$0xff]  ;;  %v946_v13 = vld [vmem:[%s5823_s4 + $0x38] sm:$0xff]  ;;  %v119_v16 = vld [vmem:[%s5824_s1 + $0x30] sm:$0xff] }
  0x1b   :  { %382 = vmatpush.msra.mxu1 %v52_v50  ;;  %459 = vmatpush.msra.mxu2 %v68_v51  ;;  %v771_v14 = vld [vmem:[%s5822_s2] sm:$0xff]  ;;  %v120_v17 = vld [vmem:[%s5824_s1 + $0x38] sm:$0xff]  ;;  %v122_v19 = vld [vmem:[%s5824_s1 + $0x48] sm:$0xff] }
  0x1c   :  { %535 = vmatpush.msra.mxu3 %v85_v52  ;;  %306 = vmatpush.msra.mxu0 %v35_v53  ;;  %v121_v18 = vld [vmem:[%s5824_s1 + $0x40] sm:$0xff]  ;;  %v949_v3 = vld [vmem:[%s5823_s4 + $0x50] sm:$0xff]  ;;  %v126_v23 = vld [vmem:[%s5824_s1 + $0x68] sm:$0xff] }
  0x1d   :  { %383 = vmatpush.msra.mxu1 %v51_v54  ;;  %460 = vmatpush.msra.mxu2 %v67_v55  ;;  %v939_v20 = vld [vmem:[%s5823_s4] sm:$0xff]  ;;  %v127_v24 = vld [vmem:[%s5824_s1 + $0x70] sm:$0xff]  ;;  %v128_v25 = vld [vmem:[%s5824_s1 + $0x78] sm:$0xff] }
  0x1e   :  { %536 = vmatpush.msra.mxu3 %v84_v56  ;;  %1089 = vperm.xlu0 %3117, %v943_v57   ;;  %v947_v21 = vld [vmem:[%s5823_s4 + $0x40] sm:$0xff]  ;;  %v952_v26 = vld [vmem:[%s5823_s4 + $0x68] sm:$0xff]  ;;  %v942_v27 = vld [vmem:[%s5823_s4 + $0x18] sm:$0xff] }
  0x1f   :  { %307 = vmatpush.msra.mxu0 %v34_v58  ;;  %384 = vmatpush.msra.mxu1 %v50_v59  ;;  %v125_v22 = vld [vmem:[%s5824_s1 + $0x60] sm:$0xff]  ;;  %v950_v28 = vld [vmem:[%s5823_s4 + $0x58] sm:$0xff]  ;;  %v131_v29 = vld [vmem:[%s5824_s1 + $0x90] sm:$0xff] }
  0x20   :  { %461 = vmatpush.msra.mxu2 %v66_v60  ;;  %537 = vmatpush.msra.mxu3 %v83_v61  ;;  %v132_v30 = vld [vmem:[%s5824_s1 + $0x98] sm:$0xff]  ;;  %v133_v31 = vld [vmem:[%s5824_s1 + $0xa0] sm:$0xff]  ;;  %v134_v32 = vld [vmem:[%s5824_s1 + $0xa8] sm:$0xff] }
  0x21   :  { %308 = vmatpush.msra.mxu0 %v33_v62  ;;  %385 = vmatpush.msra.mxu1 %v49_v63  ;;  %v955_v33 = vld [vmem:[%s5823_s4 + $0x80] sm:$0xff]  ;;  %v945_v34 = vld [vmem:[%s5823_s4 + $0x30] sm:$0xff]  ;;  %v138_v37 = vld [vmem:[%s5824_s1 + $0xc8] sm:$0xff] }
  0x22   :  { %462 = vmatpush.msra.mxu2 %v65_v0  ;;  %538 = vmatpush.msra.mxu3 %v82_v1  ;;  %v953_v35 = vld [vmem:[%s5823_s4 + $0x70] sm:$0xff]  ;;  %v137_v36 = vld [vmem:[%s5824_s1 + $0xc0] sm:$0xff]  ;;  %v140_v39 = vld [vmem:[%s5824_s1 + $0xd8] sm:$0xff] }
  0x23   :  { %1079 = vperm.xlu1 %3118, %v941_v2   ;;  %309 = vmatpush.msra.mxu0 %v32_v4  ;;  %v139_v38 = vld [vmem:[%s5824_s1 + $0xd0] sm:$0xff]  ;;  %v958_v40 = vld [vmem:[%s5823_s4 + $0x98] sm:$0xff]  ;;  %v948_v41 = vld [vmem:[%s5823_s4 + $0x48] sm:$0xff] }
  0x24   :  { %386 = vmatpush.msra.mxu1 %v48_v5  ;;  %463 = vmatpush.msra.mxu2 %v64_v6  ;;  %v956_v42 = vld [vmem:[%s5823_s4 + $0x88] sm:$0xff]  ;;  %v143_v43 = vld [vmem:[%s5824_s1 + $0xf0] sm:$0xff]  ;;  %v144_v44 = vld [vmem:[%s5824_s1 + $0xf8] sm:$0xff] }
  0x25   :  { %539 = vmatpush.msra.mxu3 %v81_v7  ;;  %310 = vmatmul.f32.vlgmr.msra.gmra.mxu0 %v113_v8  ;;  %v145_v45 = vld [vmem:[%s5824_s1 + $0x100] sm:$0xff]  ;;  %v146_v46 = vld [vmem:[%s5824_s1 + $0x108] sm:$0xff]  ;;  %v961_v47 = vld [vmem:[%s5823_s4 + $0xb0] sm:$0xff] }
  0x26   :  { %387 = vmatmul.f32.vlgmr.msra.gmra.mxu1 %v114_v9  ;;  %464 = vmatmul.f32.vlgmr.msra.gmra.mxu2 %v115_v10  ;;  %v951_v48 = vld [vmem:[%s5823_s4 + $0x60] sm:$0xff]  ;;  %v150_v51 = vld [vmem:[%s5824_s1 + $0x128] sm:$0xff]  ;;  %v151_v52 = vld [vmem:[%s5824_s1 + $0x130] sm:$0xff] }
  0x27   :  { %540 = vmatpush.msra.mxu3 %v80_v11  ;;  %1104 = vperm.xlu0 %3117, %v946_v13   ;;  %v959_v49 = vld [vmem:[%s5823_s4 + $0xa0] sm:$0xff]  ;;  %v152_v53 = vld [vmem:[%s5824_s1 + $0x138] sm:$0xff]  ;;  %v964_v54 = vld [vmem:[%s5823_s4 + $0xc8] sm:$0xff] }
  0x28   :  { %541 = vmatmul.f32.vlgmr.msra.gmra.mxu3 %v116_v12  ;;  %778 = vperm.xlu2 %3119, %v771_v14   ;;  %v149_v50 = vld [vmem:[%s5824_s1 + $0x120] sm:$0xff]  ;;  %v954_v55 = vld [vmem:[%s5823_s4 + $0x78] sm:$0xff]  ;;  %v155_v57 = vld [vmem:[%s5824_s1 + $0x150] sm:$0xff] }
  0x29   :  { %v962_v56 = vld [vmem:[%s5823_s4 + $0xb8] sm:$0xff]  ;;  %v157_v59 = vld [vmem:[%s5824_s1 + $0x160] sm:$0xff]  ;;  %v158_v60 = vld [vmem:[%s5824_s1 + $0x168] sm:$0xff] }
  0x2a   :  { %v156_v58 = vld [vmem:[%s5824_s1 + $0x158] sm:$0xff]  ;;  %v967_v61 = vld [vmem:[%s5823_s4 + $0xe0] sm:$0xff]  ;;  %v957_v62 = vld [vmem:[%s5823_s4 + $0x90] sm:$0xff] }
  0x2b   :  { %1094 = vperm.xlu1 %3118, %v944_v15   ;;  %v965_v63 = vld [vmem:[%s5823_s4 + $0xd0] sm:$0xff]  ;;  %v161_v0 = vld [vmem:[%s5824_s1 + $0x180] sm:$0xff]  ;;  %v162_v1 = vld [vmem:[%s5824_s1 + $0x188] sm:$0xff] }
  0x2c   :  { %v163_v2 = vld [vmem:[%s5824_s1 + $0x190] sm:$0xff]  ;;  %v164_v4 = vld [vmem:[%s5824_s1 + $0x198] sm:$0xff]  ;;  %v960_v6 = vld [vmem:[%s5823_s4 + $0xa8] sm:$0xff] }
  0x2d   :  { %313 = vmatmul.f32.gmra.mxu0 %v119_v16  ;;  %v970_v5 = vld [vmem:[%s5823_s4 + $0xf8] sm:$0xff]  ;;  %v968_v7 = vld [vmem:[%s5823_s4 + $0xe8] sm:$0xff]  ;;  %v167_v8 = vld [vmem:[%s5824_s1 + $0x1b0] sm:$0xff] }
  0x2e   :  { %390 = vmatmul.f32.gmra.mxu1 %v120_v17  ;;  %467 = vmatmul.f32.gmra.mxu2 %v121_v18  ;;  %v168_v9 = vld [vmem:[%s5824_s1 + $0x1b8] sm:$0xff]  ;;  %v169_v10 = vld [vmem:[%s5824_s1 + $0x1c0] sm:$0xff]  ;;  %v170_v11 = vld [vmem:[%s5824_s1 + $0x1c8] sm:$0xff] }
  0x2f   :  { %1119 = vperm.xlu0 %3117, %v949_v3   ;;  %v973_v12 = vld [vmem:[%s5823_s4 + $0x110] sm:$0xff]  ;;  %v963_v13 = vld [vmem:[%s5823_s4 + $0xc0] sm:$0xff]  ;;  %v174_v16 = vld [vmem:[%s5824_s1 + $0x1e8] sm:$0xff] }
  0x30   :  { %544 = vmatmul.f32.gmra.mxu3 %v122_v19  ;;  %1069 = vperm.xlu2 %3119, %v939_v20   ;;  %v971_v14 = vld [vmem:[%s5823_s4 + $0x100] sm:$0xff]  ;;  %v175_v17 = vld [vmem:[%s5824_s1 + $0x1f0] sm:$0xff]  ;;  %v176_v18 = vld [vmem:[%s5824_s1 + $0x1f8] sm:$0xff] }
  0x31   :  { %v173_v15 = vld [vmem:[%s5824_s1 + $0x1e0] sm:$0xff]  ;;  %v976_v19 = vld [vmem:[%s5823_s4 + $0x128] sm:$0xff]  ;;  %v966_v3 = vld [vmem:[%s5823_s4 + $0xd8] sm:$0xff] }
  0x32   :  { %v974_v20 = vld [vmem:[%s5823_s4 + $0x118] sm:$0xff] }
  0x33   :  { %1109 = vperm.xlu1 %3118, %v947_v21   ;;  %v179_v21 = vld [vmem:[%s5824_s1 + $0x210] sm:$0xff] }
  0x35   :  { %316 = vmatmul.f32.gmra.mxu0 %v125_v22  ;;  %v180_v22 = vld [vmem:[%s5824_s1 + $0x218] sm:$0xff] }
  0x36   :  { %393 = vmatmul.f32.gmra.mxu1 %v126_v23  ;;  %470 = vmatmul.f32.gmra.mxu2 %v127_v24  ;;  %v181_v23 = vld [vmem:[%s5824_s1 + $0x220] sm:$0xff]  ;;  %v182_v24 = vld [vmem:[%s5824_s1 + $0x228] sm:$0xff] }
  0x37   :  { %1134 = vperm.xlu0 %3117, %v952_v26   ;;  %v969_v26 = vld [vmem:[%s5823_s4 + $0xf0] sm:$0xff] }
  0x38   :  { %547 = vmatmul.f32.gmra.mxu3 %v128_v25  ;;  %1084 = vperm.xlu2 %3119, %v942_v27   ;;  %v979_v25 = vld [vmem:[%s5823_s4 + $0x140] sm:$0xff]  ;;  %v977_v27 = vld [vmem:[%s5823_s4 + $0x130] sm:$0xff] }
  0x3b   :  { %1124 = vperm.xlu1 %3118, %v950_v28   ;;  %v185_v28 = vld [vmem:[%s5824_s1 + $0x240] sm:$0xff] }
  0x3d   :  { %319 = vmatmul.f32.gmra.mxu0 %v131_v29  ;;  %v186_v29 = vld [vmem:[%s5824_s1 + $0x248] sm:$0xff] }
  0x3e   :  { %396 = vmatmul.f32.gmra.mxu1 %v132_v30  ;;  %473 = vmatmul.f32.gmra.mxu2 %v133_v31  ;;  %v187_v30 = vld [vmem:[%s5824_s1 + $0x250] sm:$0xff]  ;;  %v188_v31 = vld [vmem:[%s5824_s1 + $0x258] sm:$0xff] }
  0x3f   :  { %1149 = vperm.xlu0 %3117, %v955_v33   ;;  %v972_v33 = vld [vmem:[%s5823_s4 + $0x108] sm:$0xff] }
  0x40   :  { %550 = vmatmul.f32.gmra.mxu3 %v134_v32  ;;  %1099 = vperm.xlu2 %3119, %v945_v34   ;;  %v982_v32 = vld [vmem:[%s5823_s4 + $0x158] sm:$0xff] }
  0x41   :  { %v111_v34 = vld [vmem:[%s5821_s0 + $0x278] sm:$0xff] }
  0x42   :  { %602 = vmatpush.msrb.mxu0 %v111_v34  ;;  %v990_v34 = vld [vmem:[%s5823_s4 + $0x198] sm:$0xff] }
  0x43   :  { %1139 = vperm.xlu1 %3118, %v953_v35   ;;  %v980_v35 = vld [vmem:[%s5823_s4 + $0x148] sm:$0xff] }
  0x45   :  { %322 = vmatmul.f32.gmra.mxu0 %v137_v36  ;;  %v191_v36 = vld [vmem:[%s5824_s1 + $0x270] sm:$0xff] }
  0x46   :  { %399 = vmatmul.f32.gmra.mxu1 %v138_v37  ;;  %476 = vmatmul.f32.gmra.mxu2 %v139_v38  ;;  %v192_v37 = vld [vmem:[%s5824_s1 + $0x278] sm:$0xff]  ;;  %v110_v38 = vld [vmem:[%s5821_s0 + $0x270] sm:$0xff] }
  0x47   :  { %1164 = vperm.xlu0 %3117, %v958_v40   ;;  %603 = vmatpush.msrb.mxu0 %v110_v38  ;;  %v194_v40 = vld [vmem:[%s5824_s1 + $0x288] sm:$0xff]  ;;  %v227_v38 = vld [vmem:[%s5824_s1 + $0x390] sm:$0xff] }
  0x48   :  { %553 = vmatmul.f32.gmra.mxu3 %v140_v39  ;;  %1114 = vperm.xlu2 %3119, %v948_v41   ;;  %v193_v39 = vld [vmem:[%s5824_s1 + $0x280] sm:$0xff]  ;;  %v985_v41 = vld [vmem:[%s5823_s4 + $0x170] sm:$0xff] }
  0x4b   :  { %1154 = vperm.xlu1 %3118, %v956_v42   ;;  %v109_v42 = vld [vmem:[%s5821_s0 + $0x268] sm:$0xff] }
  0x4c   :  { %604 = vmatpush.msrb.mxu0 %v109_v42  ;;  %v1003_v42 = vld [vmem:[%s5823_s4 + $0x200] sm:$0xff] }
  0x4d   :  { %325 = vmatmul.f32.gmra.mxu0 %v143_v43  ;;  %v108_v43 = vld [vmem:[%s5821_s0 + $0x260] sm:$0xff] }
  0x4e   :  { %402 = vmatmul.f32.gmra.mxu1 %v144_v44  ;;  %479 = vmatmul.f32.gmra.mxu2 %v145_v45  ;;  %v975_v44 = vld [vmem:[%s5823_s4 + $0x120] sm:$0xff] }
  0x4f   :  { %1179 = vperm.xlu0 %3117, %v961_v47   ;;  %v983_v45 = vld [vmem:[%s5823_s4 + $0x160] sm:$0xff]  ;;  %605 = vmatpush.msrb.mxu0 %v108_v43  ;;  %v993_v43 = vld [vmem:[%s5823_s4 + $0x1b0] sm:$0xff] }
  0x50   :  { %556 = vmatmul.f32.gmra.mxu3 %v146_v46  ;;  %1129 = vperm.xlu2 %3119, %v951_v48   ;;  %v107_v46 = vld [vmem:[%s5821_s0 + $0x258] sm:$0xff]  ;;  %v197_v47 = vld [vmem:[%s5824_s1 + $0x2a0] sm:$0xff]  ;;  %v198_v48 = vld [vmem:[%s5824_s1 + $0x2a8] sm:$0xff] }
  0x51   :  { %606 = vmatpush.msrb.mxu0 %v107_v46 }
  0x53   :  { %1169 = vperm.xlu1 %3118, %v959_v49   ;;  %v106_v49 = vld [vmem:[%s5821_s0 + $0x250] sm:$0xff] }
  0x54   :  { %607 = vmatpush.msrb.mxu0 %v106_v49  ;;  %v1017_v49 = vld [vmem:[%s5823_s4 + $0x270] sm:$0xff] }
  0x55   :  { %328 = vmatmul.f32.gmra.mxu0 %v149_v50  ;;  %v199_v50 = vld [vmem:[%s5824_s1 + $0x2b0] sm:$0xff] }
  0x56   :  { %405 = vmatmul.f32.gmra.mxu1 %v150_v51  ;;  %482 = vmatmul.f32.gmra.mxu2 %v151_v52  ;;  %v200_v51 = vld [vmem:[%s5824_s1 + $0x2b8] sm:$0xff]  ;;  %v988_v52 = vld [vmem:[%s5823_s4 + $0x188] sm:$0xff] }
  0x57   :  { %1194 = vperm.xlu0 %3117, %v964_v54   ;;  %v104_v54 = vld [vmem:[%s5821_s0 + $0x240] sm:$0xff] }
  0x58   :  { %559 = vmatmul.f32.gmra.mxu3 %v152_v53  ;;  %1144 = vperm.xlu2 %3119, %v954_v55   ;;  %v105_v53 = vld [vmem:[%s5821_s0 + $0x248] sm:$0xff]  ;;  %v978_v55 = vld [vmem:[%s5823_s4 + $0x138] sm:$0xff] }
  0x59   :  { %608 = vmatpush.msrb.mxu0 %v105_v53 }
  0x5b   :  { %1184 = vperm.xlu1 %3118, %v962_v56   ;;  %v986_v56 = vld [vmem:[%s5823_s4 + $0x178] sm:$0xff]  ;;  %609 = vmatpush.msrb.mxu0 %v104_v54  ;;  %v123_v54 = vld [vmem:[%s5824_s1 + $0x50] sm:$0xff] }
  0x5d   :  { %331 = vmatmul.f32.gmra.mxu0 %v155_v57  ;;  %v103_v57 = vld [vmem:[%s5821_s0 + $0x238] sm:$0xff] }
  0x5e   :  { %408 = vmatmul.f32.gmra.mxu1 %v156_v58  ;;  %485 = vmatmul.f32.gmra.mxu2 %v157_v59  ;;  %v203_v58 = vld [vmem:[%s5824_s1 + $0x2d0] sm:$0xff]  ;;  %v204_v59 = vld [vmem:[%s5824_s1 + $0x2d8] sm:$0xff] }
  0x5f   :  { %1209 = vperm.xlu0 %3117, %v967_v61   ;;  %610 = vmatpush.msrb.mxu0 %v103_v57  ;;  %v205_v61 = vld [vmem:[%s5824_s1 + $0x2e0] sm:$0xff] }
  0x60   :  { %562 = vmatmul.f32.gmra.mxu3 %v158_v60  ;;  %1159 = vperm.xlu2 %3119, %v957_v62   ;;  %v102_v60 = vld [vmem:[%s5821_s0 + $0x230] sm:$0xff]  ;;  %v206_v62 = vld [vmem:[%s5824_s1 + $0x2e8] sm:$0xff]  ;;  %v999_v57 = vld [vmem:[%s5823_s4 + $0x1e0] sm:$0xff] }
  0x61   :  { %611 = vmatpush.msrb.mxu0 %v102_v60 }
  0x63   :  { %1199 = vperm.xlu1 %3118, %v965_v63   ;;  %v991_v63 = vld [vmem:[%s5823_s4 + $0x1a0] sm:$0xff] }
  0x65   :  { %334 = vmatmul.f32.gmra.mxu0 %v161_v0  ;;  %v101_v0 = vld [vmem:[%s5821_s0 + $0x228] sm:$0xff] }
  0x66   :  { %411 = vmatmul.f32.gmra.mxu1 %v162_v1  ;;  %488 = vmatmul.f32.gmra.mxu2 %v163_v2  ;;  %v100_v1 = vld [vmem:[%s5821_s0 + $0x220] sm:$0xff]  ;;  %v981_v2 = vld [vmem:[%s5823_s4 + $0x150] sm:$0xff] }
  0x67   :  { %1224 = vperm.xlu0 %3117, %v970_v5   ;;  %612 = vmatpush.msrb.mxu0 %v101_v0  ;;  %v989_v5 = vld [vmem:[%s5823_s4 + $0x190] sm:$0xff]  ;;  %v1000_v0 = vld [vmem:[%s5823_s4 + $0x1e8] sm:$0xff] }
  0x68   :  { %565 = vmatmul.f32.gmra.mxu3 %v164_v4  ;;  %1174 = vperm.xlu2 %3119, %v960_v6   ;;  %v112_v4 = vld [vmem:[%s5821_s0 + $0x280] sm:$0xff]  ;;  %v99_v6 = vld [vmem:[%s5821_s0 + $0x218] sm:$0xff] }
  0x69   :  { %613 = vmatpush.msrb.mxu0 %v100_v1  ;;  %694 = vmatpush.msrb.mxu1 %v112_v4  ;;  %v1013_v1 = vld [vmem:[%s5823_s4 + $0x250] sm:$0xff] }
  0x6b   :  { %1214 = vperm.xlu1 %3118, %v968_v7   ;;  %614 = vmatpush.msrb.mxu0 %v99_v6  ;;  %v136_v6 = vld [vmem:[%s5824_s1 + $0xb8] sm:$0xff] }
  0x6d   :  { %337 = vmatmul.f32.gmra.mxu0 %v167_v8 }
  0x6e   :  { %414 = vmatmul.f32.gmra.mxu1 %v168_v9  ;;  %491 = vmatmul.f32.gmra.mxu2 %v169_v10  ;;  %v209_v9 = vld [vmem:[%s5824_s1 + $0x300] sm:$0xff]  ;;  %v210_v10 = vld [vmem:[%s5824_s1 + $0x308] sm:$0xff] }
  0x6f   :  { %1239 = vperm.xlu0 %3117, %v973_v12   ;;  %v211_v12 = vld [vmem:[%s5824_s1 + $0x310] sm:$0xff] }
  0x70   :  { %568 = vmatmul.f32.gmra.mxu3 %v170_v11  ;;  %1189 = vperm.xlu2 %3119, %v963_v13   ;;  %v98_v11 = vld [vmem:[%s5821_s0 + $0x210] sm:$0xff]  ;;  %v212_v13 = vld [vmem:[%s5824_s1 + $0x318] sm:$0xff] }
  0x71   :  { %615 = vmatpush.msrb.mxu0 %v98_v11  ;;  %v1010_v11 = vld [vmem:[%s5823_s4 + $0x238] sm:$0xff] }
  0x73   :  { %1229 = vperm.xlu1 %3118, %v971_v14   ;;  %v994_v14 = vld [vmem:[%s5823_s4 + $0x1b8] sm:$0xff] }
  0x75   :  { %340 = vmatmul.f32.gmra.mxu0 %v173_v15  ;;  %v97_v15 = vld [vmem:[%s5821_s0 + $0x208] sm:$0xff] }
  0x76   :  { %417 = vmatmul.f32.gmra.mxu1 %v174_v16  ;;  %494 = vmatmul.f32.gmra.mxu2 %v175_v17  ;;  %v96_v16 = vld [vmem:[%s5821_s0 + $0x200] sm:$0xff]  ;;  %v984_v17 = vld [vmem:[%s5823_s4 + $0x168] sm:$0xff] }
  0x77   :  { %1254 = vperm.xlu0 %3117, %v976_v19   ;;  %616 = vmatpush.msrb.mxu0 %v97_v15  ;;  %v142_v15 = vld [vmem:[%s5824_s1 + $0xe8] sm:$0xff] }
  0x78   :  { %571 = vmatmul.f32.gmra.mxu3 %v176_v18  ;;  %1204 = vperm.xlu2 %3119, %v966_v3   ;;  %v992_v18 = vld [vmem:[%s5823_s4 + $0x1a8] sm:$0xff] }
  0x79   :  { %617 = vmatpush.msrb.mxu0 %v96_v16  ;;  %v1005_v16 = vld [vmem:[%s5823_s4 + $0x210] sm:$0xff] }
  0x7b   :  { %1244 = vperm.xlu1 %3118, %v974_v20   ;;  %v215_v20 = vld [vmem:[%s5824_s1 + $0x330] sm:$0xff] }
  0x7d   :  { %343 = vmatmul.f32.gmra.mxu0 %v179_v21  ;;  %v216_v21 = vld [vmem:[%s5824_s1 + $0x338] sm:$0xff] }
  0x7e   :  { %420 = vmatmul.f32.gmra.mxu1 %v180_v22  ;;  %497 = vmatmul.f32.gmra.mxu2 %v181_v23  ;;  %v217_v22 = vld [vmem:[%s5824_s1 + $0x340] sm:$0xff]  ;;  %v218_v23 = vld [vmem:[%s5824_s1 + $0x348] sm:$0xff] }
  0x7f   :  { %1269 = vperm.xlu0 %3117, %v979_v25   ;;  %v987_v25 = vld [vmem:[%s5823_s4 + $0x180] sm:$0xff] }
  0x80   :  { %574 = vmatmul.f32.gmra.mxu3 %v182_v24  ;;  %1219 = vperm.xlu2 %3119, %v969_v26   ;;  %v997_v24 = vld [vmem:[%s5823_s4 + $0x1d0] sm:$0xff]  ;;  %v995_v26 = vld [vmem:[%s5823_s4 + $0x1c0] sm:$0xff] }
  0x83   :  { %1259 = vperm.xlu1 %3118, %v977_v27  }
  0x85   :  { %346 = vmatmul.f32.gmra.mxu0 %v185_v28 }
  0x86   :  { %423 = vmatmul.f32.gmra.mxu1 %v186_v29  ;;  %500 = vmatmul.f32.gmra.mxu2 %v187_v30  ;;  %v221_v29 = vld [vmem:[%s5824_s1 + $0x360] sm:$0xff]  ;;  %v222_v30 = vld [vmem:[%s5824_s1 + $0x368] sm:$0xff] }
  0x87   :  { %1284 = vperm.xlu0 %3117, %v982_v32   ;;  %v224_v32 = vld [vmem:[%s5824_s1 + $0x378] sm:$0xff] }
  0x88   :  { %577 = vmatmul.f32.gmra.mxu3 %v188_v31  ;;  %1234 = vperm.xlu2 %3119, %v972_v33   ;;  %v223_v31 = vld [vmem:[%s5824_s1 + $0x370] sm:$0xff]  ;;  %v1002_v33 = vld [vmem:[%s5823_s4 + $0x1f8] sm:$0xff] }
  0x8b   :  { %1274 = vperm.xlu1 %3118, %v980_v35   ;;  %v998_v35 = vld [vmem:[%s5823_s4 + $0x1d8] sm:$0xff] }
  0x8d   :  { %349 = vmatmul.f32.gmra.mxu0 %v191_v36 }
  0x8e   :  { %426 = vmatmul.f32.gmra.mxu1 %v192_v37  ;;  %503 = vmatmul.f32.gmra.mxu2 %v193_v39  ;;  %v228_v39 = vld [vmem:[%s5824_s1 + $0x398] sm:$0xff] }
  0x8f   :  { %1299 = vperm.xlu0 %3117, %v985_v41   ;;  %v230_v41 = vld [vmem:[%s5824_s1 + $0x3a8] sm:$0xff] }
  0x90   :  { %580 = vmatmul.f32.gmra.mxu3 %v194_v40  ;;  %1249 = vperm.xlu2 %3119, %v975_v44   ;;  %v229_v40 = vld [vmem:[%s5824_s1 + $0x3a0] sm:$0xff]  ;;  %v1001_v44 = vld [vmem:[%s5823_s4 + $0x1f0] sm:$0xff] }
  0x93   :  { %1289 = vperm.xlu1 %3118, %v983_v45  }
  0x95   :  { %352 = vmatmul.f32.gmra.mxu0 %v197_v47  ;;  %v117_v47 = vld [vmem:[%s5824_s1 + $0x20] sm:$0xff] }
  0x96   :  { %429 = vmatmul.f32.gmra.mxu1 %v198_v48  ;;  %506 = vmatmul.f32.gmra.mxu2 %v199_v50  ;;  %v118_v48 = vld [vmem:[%s5824_s1 + $0x28] sm:$0xff] }
  0x97   :  { %1314 = vperm.xlu0 %3117, %v988_v52   ;;  %v996_v50 = vld [vmem:[%s5823_s4 + $0x1c8] sm:$0xff] }
  0x98   :  { %583 = vmatmul.f32.gmra.mxu3 %v200_v51  ;;  %1264 = vperm.xlu2 %3119, %v978_v55   ;;  %v1004_v51 = vld [vmem:[%s5823_s4 + $0x208] sm:$0xff]  ;;  %v124_v55 = vld [vmem:[%s5824_s1 + $0x58] sm:$0xff] }
  0x9b   :  { %1304 = vperm.xlu1 %3118, %v986_v56   ;;  %v1014_v56 = vld [vmem:[%s5823_s4 + $0x258] sm:$0xff] }
  0x9d   :  { %355 = vmatmul.f32.gmra.mxu0 %v203_v58  ;;  %v1016_v58 = vld [vmem:[%s5823_s4 + $0x268] sm:$0xff] }
  0x9e   :  { %432 = vmatmul.f32.gmra.mxu1 %v204_v59  ;;  %509 = vmatmul.f32.gmra.mxu2 %v205_v61  ;;  %v129_v61 = vld [vmem:[%s5824_s1 + $0x80] sm:$0xff] }
  0x9f   :  { %1329 = vperm.xlu0 %3117, %v991_v63   ;;  %v1011_v63 = vld [vmem:[%s5823_s4 + $0x240] sm:$0xff] }
  0xa0   :  { %586 = vmatmul.f32.gmra.mxu3 %v206_v62  ;;  %1279 = vperm.xlu2 %3119, %v981_v2   ;;  %v130_v62 = vld [vmem:[%s5824_s1 + $0x88] sm:$0xff] }
  0xa2   :  { %v3765_v7 = vpop.f32.mrf.mxu0 }
  0xa3   :  { %v3767_v8 = vpop.f32.mrf.mxu1  ;;  %1319 = vperm.xlu1 %3118, %v989_v5   ;;  %v135_v5 = vld [vmem:[%s5824_s1 + $0xb0] sm:$0xff] }
  0xa5   :  { %358 = vmatmul.f32.gmra.mxu0 %v209_v9  ;;  %v1008_v9 = vld [vmem:[%s5823_s4 + $0x228] sm:$0xff] }
  0xa6   :  { %435 = vmatmul.f32.gmra.mxu1 %v210_v10  ;;  %512 = vmatmul.f32.gmra.mxu2 %v211_v12  ;;  %v1018_v10 = vld [vmem:[%s5823_s4 + $0x278] sm:$0xff] }
  0xa7   :  { %1344 = vperm.xlu0 %3117, %v994_v14   ;;  %v141_v14 = vld [vmem:[%s5824_s1 + $0xe0] sm:$0xff] }
  0xa8   :  { %589 = vmatmul.f32.gmra.mxu3 %v212_v13  ;;  %1294 = vperm.xlu2 %3119, %v984_v17   ;;  %v1015_v17 = vld [vmem:[%s5823_s4 + $0x260] sm:$0xff] }
  0xaa   :  { %v3799_v19 = vpop.f32.mrf.mxu0 }
  0xab   :  { %v3801_v3 = vpop.f32.mrf.mxu1  ;;  %1334 = vperm.xlu1 %3118, %v992_v18   ;;  %v1007_v18 = vld [vmem:[%s5823_s4 + $0x220] sm:$0xff] }
  0xad   :  { %361 = vmatmul.f32.gmra.mxu0 %v215_v20 }
  0xae   :  { %438 = vmatmul.f32.gmra.mxu1 %v216_v21  ;;  %515 = vmatmul.f32.gmra.mxu2 %v217_v22  ;;  %v147_v22 = vld [vmem:[%s5824_s1 + $0x110] sm:$0xff] }
  0xaf   :  { %1359 = vperm.xlu0 %3117, %v997_v24   ;;  %v1065_v24 = vld [vmem:[%s5823_s4 + $0x3f0] sm:$0xff] }
  0xb0   :  { %592 = vmatmul.f32.gmra.mxu3 %v218_v23  ;;  %1309 = vperm.xlu2 %3119, %v987_v25   ;;  %v148_v23 = vld [vmem:[%s5824_s1 + $0x118] sm:$0xff]  ;;  %v1012_v25 = vld [vmem:[%s5823_s4 + $0x248] sm:$0xff] }
  0xb2   :  { %v3824_v27 = vpop.f32.mrf.mxu0 }
  0xb3   :  { %v3826_v28 = vpop.f32.mrf.mxu1  ;;  %1349 = vperm.xlu1 %3118, %v995_v26   ;;  %v1066_v26 = vld [vmem:[%s5823_s4 + $0x3f8] sm:$0xff] }
  0xb5   :  { %364 = vmatmul.f32.gmra.mxu0 %v221_v29 }
  0xb6   :  { %441 = vmatmul.f32.gmra.mxu1 %v222_v30  ;;  %518 = vmatmul.f32.gmra.mxu2 %v223_v31  ;;  %v153_v31 = vld [vmem:[%s5824_s1 + $0x140] sm:$0xff] }
  0xb7   :  { %1384 = vperm.xlu0 %3117, %v1002_v33   ;;  %v1064_v33 = vld [vmem:[%s5823_s4 + $0x3e8] sm:$0xff] }
  0xb8   :  { %595 = vmatmul.f32.gmra.mxu3 %v224_v32  ;;  %1324 = vperm.xlu2 %3119, %v990_v34   ;;  %v154_v32 = vld [vmem:[%s5824_s1 + $0x148] sm:$0xff]  ;;  %v1009_v34 = vld [vmem:[%s5823_s4 + $0x230] sm:$0xff] }
  0xba   :  { %v3849_v36 = vpop.f32.mrf.mxu0 }
  0xbb   :  { %v3851_v37 = vpop.f32.mrf.mxu1  ;;  %1364 = vperm.xlu1 %3118, %v998_v35   ;;  %v1033_v35 = vld [vmem:[%s5823_s4 + $0x2f0] sm:$0xff] }
  0xbd   :  { %367 = vmatmul.f32.gmra.mxu0 %v227_v38 }
  0xbe   :  { %444 = vmatmul.f32.gmra.mxu1 %v228_v39  ;;  %521 = vmatmul.f32.gmra.mxu2 %v229_v40  ;;  %v159_v40 = vld [vmem:[%s5824_s1 + $0x170] sm:$0xff] }
  0xbf   :  { %1389 = vperm.xlu0 %3117, %v1003_v42   ;;  %v1063_v42 = vld [vmem:[%s5823_s4 + $0x3e0] sm:$0xff] }
  0xc0   :  { %598 = vmatmul.f32.gmra.mxu3 %v230_v41  ;;  %1339 = vperm.xlu2 %3119, %v993_v43   ;;  %v160_v41 = vld [vmem:[%s5824_s1 + $0x178] sm:$0xff] }
  0xc1   :  { %v1006_v43 = vld [vmem:[%s5823_s4 + $0x218] sm:$0xff] }
  0xc2   :  { %v3874_v45 = vpop.f32.mrf.mxu0 }
  0xc3   :  { %v3876_v46 = vpop.f32.mrf.mxu1  ;;  %1379 = vperm.xlu1 %3118, %v1001_v44   ;;  %v1032_v44 = vld [vmem:[%s5823_s4 + $0x2e8] sm:$0xff] }
  0xc5   :  { %618 = vmatmul.f32.vlgmr.msrb.gmra.mxu0 %v117_v47 }
  0xc6   :  { %2952 = vmatmul.msk.f32.vlgmr.msrb.gmra.mxu1 %vm233_vm0, %v118_v48 }
  0xc7   :  { %1459 = vperm.xlu0 %3117, %v1017_v49   ;;  %v165_v49 = vld [vmem:[%s5824_s1 + $0x1a0] sm:$0xff] }
  0xc8   :  { %1354 = vperm.xlu2 %3119, %v996_v50   ;;  %v166_v50 = vld [vmem:[%s5824_s1 + $0x1a8] sm:$0xff] }
  0xca   :  { %v3894_v52 = vpop.f32.mrf.mxu0 }
  0xcb   :  { %v3896_v53 = vpop.f32.mrf.mxu1  ;;  %1394 = vperm.xlu1 %3118, %v1004_v51   ;;  %v1062_v51 = vld [vmem:[%s5823_s4 + $0x3d8] sm:$0xff] }
  0xcd   :  { %621 = vmatmul.f32.gmra.mxu0 %v123_v54  ;;  %v1034_v54 = vld [vmem:[%s5823_s4 + $0x2f8] sm:$0xff] }
  0xce   :  { %2953 = vmatmul.msk.f32.gmra.mxu1 %vm233_vm0, %v124_v55  ;;  %v1031_v55 = vld [vmem:[%s5823_s4 + $0x2e0] sm:$0xff] }
  0xcf   :  { %1444 = vperm.xlu0 %3117, %v1014_v56  }
  0xd0   :  { %1369 = vperm.xlu2 %3119, %v999_v57  }
  0xd2   :  { %v3914_v59 = vpop.f32.mrf.mxu0 }
  0xd3   :  { %v3916_v60 = vpop.f32.mrf.mxu1  ;;  %1454 = vperm.xlu1 %3118, %v1016_v58   ;;  %v171_v58 = vld [vmem:[%s5824_s1 + $0x1d0] sm:$0xff] }
  0xd5   :  { %624 = vmatmul.f32.gmra.mxu0 %v129_v61  ;;  %v172_v61 = vld [vmem:[%s5824_s1 + $0x1d8] sm:$0xff] }
  0xd6   :  { %2954 = vmatmul.msk.f32.gmra.mxu1 %vm233_vm0, %v130_v62  ;;  %v1061_v62 = vld [vmem:[%s5823_s4 + $0x3d0] sm:$0xff] }
  0xd7   :  { %1429 = vperm.xlu0 %3117, %v1011_v63   ;;  %v1050_v63 = vld [vmem:[%s5823_s4 + $0x378] sm:$0xff] }
  0xd8   :  { %1374 = vperm.xlu2 %3119, %v1000_v0   ;;  %v4071_v0 = vpop.f32.mrf.mxu2 }
  0xda   :  { %v3934_v2 = vpop.f32.mrf.mxu0 }
  0xdb   :  { %v3936_v4 = vpop.f32.mrf.mxu1  ;;  %1439 = vperm.xlu1 %3118, %v1013_v1   ;;  %v1030_v1 = vld [vmem:[%s5823_s4 + $0x2d8] sm:$0xff] }
  0xdd   :  { %627 = vmatmul.f32.gmra.mxu0 %v135_v5 }
  0xde   :  { %2955 = vmatmul.msk.f32.gmra.mxu1 %vm233_vm0, %v136_v6 }
  0xdf   :  { %1414 = vperm.xlu0 %3117, %v1008_v9   ;;  %v177_v9 = vld [vmem:[%s5824_s1 + $0x200] sm:$0xff] }
  0xe0   :  { %1464 = vperm.xlu2 %3119, %v1018_v10   ;;  %v178_v10 = vld [vmem:[%s5824_s1 + $0x208] sm:$0xff] }
  0xe2   :  { %v3954_v12 = vpop.f32.mrf.mxu0 }
  0xe3   :  { %v3956_v13 = vpop.f32.mrf.mxu1  ;;  %1424 = vperm.xlu1 %3118, %v1010_v11   ;;  %v4086_v11 = vpop.f32.mrf.mxu3 }
  0xe5   :  { %630 = vmatmul.f32.gmra.mxu0 %v141_v14  ;;  %v1060_v14 = vld [vmem:[%s5823_s4 + $0x3c8] sm:$0xff] }
  0xe6   :  { %2956 = vmatmul.msk.f32.gmra.mxu1 %vm233_vm0, %v142_v15  ;;  %v1049_v15 = vld [vmem:[%s5823_s4 + $0x370] sm:$0xff] }
  0xe7   :  { %1399 = vperm.xlu0 %3117, %v1005_v16   ;;  %v1029_v16 = vld [vmem:[%s5823_s4 + $0x2d0] sm:$0xff] }
  0xe8   :  { %1449 = vperm.xlu2 %3119, %v1015_v17   ;;  %v4098_v17 = vpop.f32.mrf.mxu2 }
  0xea   :  { %v3974_v20 = vpop.f32.mrf.mxu0 }
  0xeb   :  { %v3976_v21 = vpop.f32.mrf.mxu1  ;;  %1409 = vperm.xlu1 %3118, %v1007_v18  }
  0xed   :  { %633 = vmatmul.f32.gmra.mxu0 %v147_v22 }
  0xee   :  { %2957 = vmatmul.msk.f32.gmra.mxu1 %vm233_vm0, %v148_v23  ;;  %v183_v23 = vld [vmem:[%s5824_s1 + $0x230] sm:$0xff] }
  0xef   :  { %1699 = vperm.xlu0 %3117, %v1065_v24   ;;  %v184_v24 = vld [vmem:[%s5824_s1 + $0x238] sm:$0xff] }
  0xf0   :  { %1434 = vperm.xlu2 %3119, %v1012_v25   ;;  %v1059_v25 = vld [vmem:[%s5823_s4 + $0x3c0] sm:$0xff] }
  0xf2   :  { %v3994_v29 = vpop.f32.mrf.mxu0 }
  0xf3   :  { %v3996_v30 = vpop.f32.mrf.mxu1  ;;  %1704 = vperm.xlu1 %3118, %v1066_v26   ;;  %v4113_v26 = vpop.f32.mrf.mxu3 }
  0xf5   :  { %636 = vmatmul.f32.gmra.mxu0 %v153_v31  ;;  %v1048_v31 = vld [vmem:[%s5823_s4 + $0x368] sm:$0xff] }
  0xf6   :  { %2958 = vmatmul.msk.f32.gmra.mxu1 %vm233_vm0, %v154_v32  ;;  %v1028_v32 = vld [vmem:[%s5823_s4 + $0x2c8] sm:$0xff] }
  0xf7   :  { %1694 = vperm.xlu0 %3117, %v1064_v33  }
  0xf8   :  { %1419 = vperm.xlu2 %3119, %v1009_v34  }
  0xfa   :  { %v4014_v38 = vpop.f32.mrf.mxu0 }
  0xfb   :  { %v4016_v39 = vpop.f32.mrf.mxu1  ;;  %1539 = vperm.xlu1 %3118, %v1033_v35   ;;  %v189_v35 = vld [vmem:[%s5824_s1 + $0x260] sm:$0xff] }
  0xfd   :  { %639 = vmatmul.f32.gmra.mxu0 %v159_v40  ;;  %v190_v40 = vld [vmem:[%s5824_s1 + $0x268] sm:$0xff] }
  0xfe   :  { %2959 = vmatmul.msk.f32.gmra.mxu1 %vm233_vm0, %v160_v41  ;;  %v4132_v41 = vpop.f32.mrf.mxu2 }
  0xff   :  { %1689 = vperm.xlu0 %3117, %v1063_v42   ;;  %v1058_v42 = vld [vmem:[%s5823_s4 + $0x3b8] sm:$0xff] }
 0x100   :  { %1404 = vperm.xlu2 %3119, %v1006_v43   ;;  %v1047_v43 = vld [vmem:[%s5823_s4 + $0x360] sm:$0xff] }
 0x102   :  { %v4034_v47 = vpop.f32.mrf.mxu0 }
 0x103   :  { %v4036_v48 = vpop.f32.mrf.mxu1  ;;  %1534 = vperm.xlu1 %3118, %v1032_v44   ;;  %v4141_v44 = vpop.f32.mrf.mxu3 }
 0x105   :  { %642 = vmatmul.f32.gmra.mxu0 %v165_v49  ;;  %v1027_v49 = vld [vmem:[%s5823_s4 + $0x2c0] sm:$0xff] }
 0x106   :  { %2960 = vmatmul.msk.f32.gmra.mxu1 %vm233_vm0, %v166_v50 }
 0x107   :  { %1684 = vperm.xlu0 %3117, %v1062_v51  }
 0x108   :  { %1544 = vperm.xlu2 %3119, %v1034_v54   ;;  %v195_v54 = vld [vmem:[%s5824_s1 + $0x290] sm:$0xff] }
 0x10a   :  { %v4054_v56 = vpop.f32.mrf.mxu0 }
 0x10b   :  { %v4056_v57 = vpop.f32.mrf.mxu1  ;;  %1529 = vperm.xlu1 %3118, %v1031_v55   ;;  %v196_v55 = vld [vmem:[%s5824_s1 + $0x298] sm:$0xff] }
 0x10d   :  { %645 = vmatmul.f32.gmra.mxu0 %v171_v58  ;;  %v1057_v58 = vld [vmem:[%s5823_s4 + $0x3b0] sm:$0xff] }
 0x10e   :  { %2961 = vmatmul.msk.f32.gmra.mxu1 %vm233_vm0, %v172_v61  ;;  %v4159_v61 = vpop.f32.mrf.mxu2 }
 0x10f   :  { %1679 = vperm.xlu0 %3117, %v1061_v62   ;;  %v1046_v62 = vld [vmem:[%s5823_s4 + $0x358] sm:$0xff] }
 0x110   :  { %1624 = vperm.xlu2 %3119, %v1050_v63   ;;  %v1026_v63 = vld [vmem:[%s5823_s4 + $0x2b8] sm:$0xff] }
 0x112   :  { %v4076_v5 = vpop.f32.mrf.mxu0 }
 0x113   :  { %v4078_v6 = vpop.f32.mrf.mxu1  ;;  %1524 = vperm.xlu1 %3118, %v1030_v1   ;;  %v4168_v1 = vpop.f32.mrf.mxu3 }
 0x115   :  { %648 = vmatmul.f32.gmra.mxu0 %v177_v9 }
 0x116   :  { %2962 = vmatmul.msk.f32.gmra.mxu1 %vm233_vm0, %v178_v10 }
 0x117   :  { %1674 = vperm.xlu0 %3117, %v1060_v14   ;;  %v201_v14 = vld [vmem:[%s5824_s1 + $0x2c0] sm:$0xff] }
 0x118   :  { %1619 = vperm.xlu2 %3119, %v1049_v15   ;;  %v202_v15 = vld [vmem:[%s5824_s1 + $0x2c8] sm:$0xff] }
 0x11a   :  { %v4100_v18 = vpop.f32.mrf.mxu0 }
 0x11b   :  { %5831 = vst [vmem:[#allocation2_spill] sm:$0xff] %v4100_v18  ;;  %v4102_v22 = vpop.f32.mrf.mxu1  ;;  %1519 = vperm.xlu1 %3118, %v1029_v16   ;;  %v1056_v16 = vld [vmem:[%s5823_s4 + $0x3a8] sm:$0xff] }
 0x11c   :  { %5832 = vst [vmem:[#allocation3_spill] sm:$0xff] %v4102_v22 }
 0x11d   :  { %651 = vmatmul.f32.gmra.mxu0 %v183_v23  ;;  %v1045_v23 = vld [vmem:[%s5823_s4 + $0x350] sm:$0xff] }
 0x11e   :  { %2963 = vmatmul.msk.f32.gmra.mxu1 %vm233_vm0, %v184_v24  ;;  %v4187_v24 = vpop.f32.mrf.mxu2 }
 0x11f   :  { %1669 = vperm.xlu0 %3117, %v1059_v25   ;;  %v1025_v25 = vld [vmem:[%s5823_s4 + $0x2b0] sm:$0xff] }
 0x120   :  { %1614 = vperm.xlu2 %3119, %v1048_v31  }
 0x122   :  { %v4122_v33 = vpop.f32.mrf.mxu0 }
 0x123   :  { %5833 = vst [vmem:[#allocation4_spill] sm:$0xff] %v4122_v33  ;;  %v4124_v34 = vpop.f32.mrf.mxu1  ;;  %1514 = vperm.xlu1 %3118, %v1028_v32  }
 0x124   :  { %5834 = vst [vmem:[#allocation5_spill] sm:$0xff] %v4124_v34 }
 0x125   :  { %654 = vmatmul.f32.gmra.mxu0 %v189_v35  ;;  %v207_v35 = vld [vmem:[%s5824_s1 + $0x2f0] sm:$0xff] }
 0x126   :  { %2964 = vmatmul.msk.f32.gmra.mxu1 %vm233_vm0, %v190_v40  ;;  %v208_v40 = vld [vmem:[%s5824_s1 + $0x2f8] sm:$0xff] }
 0x127   :  { %1664 = vperm.xlu0 %3117, %v1058_v42   ;;  %v4202_v42 = vpop.f32.mrf.mxu3 }
 0x128   :  { %1609 = vperm.xlu2 %3119, %v1047_v43   ;;  %v1055_v43 = vld [vmem:[%s5823_s4 + $0x3a0] sm:$0xff] }
 0x12a   :  { %v4146_v50 = vpop.f32.mrf.mxu0 }
 0x12b   :  { %v4148_v51 = vpop.f32.mrf.mxu1  ;;  %1509 = vperm.xlu1 %3118, %v1027_v49   ;;  %v1044_v49 = vld [vmem:[%s5823_s4 + $0x348] sm:$0xff] }
 0x12d   :  { %657 = vmatmul.f32.gmra.mxu0 %v195_v54  ;;  %v1024_v54 = vld [vmem:[%s5823_s4 + $0x2a8] sm:$0xff] }
 0x12e   :  { %2965 = vmatmul.msk.f32.gmra.mxu1 %vm233_vm0, %v196_v55  ;;  %v4214_v55 = vpop.f32.mrf.mxu2 }
 0x12f   :  { %1659 = vperm.xlu0 %3117, %v1057_v58  }
 0x130   :  { %1604 = vperm.xlu2 %3119, %v1046_v62  }
 0x132   :  { %v4170_v9 = vpop.f32.mrf.mxu0 }
 0x133   :  { %v4172_v10 = vpop.f32.mrf.mxu1  ;;  %1504 = vperm.xlu1 %3118, %v1026_v63   ;;  %v213_v63 = vld [vmem:[%s5824_s1 + $0x320] sm:$0xff] }
 0x135   :  { %660 = vmatmul.f32.gmra.mxu0 %v201_v14  ;;  %v214_v14 = vld [vmem:[%s5824_s1 + $0x328] sm:$0xff] }
 0x136   :  { %2966 = vmatmul.msk.f32.gmra.mxu1 %vm233_vm0, %v202_v15  ;;  %v1054_v15 = vld [vmem:[%s5823_s4 + $0x398] sm:$0xff] }
 0x137   :  { %1654 = vperm.xlu0 %3117, %v1056_v16   ;;  %v4229_v16 = vpop.f32.mrf.mxu3 }
 0x138   :  { %1599 = vperm.xlu2 %3119, %v1045_v23   ;;  %v1043_v23 = vld [vmem:[%s5823_s4 + $0x340] sm:$0xff] }
 0x13a   :  { %v4192_v31 = vpop.f32.mrf.mxu0 }
 0x13b   :  { %5835 = vst [vmem:[#allocation6_spill] sm:$0xff] %v4192_v31  ;;  %v4194_v32 = vpop.f32.mrf.mxu1  ;;  %1499 = vperm.xlu1 %3118, %v1025_v25   ;;  %v1023_v25 = vld [vmem:[%s5823_s4 + $0x2a0] sm:$0xff] }
 0x13c   :  { %5836 = vst [vmem:[#allocation7_spill] sm:$0xff] %v4194_v32 }
 0x13d   :  { %663 = vmatmul.f32.gmra.mxu0 %v207_v35 }
 0x13e   :  { %2967 = vmatmul.msk.f32.gmra.mxu1 %vm233_vm0, %v208_v40 }
 0x13f   :  { %1649 = vperm.xlu0 %3117, %v1055_v43   ;;  %v219_v43 = vld [vmem:[%s5824_s1 + $0x350] sm:$0xff] }
 0x140   :  { %1594 = vperm.xlu2 %3119, %v1044_v49   ;;  %v220_v49 = vld [vmem:[%s5824_s1 + $0x358] sm:$0xff] }
 0x142   :  { %v4216_v58 = vpop.f32.mrf.mxu0 }
 0x143   :  { %5837 = vst [vmem:[#allocation8_spill] sm:$0xff] %v4216_v58  ;;  %1494 = vperm.xlu1 %3118, %v1024_v54   ;;  %v4218_v62 = vpop.f32.mrf.mxu1  ;;  %v4248_v54 = vpop.f32.mrf.mxu2 }
 0x144   :  { %5838 = vst [vmem:[#allocation9_spill] sm:$0xff] %v4218_v62 }
 0x145   :  { %666 = vmatmul.f32.gmra.mxu0 %v213_v63  ;;  %v1053_v63 = vld [vmem:[%s5823_s4 + $0x390] sm:$0xff] }
 0x146   :  { %2968 = vmatmul.msk.f32.gmra.mxu1 %vm233_vm0, %v214_v14  ;;  %v4253_v14 = vpop.permute.xlu2 %778 }
 0x147   :  { %1644 = vperm.xlu0 %3117, %v1054_v15   ;;  %5841 = vst [vmem:[#allocation12_spill] sm:$0xff] %v4253_v14  ;;  %v1042_v15 = vld [vmem:[%s5823_s4 + $0x338] sm:$0xff] }
 0x148   :  { %1589 = vperm.xlu2 %3119, %v1043_v23   ;;  %v4259_v23 = vpop.f32.mrf.mxu3 }
 0x149   :  { %5842 = vst [vmem:[#allocation13_spill] sm:$0xff] %v4259_v23 }
 0x14a   :  { %v4238_v35 = vpop.f32.mrf.mxu0 }
 0x14b   :  { %5839 = vst [vmem:[#allocation10_spill] sm:$0xff] %v4238_v35  ;;  %1489 = vperm.xlu1 %3118, %v1023_v25   ;;  %v4240_v40 = vpop.f32.mrf.mxu1  ;;  %v1022_v25 = vld [vmem:[%s5823_s4 + $0x298] sm:$0xff]  ;;  %v4277_v14 = vpop.f32.mrf.mxu2 }
 0x14c   :  { %5840 = vst [vmem:[#allocation11_spill] sm:$0xff] %v4240_v40 }
 0x14d   :  { %669 = vmatmul.f32.gmra.mxu0 %v219_v43  ;;  %v225_v43 = vld [vmem:[%s5824_s1 + $0x380] sm:$0xff] }
 0x14e   :  { %2969 = vmatmul.msk.f32.gmra.mxu1 %vm233_vm0, %v220_v49  ;;  %v226_v49 = vld [vmem:[%s5824_s1 + $0x388] sm:$0xff] }
 0x14f   :  { %1639 = vperm.xlu0 %3117, %v1053_v63   ;;  %v1052_v63 = vld [vmem:[%s5823_s4 + $0x388] sm:$0xff] }
 0x150   :  { %1584 = vperm.xlu2 %3119, %v1042_v15   ;;  %v1041_v15 = vld [vmem:[%s5823_s4 + $0x330] sm:$0xff]  ;;  %v4288_v35 = vpop.f32.mrf.mxu3 }
 0x151   :  { %5846 = vst [vmem:[#allocation17_spill] sm:$0xff] %v4288_v35  ;;  %v1035_v35 = vld [vmem:[%s5823_s4 + $0x300] sm:$0xff] }
 0x152   :  { %v4264_v62 = vpop.f32.mrf.mxu0 }
 0x153   :  { %5843 = vst [vmem:[#allocation14_spill] sm:$0xff] %v4264_v62  ;;  %1484 = vperm.xlu1 %3118, %v1022_v25   ;;  %v4266_v40 = vpop.f32.mrf.mxu1  ;;  %v4283_v25 = vpop.permute.xlu2 %1069 }
 0x154   :  { %5844 = vst [vmem:[#allocation15_spill] sm:$0xff] %v4266_v40  ;;  %v1021_v40 = vld [vmem:[%s5823_s4 + $0x290] sm:$0xff] }
 0x155   :  { %672 = vmatmul.f32.gmra.mxu0 %v225_v43  ;;  %5845 = vst [vmem:[#allocation16_spill] sm:$0xff] %v4283_v25  ;;  %v1051_v25 = vld [vmem:[%s5823_s4 + $0x380] sm:$0xff] }
 0x156   :  { %2970 = vmatmul.msk.f32.gmra.mxu1 %vm233_vm0, %v226_v49  ;;  %v231_v49 = vld [vmem:[%s5824_s1 + $0x3b0] sm:$0xff] }
 0x157   :  { %1634 = vperm.xlu0 %3117, %v1052_v63   ;;  %v232_v63 = vld [vmem:[%s5824_s1 + $0x3b8] sm:$0xff] }
 0x158   :  { %1579 = vperm.xlu2 %3119, %v1041_v15   ;;  %v4307_v15 = vpop.f32.mrf.mxu2 }
 0x15a   :  { %v4290_v58 = vpop.f32.mrf.mxu0 }
 0x15b   :  { %5847 = vst [vmem:[#allocation18_spill] sm:$0xff] %v4290_v58  ;;  %1479 = vperm.xlu1 %3118, %v1021_v40   ;;  %v4292_v43 = vpop.f32.mrf.mxu1  ;;  %v1040_v40 = vld [vmem:[%s5823_s4 + $0x328] sm:$0xff]  ;;  %v4312_v58 = vpop.permute.xlu2 %1084 }
 0x15c   :  { %5848 = vst [vmem:[#allocation19_spill] sm:$0xff] %v4292_v43  ;;  %v1020_v43 = vld [vmem:[%s5823_s4 + $0x288] sm:$0xff] }
 0x15d   :  { %675 = vmatmul.f32.gmra.mxu0 %v231_v49  ;;  %5849 = vst [vmem:[#allocation20_spill] sm:$0xff] %v4312_v58 }
 0x15e   :  { %2971 = vmatmul.msk.f32.gmra.mxu1 %vm233_vm0, %v232_v63  ;;  %v4318_v63 = vpop.f32.mrf.mxu3 }
 0x15f   :  { %1629 = vperm.xlu0 %3117, %v1051_v25   ;;  %5852 = vst [vmem:[#allocation23_spill] sm:$0xff] %v4318_v63  ;;  %v1039_v25 = vld [vmem:[%s5823_s4 + $0x320] sm:$0xff]  ;;  %v2654_v63 = vld [vmem:[%s5825_s6 + $0x8] sm:$0xff] }
 0x160   :  { %1574 = vperm.xlu2 %3119, %v1040_v40   ;;  %v1019_v40 = vld [vmem:[%s5823_s4 + $0x280] sm:$0xff]  ;;  %v4329_v58 = vpop.f32.mrf.mxu2 }
 0x162   :  { %v4314_v62 = vpop.f32.mrf.mxu0 }
 0x163   :  { %5850 = vst [vmem:[#allocation21_spill] sm:$0xff] %v4314_v62  ;;  %1474 = vperm.xlu1 %3118, %v1020_v43   ;;  %v4316_v49 = vpop.f32.mrf.mxu1  ;;  %v4335_v62 = vpop.permute.xlu2 %1099 }
 0x164   :  { %5851 = vst [vmem:[#allocation22_spill] sm:$0xff] %v4316_v49 }
 0x165   :  { %5855 = vst [vmem:[#allocation26_spill] sm:$0xff] %v4335_v62 }
 0x166   :  { %v4340_v32 = vpop.f32.mrf.mxu3 }
 0x167   :  { %1549 = vperm.xlu0 %3117, %v1035_v35   ;;  %5856 = vst [vmem:[#allocation27_spill] sm:$0xff] %v4340_v32  ;;  %v1038_v35 = vld [vmem:[%s5823_s4 + $0x318] sm:$0xff]  ;;  %v1037_v32 = vld [vmem:[%s5823_s4 + $0x310] sm:$0xff] }
 0x168   :  { %1569 = vperm.xlu2 %3119, %v1039_v25   ;;  %v2656_v25 = vld [vmem:[%s5825_s6 + $0x18] sm:$0xff] }
 0x16a   :  { %v4331_v43 = vpop.f32.mrf.mxu0 }
 0x16b   :  { %5853 = vst [vmem:[#allocation24_spill] sm:$0xff] %v4331_v43  ;;  %1469 = vperm.xlu1 %3118, %v1019_v40   ;;  %v4333_v49 = vpop.f32.mrf.mxu1  ;;  %v4354_v43 = vpop.permute.xlu2 %1114 }
 0x16c   :  { %5854 = vst [vmem:[#allocation25_spill] sm:$0xff] %v4333_v49  ;;  %v4352_v49 = vpop.f32.mrf.mxu2 }
 0x16d   :  { %5859 = vst [vmem:[#allocation30_spill] sm:$0xff] %v4354_v43  ;;  %v1036_v43 = vld [vmem:[%s5823_s4 + $0x308] sm:$0xff] }
 0x16e   :  { %v4359_v31 = vpop.f32.mrf.mxu3 }
 0x16f   :  { %2664 = vperm.xlu0 %3117, %v2654_v63   ;;  %5860 = vst [vmem:[#allocation31_spill] sm:$0xff] %v4359_v31  ;;  %v2653_v63 = vld [vmem:[%s5825_s6] sm:$0xff] }
 0x170   :  { %1564 = vperm.xlu2 %3119, %v1038_v35  }
 0x172   :  { %v4348_v40 = vpop.f32.mrf.mxu0 }
 0x173   :  { %5857 = vst [vmem:[#allocation28_spill] sm:$0xff] %v4348_v40  ;;  %2674 = vperm.xlu1 %3118, %v2656_v25   ;;  %v4350_v62 = vpop.f32.mrf.mxu1  ;;  %v4373_v40 = vpop.permute.xlu2 %1129 }
 0x174   :  { %5858 = vst [vmem:[#allocation29_spill] sm:$0xff] %v4350_v62  ;;  %v4368_v62 = vpop.f32.mrf.mxu2 }
 0x175   :  { %5863 = vst [vmem:[#allocation34_spill] sm:$0xff] %v4373_v40 }
 0x176   :  { %v4375_v23 = vpop.f32.mrf.mxu3 }
 0x177   :  { %5864 = vst [vmem:[#allocation35_spill] sm:$0xff] %v4375_v23 }
 0x178   :  { %1559 = vperm.xlu2 %3119, %v1037_v32   ;;  %v2655_v32 = vld [vmem:[%s5825_s6 + $0x10] sm:$0xff] }
 0x17a   :  { %v4364_v35 = vpop.f32.mrf.mxu0 }
 0x17b   :  { %5861 = vst [vmem:[#allocation32_spill] sm:$0xff] %v4364_v35  ;;  %2659 = vperm.xlu1 %3118, %v2653_v63   ;;  %v4366_v25 = vpop.f32.mrf.mxu1 }
 0x17c   :  { %5862 = vst [vmem:[#allocation33_spill] sm:$0xff] %v4366_v25  ;;  %v4384_v63 = vpop.f32.mrf.mxu2  ;;  %v4386_v25 = vpop.permute.xlu2 %1144 }
 0x17d   :  { %5867 = vst [vmem:[#allocation38_spill] sm:$0xff] %v4386_v25 }
 0x17e   :  { %v4392_v40 = vpop.f32.mrf.mxu3 }
 0x17f   :  { %5870 = vst [vmem:[#allocation41_spill] sm:$0xff] %v4392_v40 }
 0x180   :  { %1554 = vperm.xlu2 %3119, %v1036_v43   ;;  %v2914_v43 = vld [vmem:[%s5826_s8] sm:$0xf] }
 0x182   :  { %v4377_v31 = vpop.f32.mrf.mxu0 }
 0x183   :  { %5865 = vst [vmem:[#allocation36_spill] sm:$0xff] %v4377_v31  ;;  %v4379_v34 = vpop.f32.mrf.mxu1 }
 0x184   :  { %5866 = vst [vmem:[#allocation37_spill] sm:$0xff] %v4379_v34  ;;  %v4397_v34 = vpop.f32.mrf.mxu2  ;;  %v4403_v22 = vpop.permute.xlu2 %1159 }
 0x185   :  { %5871 = vst [vmem:[#allocation42_spill] sm:$0xff] %v4397_v34 }
 0x186   :  { %5874 = vst [vmem:[#allocation45_spill] sm:$0xff] %v4403_v22 }
 0x188   :  { %2669 = vperm.xlu2 %3119, %v2655_v32   ;;  %v4405_v32 = vpop.f32.mrf.mxu3 }
 0x189   :  { %5875 = vst [vmem:[#allocation46_spill] sm:$0xff] %v4405_v32 }
 0x18a   :  { %v4388_v35 = vpop.f32.mrf.mxu0 }
 0x18b   :  { %5868 = vst [vmem:[#allocation39_spill] sm:$0xff] %v4388_v35  ;;  %v4390_v33 = vpop.f32.mrf.mxu1 }
 0x18c   :  { %5869 = vst [vmem:[#allocation40_spill] sm:$0xff] %v4390_v33  ;;  %v4411_v35 = vpop.f32.mrf.mxu2  ;;  %v4413_v40 = vpop.permute.xlu2 %1174 }
 0x18d   :  { %5878 = vst [vmem:[#allocation49_spill] sm:$0xff] %v4411_v35 }
 0x18e   :  { %5879 = vst [vmem:[#allocation50_spill] sm:$0xff] %v4413_v40 }
 0x190   :  { %2917 = vperm.xlu2 %3119, %v2914_v43   ;;  %v4415_v18 = vpop.f32.mrf.mxu3 }
 0x191   :  { %5880 = vst [vmem:[#allocation51_spill] sm:$0xff] %v4415_v18 }
 0x192   :  { %v4399_v31 = vpop.f32.mrf.mxu0 }
 0x193   :  { %5872 = vst [vmem:[#allocation43_spill] sm:$0xff] %v4399_v31  ;;  %v4401_v23 = vpop.f32.mrf.mxu1 }
 0x194   :  { %5873 = vst [vmem:[#allocation44_spill] sm:$0xff] %v4401_v23  ;;  %v4421_v31 = vpop.f32.mrf.mxu2  ;;  %v4423_v23 = vpop.permute.xlu2 %1189 }
 0x195   :  { %5883 = vst [vmem:[#allocation54_spill] sm:$0xff] %v4421_v31 }
 0x196   :  { %5884 = vst [vmem:[#allocation55_spill] sm:$0xff] %v4423_v23 }
 0x198   :  { %v4425_v22 = vpop.f32.mrf.mxu3 }
 0x199   :  { %5885 = vst [vmem:[#allocation56_spill] sm:$0xff] %v4425_v22 }
 0x19a   :  { %v4407_v25 = vpop.f32.mrf.mxu0 }
 0x19b   :  { %5876 = vst [vmem:[#allocation47_spill] sm:$0xff] %v4407_v25  ;;  %v4409_v33 = vpop.f32.mrf.mxu1 }
 0x19c   :  { %5877 = vst [vmem:[#allocation48_spill] sm:$0xff] %v4409_v33  ;;  %v4431_v33 = vpop.f32.mrf.mxu2  ;;  %v4433_v35 = vpop.permute.xlu2 %1204 }
 0x19d   :  { %5888 = vst [vmem:[#allocation59_spill] sm:$0xff] %v4433_v35  ;;  %v392_v35 = vadd.f32 %v3801_v3, %v3799_v19  ;;  %v404_v19 = vadd.f32 %v3896_v53, %v3894_v52  ;;  %v407_v53 = vadd.f32 %v3916_v60, %v3914_v59 }
 0x19f   :  { %v484_v59 = vadd.f32 %v4248_v54, %v407_v53  ;;  %v5905_v54 = vld [vmem:[#allocation7_spill] sm:$0xff] }
 0x1a0   :  { %v5912_v53 = vld [vmem:[#allocation35_spill] sm:$0xff] }
 0x1a2   :  { %v4417_v34 = vpop.f32.mrf.mxu0 }
 0x1a3   :  { %5881 = vst [vmem:[#allocation52_spill] sm:$0xff] %v4417_v34  ;;  %v4419_v43 = vpop.f32.mrf.mxu1  ;;  %v4439_v34 = vpop.f32.mrf.mxu3 }
 0x1a4   :  { %5882 = vst [vmem:[#allocation53_spill] sm:$0xff] %v4419_v43  ;;  %v516_v43 = vpop.f32.mrf.mxu2  ;;  %v4445_v22 = vpop.permute.xlu2 %1219 }
 0x1a5   :  { %5891 = vst [vmem:[#allocation62_spill] sm:$0xff] %v4439_v34 }
 0x1a6   :  { %5894 = vst [vmem:[#allocation65_spill] sm:$0xff] %v4445_v22  ;;  %v401_v22 = vadd.f32 %v3876_v46, %v3874_v45 }
 0x1aa   :  { %v4427_v32 = vpop.f32.mrf.mxu0 }
 0x1ab   :  { %5886 = vst [vmem:[#allocation57_spill] sm:$0xff] %v4427_v32  ;;  %v4429_v25 = vpop.f32.mrf.mxu1  ;;  %v4447_v32 = vpop.f32.mrf.mxu3 }
 0x1ac   :  { %5887 = vst [vmem:[#allocation58_spill] sm:$0xff] %v4429_v25  ;;  %v389_v25 = vadd.f32 %v3767_v8, %v3765_v7  ;;  %v469_v7 = vadd.f32 %v4098_v17, %v392_v35  ;;  %v519_v3 = vpop.f32.mrf.mxu2 }
 0x1ae   :  { %v546_v46 = vadd.f32 %v4113_v26, %v469_v7  ;;  %v416_v26 = vadd.f32 %v3976_v21, %v3974_v20  ;;  %v425_v21 = vadd.f32 %v4036_v48, %v4034_v47 }
 0x1b2   :  { %v4435_v40 = vpop.f32.mrf.mxu0 }
 0x1b3   :  { %5889 = vst [vmem:[#allocation60_spill] sm:$0xff] %v4435_v40  ;;  %v4437_v18 = vpop.f32.mrf.mxu1 }
 0x1b4   :  { %5890 = vst [vmem:[#allocation61_spill] sm:$0xff] %v4437_v18  ;;  %v395_v18 = vadd.f32 %v3826_v28, %v3824_v27  ;;  %v478_v28 = vadd.f32 %v4187_v24, %v401_v22  ;;  %v5898_v24 = vld [vmem:[#allocation3_spill] sm:$0xff]  ;;  %v522_v48 = vpop.f32.mrf.mxu2 }
 0x1b6   :  { %v472_v8 = vadd.f32 %v4132_v41, %v395_v18  ;;  %v4478_v52 = vadd.f32 %v4202_v42, %v478_v28  ;;  %v410_v18 = vadd.f32 %v3936_v4, %v3934_v2  ;;  %v419_v41 = vadd.f32 %v3996_v30, %v3994_v29  ;;  %v5899_v42 = vld [vmem:[#allocation4_spill] sm:$0xff] }
 0x1b7   :  { %v422_v2 = vadd.f32 %v4016_v39, %v4014_v38  ;;  %v443_v4 = vadd.f32 %v4172_v10, %v4170_v9  ;;  %v428_v30 = vadd.f32 %v4056_v57, %v4054_v56  ;;  %v440_v38 = vadd.f32 %v4148_v51, %v4146_v50  ;;  %v5897_v10 = vld [vmem:[#allocation2_spill] sm:$0xff] }
 0x1b8   :  { %v487_v60 = vadd.f32 %v4277_v14, %v410_v18  ;;  %v496_v20 = vadd.f32 %v4352_v49, %v419_v41  ;;  %v431_v9 = vadd.f32 %v4078_v6, %v4076_v5  ;;  %v5903_v56 = vld [vmem:[#allocation42_spill] sm:$0xff]  ;;  %v5907_v5 = vld [vmem:[#allocation49_spill] sm:$0xff] }
 0x1b9   :  { %v499_v29 = vadd.f32 %v4368_v62, %v422_v2  ;;  %v520_v39 = vadd.f32 %v519_v3, %v443_v4  ;;  %v505_v57 = vadd.f32 %v5903_v56, %v428_v30  ;;  %v517_v50 = vadd.f32 %v516_v43, %v440_v38  ;;  %v5904_v51 = vld [vmem:[#allocation6_spill] sm:$0xff] }
 0x1ba   :  { %v4441_v31 = vpop.f32.mrf.mxu0  ;;  %v446_v14 = vadd.f32 %v5905_v54, %v5904_v51  ;;  %v508_v6 = vadd.f32 %v5907_v5, %v431_v9  ;;  %v5908_v49 = vld [vmem:[#allocation54_spill] sm:$0xff]  ;;  %v5927_v54 = vld [vmem:[#allocation19_spill] sm:$0xff] }
 0x1bb   :  { %5892 = vst [vmem:[#allocation63_spill] sm:$0xff] %v4441_v31  ;;  %v4443_v23 = vpop.f32.mrf.mxu1  ;;  %v466_v31 = vadd.f32 %v4071_v0, %v389_v25  ;;  %v549_v0 = vadd.f32 %v4141_v44, %v472_v8  ;;  %v5910_v8 = vld [vmem:[#allocation27_spill] sm:$0xff]  ;;  %v576_v18 = vadd.f32 %v5912_v53, %v499_v29  ;;  %v5914_v41 = vld [vmem:[#allocation14_spill] sm:$0xff]  ;;  %v5920_v29 = vld [vmem:[#allocation36_spill] sm:$0xff] }
 0x1bc   :  { %5893 = vst [vmem:[#allocation64_spill] sm:$0xff] %v4443_v23  ;;  %v398_v23 = vadd.f32 %v3851_v37, %v3849_v36  ;;  %v481_v36 = vadd.f32 %v4214_v55, %v404_v19  ;;  %v596_v37 = vpop.f32.mrf.mxu3  ;;  %v5900_v55 = vld [vmem:[#allocation5_spill] sm:$0xff]  ;;  %v5915_v4 = vld [vmem:[#allocation46_spill] sm:$0xff] }
 0x1bd   :  { %v543_v45 = vadd.f32 %v4086_v11, %v466_v31  ;;  %v413_v11 = vadd.f32 %v3956_v13, %v3954_v12  ;;  %v493_v13 = vadd.f32 %v4329_v58, %v416_v26  ;;  %v434_v31 = vadd.f32 %v5898_v24, %v5897_v10  ;;  %v5901_v58 = vld [vmem:[#allocation13_spill] sm:$0xff] }
 0x1be   :  { %v475_v27 = vadd.f32 %v4159_v61, %v398_v23  ;;  %v4485_v22 = vadd.f32 %v4229_v16, %v481_v36  ;;  %v437_v47 = vadd.f32 %v5900_v55, %v5899_v42  ;;  %v561_v62 = vadd.f32 %v5901_v58, %v484_v59  ;;  %v5906_v23 = vld [vmem:[#allocation17_spill] sm:$0xff]  ;;  %v5911_v36 = vld [vmem:[#allocation31_spill] sm:$0xff] }
 0x1bf   :  { %v490_v12 = vadd.f32 %v4307_v15, %v413_v11  ;;  %v564_v15 = vadd.f32 %v5906_v23, %v487_v60  ;;  %v511_v35 = vadd.f32 %v5908_v49, %v434_v31  ;;  %v570_v19 = vadd.f32 %v5910_v8, %v493_v13  ;;  %v5913_v11 = vld [vmem:[#allocation41_spill] sm:$0xff]  ;;  %v5921_v31 = vld [vmem:[#allocation8_spill] sm:$0xff]  ;;  %v5932_v8 = vld [vmem:[#allocation47_spill] sm:$0xff] }
 0x1c0   :  { %v552_v17 = vadd.f32 %v4168_v1, %v475_v27  ;;  %v502_v1 = vadd.f32 %v4384_v63, %v425_v21  ;;  %v514_v25 = vadd.f32 %v4431_v33, %v437_v47  ;;  %v5909_v63 = vld [vmem:[#allocation23_spill] sm:$0xff]  ;;  %v597_v3 = vadd.f32 %v596_v37, %v520_v39  ;;  %v5918_v39 = vld [vmem:[#allocation56_spill] sm:$0xff]  ;;  %v5922_v42 = vld [vmem:[#allocation57_spill] sm:$0xff] }
 0x1c1   :  { %v567_v7 = vadd.f32 %v5909_v63, %v490_v12  ;;  %v523_v27 = vadd.f32 %v522_v48, %v446_v14  ;;  %v573_v43 = vadd.f32 %v5911_v36, %v496_v20  ;;  %v626_v59 = vadd.f32 %v5914_v41, %v549_v0  ;;  %v5916_v12 = vld [vmem:[#allocation18_spill] sm:$0xff]  ;;  %v5917_v37 = vld [vmem:[#allocation51_spill] sm:$0xff]  ;;  %v5928_v23 = vld [vmem:[#allocation52_spill] sm:$0xff] }
 0x1c2   :  { %v4455_v40 = vpop.f32.mrf.mxu0  ;;  %v579_v26 = vadd.f32 %v5913_v11, %v502_v1  ;;  %v582_v21 = vadd.f32 %v5915_v4, %v505_v57  ;;  %v594_v33 = vadd.f32 %v4447_v32, %v517_v50  ;;  %v629_v30 = vadd.f32 %v5916_v12, %v552_v17  ;;  %v5919_v20 = vld [vmem:[#allocation62_spill] sm:$0xff]  ;;  %v5924_v32 = vld [vmem:[#allocation15_spill] sm:$0xff]  ;;  %v5925_v17 = vld [vmem:[#allocation32_spill] sm:$0xff] }
 0x1c3   :  { %v4457_v34 = vpop.f32.mrf.mxu1  ;;  %v585_v38 = vadd.f32 %v5917_v37, %v508_v6  ;;  %v588_v9 = vadd.f32 %v5918_v39, %v511_v35  ;;  %v591_v10 = vadd.f32 %v5919_v20, %v514_v25  ;;  %v644_v24 = vadd.f32 %v5920_v29, %v567_v7  ;;  %v5923_v48 = vld [vmem:[#allocation10_spill] sm:$0xff]  ;;  %v5926_v50 = vld [vmem:[#allocation39_spill] sm:$0xff]  ;;  %v799_v35 = vpop.permute.xlu0 %798  ;;  %v5944_v20 = vld [vmem:[#allocation29_spill] sm:$0xff] }
 0x1c4   :  { %5895 = vst [vmem:[#allocation66_spill] sm:$0xff] %v4457_v34  ;;  %v4470_v34 = vpop.permute.xlu2 %1234  ;;  %v599_v28 = vpop.f32.mrf.mxu3  ;;  %v620_v0 = vadd.f32 %v5921_v31, %v543_v45  ;;  %v659_v55 = vadd.f32 %v5922_v42, %v582_v21  ;;  %v623_v58 = vadd.f32 %v5923_v48, %v546_v46  ;;  %v703_v56 = vadd.f32 %v5924_v32, %v626_v59  ;;  %v5929_v45 = vld [vmem:[#allocation21_spill] sm:$0xff]  ;;  %v5936_v53 = vld [vmem:[#allocation63_spill] sm:$0xff]  ;;  %v5945_v29 = vld [vmem:[#allocation48_spill] sm:$0xff] }
 0x1c5   :  { %5896 = vst [vmem:[#allocation67_spill] sm:$0xff] %v4470_v34  ;;  %v600_v1 = vadd.f32 %v599_v28, %v523_v27  ;;  %v641_v57 = vadd.f32 %v5925_v17, %v564_v15  ;;  %v647_v51 = vadd.f32 %v5926_v50, %v570_v19  ;;  %v706_v14 = vadd.f32 %v5927_v54, %v629_v30  ;;  %v5931_v46 = vld [vmem:[#allocation37_spill] sm:$0xff]  ;;  %v5934_v19 = vld [vmem:[#allocation58_spill] sm:$0xff]  ;;  %v5935_v28 = vld [vmem:[#allocation60_spill] sm:$0xff]  ;;  %v789_v39 = vpop.permute.xlu1 %788 }
 0x1c6   :  { %v656_v5 = vadd.f32 %v5928_v23, %v579_v26  ;;  %v668_v6 = vadd.f32 %v4455_v40, %v591_v10  ;;  %v632_v25 = vadd.f32 %v5929_v45, %v4478_v52  ;;  %v721_v7 = vadd.f32 %v5931_v46, %v644_v24  ;;  %v5937_v26 = vld [vmem:[#allocation24_spill] sm:$0xff]  ;;  %v5938_v52 = vld [vmem:[#allocation33_spill] sm:$0xff]  ;;  %v5948_v32 = vld [vmem:[#allocation11_spill] sm:$0xff] }
 0x1c7   :  { %v736_v27 = vadd.f32 %v5934_v19, %v659_v55  ;;  %v662_v36 = vadd.f32 %v5935_v28, %v585_v38  ;;  %v665_v11 = vadd.f32 %v5936_v53, %v588_v9  ;;  %v635_v41 = vadd.f32 %v5937_v26, %v4485_v22  ;;  %v5943_v9 = vld [vmem:[#allocation22_spill] sm:$0xff]  ;;  %v5946_v31 = vld [vmem:[#allocation61_spill] sm:$0xff]  ;;  %v5947_v55 = vld [vmem:[#allocation64_spill] sm:$0xff] }
 0x1c8   :  { %v718_v59 = vadd.f32 %v5938_v52, %v641_v57  ;;  %v759_v22 = vmax.f32 %v706_v14, %v721_v7  ;;  %v700_v17 = vadd.f32 %v5948_v32, %v623_v58  ;;  %v5949_v57 = vld [vmem:[#allocation25_spill] sm:$0xff]  ;;  %v5950_v54 = vld [vmem:[#allocation44_spill] sm:$0xff] }
 0x1c9   :  { %v739_v42 = vadd.f32 %v5946_v31, %v662_v36  ;;  %v712_v50 = vadd.f32 %v5949_v57, %v635_v41  ;;  %v5951_v14 = vld [vmem:[#allocation9_spill] sm:$0xff] }
 0x1ca   :  { %v670_v44 = vpop.f32.mrf.mxu0  ;;  %v697_v45 = vadd.f32 %v5951_v14, %v620_v0  ;;  %v5953_v0 = vld [vmem:[#allocation12_spill] sm:$0xff]  ;;  %v867_v14 = vld [vmem:[%s5827_s3 + $0x1c0] sm:$0xff] }
 0x1cb   :  { %v4493_v61 = vpop.f32.mrf.mxu1  ;;  %v671_v47 = vadd.f32 %v670_v44, %v594_v33  ;;  %v5930_v44 = vld [vmem:[#allocation28_spill] sm:$0xff]  ;;  %v5941_v33 = vld [vmem:[#allocation53_spill] sm:$0xff]  ;;  %v5942_v30 = vld [vmem:[#allocation66_spill] sm:$0xff]  ;;  %v794_v7 = vpop.permute.xlu0 %793 }
 0x1cc   :  { %v4519_v16 = vpop.permute.xlu2 %1249  ;;  %v638_v63 = vadd.f32 %v5930_v44, %v561_v62  ;;  %v5939_v62 = vld [vmem:[#allocation40_spill] sm:$0xff]  ;;  %v733_v12 = vadd.f32 %v5941_v33, %v656_v5  ;;  %v862_v33 = vld [vmem:[%s5827_s3 + $0x198] sm:$0xff] }
 0x1cd   :  { %5902 = vst [vmem:[#allocation2_spill] sm:$0xff] %v4519_v16  ;;  %v748_v40 = vadd.f32 %v4493_v61, %v671_v47  ;;  %v709_v61 = vadd.f32 %v5943_v9, %v632_v25  ;;  %v784_v53 = vpop.permute.xlu1 %783  ;;  %v914_v9 = vld [vmem:[%s5827_s3 + $0x338] sm:$0xff] }
 0x1ce   :  { %v715_v10 = vadd.f32 %v5944_v20, %v638_v63 }
 0x1cf   :  { %v763_v47 = vmax.f32 %v733_v12, %v748_v40  ;;  %v913_v12 = vld [vmem:[%s5827_s3 + $0x330] sm:$0xff] }
 0x1d0   :  { %v757_v25 = vmax.f32 %v700_v17, %v715_v10  ;;  %v814_v10 = vld [vmem:[%s5827_s3 + $0x18] sm:$0xff] }
 0x1d2   :  { %v673_v60 = vpop.f32.mrf.mxu0 }
 0x1d3   :  { %v750_v2 = vpop.f32.mrf.mxu1  ;;  %v674_v13 = vadd.f32 %v673_v60, %v597_v3  ;;  %v653_v3 = vadd.f32 %v5932_v8, %v576_v18  ;;  %v724_v60 = vadd.f32 %v5939_v62, %v647_v51  ;;  %v758_v51 = vmax.f32 %v703_v56, %v718_v59  ;;  %v811_v62 = vld [vmem:[%s5827_s3] sm:$0xff]  ;;  %v4636_v20 = vpop.permute.xlu0 %1074 }
 0x1d4   :  { %v4555_v15 = vpop.permute.xlu2 %1264  ;;  %v756_v8 = vmax.f32 %v697_v45, %v712_v50  ;;  %v816_v50 = vld [vmem:[%s5827_s3 + $0x28] sm:$0xff]  ;;  %v918_v45 = vld [vmem:[%s5827_s3 + $0x358] sm:$0xff] }
 0x1d5   :  { %v751_v49 = vadd.f32 %v750_v2, %v674_v13  ;;  %5933 = vst [vmem:[#allocation3_spill] sm:$0xff] %v4555_v15  ;;  %v5940_v2 = vld [vmem:[#allocation43_spill] sm:$0xff]  ;;  %v745_v13 = vadd.f32 %v5942_v30, %v668_v6  ;;  %v730_v24 = vadd.f32 %v5945_v29, %v653_v3  ;;  %v768_v63 = vmax.f32 %v758_v51, %v763_v47  ;;  %v865_v47 = vld [vmem:[%s5827_s3 + $0x1b0] sm:$0xff]  ;;  %v839_v51 = vld [vmem:[%s5827_s3 + $0xe0] sm:$0xff] }
 0x1d6   :  { %v650_v4 = vadd.f32 %v5940_v2, %v573_v43  ;;  %v742_v43 = vadd.f32 %v5947_v55, %v665_v11  ;;  %v861_v2 = vld [vmem:[%s5827_s3 + $0x190] sm:$0xff]  ;;  %v864_v29 = vld [vmem:[%s5827_s3 + $0x1a8] sm:$0xff]  ;;  %v815_v55 = vld [vmem:[%s5827_s3 + $0x20] sm:$0xff] }
 0x1d7   :  { %v764_v37 = vmax.f32 %v736_v27, %v751_v49  ;;  %v762_v5 = vmax.f32 %v730_v24, %v745_v13  ;;  %v803_v28 = vadd.f32 %v789_v39, %v768_v63  ;;  %v813_v13 = vld [vmem:[%s5827_s3 + $0x10] sm:$0xff]  ;;  %v863_v39 = vld [vmem:[%s5827_s3 + $0x1a0] sm:$0xff]  ;;  %v818_v63 = vld [vmem:[%s5827_s3 + $0x38] sm:$0xff] }
 0x1d8   :  { %v727_v23 = vadd.f32 %v5950_v54, %v650_v4  ;;  %v912_v4 = vld [vmem:[%s5827_s3 + $0x328] sm:$0xff]  ;;  %v915_v24 = vld [vmem:[%s5827_s3 + $0x340] sm:$0xff]  ;;  %v917_v54 = vld [vmem:[%s5827_s3 + $0x350] sm:$0xff] }
 0x1d9   :  { %v769_v6 = vmax.f32 %v759_v22, %v764_v37  ;;  %v767_v3 = vmax.f32 %v757_v25, %v762_v5  ;;  %v808_v41 = vmax.f32 %v803_v28, 0.0  ;;  %v836_v37 = vld [vmem:[%s5827_s3 + $0xc8] sm:$0xff]  ;;  %v837_v22 = vld [vmem:[%s5827_s3 + $0xd0] sm:$0xff]  ;;  %v842_v28 = vld [vmem:[%s5827_s3 + $0xf8] sm:$0xff] }
 0x1da   :  { %v676_v18 = vpop.f32.mrf.mxu0  ;;  %v761_v44 = vmax.f32 %v727_v23, %v742_v43  ;;  %v838_v43 = vld [vmem:[%s5827_s3 + $0xd8] sm:$0xff] }
 0x1db   :  { %v753_v21 = vpop.f32.mrf.mxu1  ;;  %v677_v38 = vadd.f32 %v676_v18, %v600_v1  ;;  %v760_v1 = vmax.f32 %v709_v61, %v724_v60  ;;  %v804_v19 = vadd.f32 %v794_v7, %v769_v6  ;;  %v802_v11 = vadd.f32 %v784_v53, %v767_v3  ;;  %v834_v60 = vld [vmem:[%s5827_s3 + $0xb8] sm:$0xff]  ;;  %v812_v18 = vld [vmem:[%s5827_s3 + $0x8] sm:$0xff]  ;;  %v4670_v32 = vpop.permute.xlu0 %1089  ;;  %v817_v6 = vld [vmem:[%s5827_s3 + $0x30] sm:$0xff] }
 0x1dc   :  { %v4577_v27 = vpop.permute.xlu2 %1279  ;;  %v766_v56 = vmax.f32 %v756_v8, %v761_v44  ;;  %v868_v8 = vld [vmem:[%s5827_s3 + $0x1c8] sm:$0xff]  ;;  %v919_v3 = vld [vmem:[%s5827_s3 + $0x360] sm:$0xff] }
 0x1dd   :  { %v754_v48 = vadd.f32 %v753_v21, %v677_v38  ;;  %5952 = vst [vmem:[#allocation4_spill] sm:$0xff] %v4577_v27  ;;  %v809_v40 = vmax.f32 %v804_v19, 0.0  ;;  %v835_v21 = vld [vmem:[%s5827_s3 + $0xc0] sm:$0xff]  ;;  %v4622_v38 = vpop.permute.xlu1 %1079  ;;  %v920_v53 = vld [vmem:[%s5827_s3 + $0x368] sm:$0xff]  ;;  %v858_v27 = vld [vmem:[%s5827_s3 + $0x178] sm:$0xff] }
 0x1de   :  { %v801_v26 = vadd.f32 %v5953_v0, %v766_v56  ;;  %v819_v56 = vld [vmem:[%s5827_s3 + $0x40] sm:$0xff]  ;;  %v820_v0 = vld [vmem:[%s5827_s3 + $0x48] sm:$0xff] }
 0x1df   :  { %v765_v49 = vmax.f32 %v739_v42, %v754_v48  ;;  %v916_v48 = vld [vmem:[%s5827_s3 + $0x348] sm:$0xff] }
 0x1e0   :  { %v806_v52 = vmax.f32 %v801_v26, 0.0  ;;  %v843_v26 = vld [vmem:[%s5827_s3 + $0x100] sm:$0xff] }
 0x1e1   :  { %v770_v46 = vmax.f32 %v760_v1, %v765_v49  ;;  %v866_v1 = vld [vmem:[%s5827_s3 + $0x1b8] sm:$0xff]  ;;  %v840_v49 = vld [vmem:[%s5827_s3 + $0xe8] sm:$0xff] }
 0x1e3   :  { %v805_v58 = vadd.f32 %v799_v35, %v770_v46  ;;  %v807_v35 = vmax.f32 %v802_v11, 0.0  ;;  %v4694_v23 = vpop.permute.xlu0 %1104  ;;  %v841_v46 = vld [vmem:[%s5827_s3 + $0xf0] sm:$0xff] }
 0x1e4   :  { %v4580_v59 = vpop.permute.xlu2 %1294 }
 0x1e5   :  { %v810_v36 = vmax.f32 %v805_v58, 0.0  ;;  %5954 = vst [vmem:[#allocation5_spill] sm:$0xff] %v4580_v59  ;;  %v4650_v31 = vpop.permute.xlu1 %1094  ;;  %v859_v59 = vld [vmem:[%s5827_s3 + $0x180] sm:$0xff] }
 0x1e7   :  { %2103 = vmatpush.msra.mxu0 %v810_v36  ;;  %3101 = vmatpush.msra.mxu1 %v810_v36 }
 0x1e8   :  { %3102 = vmatpush.msrb.mxu2 %v810_v36  ;;  %3103 = vmatpush.msrb.mxu3 %v810_v36  ;;  %v869_v36 = vld [vmem:[%s5827_s3 + $0x1d0] sm:$0xff] }
 0x1e9   :  { %2104 = vmatpush.msra.mxu0 %v809_v40  ;;  %3104 = vmatpush.msra.mxu1 %v809_v40 }
 0x1ea   :  { %3105 = vmatpush.msrb.mxu2 %v809_v40  ;;  %3106 = vmatpush.msrb.mxu3 %v809_v40 }
 0x1eb   :  { %2105 = vmatpush.msra.mxu0 %v808_v41  ;;  %3107 = vmatpush.msra.mxu1 %v808_v41  ;;  %v4718_v44 = vpop.permute.xlu0 %1119 }
 0x1ec   :  { %3108 = vmatpush.msrb.mxu2 %v808_v41  ;;  %3109 = vmatpush.msrb.mxu3 %v808_v41  ;;  %v4610_v30 = vpop.permute.xlu2 %1309  ;;  %v870_v41 = vld [vmem:[%s5827_s3 + $0x1d8] sm:$0xff] }
 0x1ed   :  { %2106 = vmatpush.msra.mxu0 %v807_v35  ;;  %3110 = vmatpush.msra.mxu1 %v807_v35  ;;  %5955 = vst [vmem:[#allocation13_spill] sm:$0xff] %v4610_v30  ;;  %v4676_v17 = vpop.permute.xlu1 %1109 }
 0x1ee   :  { %3111 = vmatpush.msrb.mxu2 %v807_v35  ;;  %3112 = vmatpush.msrb.mxu3 %v807_v35  ;;  %v921_v35 = vld [vmem:[%s5827_s3 + $0x370] sm:$0xff] }
 0x1ef   :  { %2107 = vmatpush.msra.mxu0 %v806_v52  ;;  %3113 = vmatpush.msra.mxu1 %v806_v52 }
 0x1f0   :  { %3114 = vmatpush.msrb.mxu2 %v806_v52  ;;  %3115 = vmatpush.msrb.mxu3 %v806_v52 }
 0x1f1   :  { %2972 = vmatmul.msk.f32.vlgmr.msra.gmra.mxu0 %vm1707_vm1, %v811_v62  ;;  %2995 = vmatmul.msk.f32.vlgmr.msra.gmra.mxu1 %vm1707_vm1, %v834_v60 }
 0x1f2   :  { %3022 = vmatmul.msk.f32.vlgmr.msrb.gmra.mxu2 %vm1707_vm1, %v861_v2  ;;  %3073 = vmatmul.msk.f32.vlgmr.msrb.gmra.mxu3 %vm1707_vm1, %v912_v4  ;;  %v821_v2 = vld [vmem:[%s5827_s3 + $0x50] sm:$0xff]  ;;  %v844_v4 = vld [vmem:[%s5827_s3 + $0x108] sm:$0xff] }
 0x1f3   :  { %v4740_v58 = vpop.permute.xlu0 %1134 }
 0x1f4   :  { %v4632_v61 = vpop.permute.xlu2 %1324 }
 0x1f5   :  { %5956 = vst [vmem:[#allocation42_spill] sm:$0xff] %v4632_v61  ;;  %v4698_v5 = vpop.permute.xlu1 %1124 }
 0x1f9   :  { %2973 = vmatmul.msk.f32.gmra.mxu0 %vm1707_vm1, %v812_v18  ;;  %2996 = vmatmul.msk.f32.gmra.mxu1 %vm1707_vm1, %v835_v21  ;;  %v871_v18 = vld [vmem:[%s5827_s3 + $0x1e0] sm:$0xff]  ;;  %v922_v21 = vld [vmem:[%s5827_s3 + $0x378] sm:$0xff] }
 0x1fa   :  { %3023 = vmatmul.msk.f32.gmra.mxu2 %vm1707_vm1, %v862_v33  ;;  %3074 = vmatmul.msk.f32.gmra.mxu3 %vm1707_vm1, %v913_v12 }
 0x1fb   :  { %v4774_v52 = vpop.permute.xlu0 %1149 }
 0x1fc   :  { %v4656_v42 = vpop.permute.xlu2 %1339  ;;  %5963 = vst [vmem:[#allocation27_spill] sm:$0xff] %v4774_v52 }
 0x1fd   :  { %5957 = vst [vmem:[#allocation6_spill] sm:$0xff] %v4656_v42  ;;  %v4726_v7 = vpop.permute.xlu1 %1139 }
 0x201   :  { %2974 = vmatmul.msk.f32.gmra.mxu0 %vm1707_vm1, %v813_v13  ;;  %2997 = vmatmul.msk.f32.gmra.mxu1 %vm1707_vm1, %v836_v37  ;;  %v822_v13 = vld [vmem:[%s5827_s3 + $0x58] sm:$0xff]  ;;  %v845_v37 = vld [vmem:[%s5827_s3 + $0x110] sm:$0xff] }
 0x202   :  { %3024 = vmatmul.msk.f32.gmra.mxu2 %vm1707_vm1, %v863_v39  ;;  %3075 = vmatmul.msk.f32.gmra.mxu3 %vm1707_vm1, %v914_v9  ;;  %v872_v39 = vld [vmem:[%s5827_s3 + $0x1e8] sm:$0xff]  ;;  %v923_v9 = vld [vmem:[%s5827_s3 + $0x380] sm:$0xff] }
 0x203   :  { %v4798_v33 = vpop.permute.xlu0 %1164 }
 0x204   :  { %v4678_v57 = vpop.permute.xlu2 %1354  ;;  %5966 = vst [vmem:[#allocation41_spill] sm:$0xff] %v4798_v33 }
 0x205   :  { %5958 = vst [vmem:[#allocation7_spill] sm:$0xff] %v4678_v57  ;;  %v4754_v11 = vpop.permute.xlu1 %1154  ;;  %v832_v57 = vld [vmem:[%s5827_s3 + $0xa8] sm:$0xff] }
 0x206   :  { %5961 = vst [vmem:[#allocation54_spill] sm:$0xff] %v4754_v11 }
 0x209   :  { %2975 = vmatmul.msk.f32.gmra.mxu0 %vm1707_vm1, %v814_v10  ;;  %2998 = vmatmul.msk.f32.gmra.mxu1 %vm1707_vm1, %v837_v22 }
 0x20a   :  { %3025 = vmatmul.msk.f32.gmra.mxu2 %vm1707_vm1, %v864_v29  ;;  %3076 = vmatmul.msk.f32.gmra.mxu3 %vm1707_vm1, %v915_v24  ;;  %v823_v29 = vld [vmem:[%s5827_s3 + $0x60] sm:$0xff]  ;;  %v846_v24 = vld [vmem:[%s5827_s3 + $0x118] sm:$0xff] }
 0x20b   :  { %v4822_v22 = vpop.permute.xlu0 %1179 }
 0x20c   :  { %v4712_v25 = vpop.permute.xlu2 %1369  ;;  %5968 = vst [vmem:[#allocation46_spill] sm:$0xff] %v4822_v22 }
 0x20d   :  { %5959 = vst [vmem:[#allocation17_spill] sm:$0xff] %v4712_v25  ;;  %v4780_v62 = vpop.permute.xlu1 %1169 }
 0x20e   :  { %5964 = vst [vmem:[#allocation31_spill] sm:$0xff] %v4780_v62 }
 0x211   :  { %2976 = vmatmul.msk.f32.gmra.mxu0 %vm1707_vm1, %v815_v55  ;;  %2999 = vmatmul.msk.f32.gmra.mxu1 %vm1707_vm1, %v838_v43  ;;  %v873_v43 = vld [vmem:[%s5827_s3 + $0x1f0] sm:$0xff] }
 0x212   :  { %3026 = vmatmul.msk.f32.gmra.mxu2 %vm1707_vm1, %v865_v47  ;;  %3077 = vmatmul.msk.f32.gmra.mxu3 %vm1707_vm1, %v916_v48  ;;  %v924_v47 = vld [vmem:[%s5827_s3 + $0x388] sm:$0xff] }
 0x214   :  { %v4736_v19 = vpop.permute.xlu2 %1374 }
 0x215   :  { %5960 = vst [vmem:[#allocation49_spill] sm:$0xff] %v4736_v19  ;;  %v4802_v12 = vpop.permute.xlu1 %1184 }
 0x219   :  { %2977 = vmatmul.msk.f32.gmra.mxu0 %vm1707_vm1, %v816_v50  ;;  %3000 = vmatmul.msk.f32.gmra.mxu1 %vm1707_vm1, %v839_v51  ;;  %v4844_v50 = vpop.permute.xlu0 %1194  ;;  %v824_v51 = vld [vmem:[%s5827_s3 + $0x68] sm:$0xff] }
 0x21a   :  { %3027 = vmatmul.msk.f32.gmra.mxu2 %vm1707_vm1, %v866_v1  ;;  %3078 = vmatmul.msk.f32.gmra.mxu3 %vm1707_vm1, %v917_v54  ;;  %v847_v1 = vld [vmem:[%s5827_s3 + $0x120] sm:$0xff]  ;;  %v874_v54 = vld [vmem:[%s5827_s3 + $0x1f8] sm:$0xff] }
 0x21c   :  { %v4760_v40 = vpop.permute.xlu2 %1464 }
 0x21d   :  { %5962 = vst [vmem:[#allocation23_spill] sm:$0xff] %v4760_v40  ;;  %v4830_v55 = vpop.permute.xlu1 %1199 }
 0x221   :  { %2978 = vmatmul.msk.f32.gmra.mxu0 %vm1707_vm1, %v817_v6  ;;  %3001 = vmatmul.msk.f32.gmra.mxu1 %vm1707_vm1, %v840_v49  ;;  %v925_v6 = vld [vmem:[%s5827_s3 + $0x390] sm:$0xff] }
 0x222   :  { %3028 = vmatmul.msk.f32.gmra.mxu2 %vm1707_vm1, %v867_v14  ;;  %3079 = vmatmul.msk.f32.gmra.mxu3 %vm1707_vm1, %v918_v45  ;;  %v825_v45 = vld [vmem:[%s5827_s3 + $0x70] sm:$0xff] }
 0x224   :  { %v4782_v60 = vpop.permute.xlu2 %1449 }
 0x225   :  { %5965 = vst [vmem:[#allocation35_spill] sm:$0xff] %v4782_v60  ;;  %v4858_v49 = vpop.permute.xlu1 %1214 }
 0x229   :  { %2979 = vmatmul.msk.f32.gmra.mxu0 %vm1707_vm1, %v818_v63  ;;  %3002 = vmatmul.msk.f32.gmra.mxu1 %vm1707_vm1, %v841_v46  ;;  %v848_v63 = vld [vmem:[%s5827_s3 + $0x128] sm:$0xff]  ;;  %v875_v46 = vld [vmem:[%s5827_s3 + $0x200] sm:$0xff] }
 0x22a   :  { %3029 = vmatmul.msk.f32.gmra.mxu2 %vm1707_vm1, %v868_v8  ;;  %3080 = vmatmul.msk.f32.gmra.mxu3 %vm1707_vm1, %v919_v3  ;;  %v926_v8 = vld [vmem:[%s5827_s3 + $0x398] sm:$0xff]  ;;  %v4878_v3 = vpop.permute.xlu0 %1209 }
 0x22c   :  { %v4816_v10 = vpop.permute.xlu2 %1434 }
 0x22d   :  { %5967 = vst [vmem:[#allocation14_spill] sm:$0xff] %v4816_v10 }
 0x231   :  { %2980 = vmatmul.msk.f32.gmra.mxu0 %vm1707_vm1, %v819_v56  ;;  %3003 = vmatmul.msk.f32.gmra.mxu1 %vm1707_vm1, %v842_v28  ;;  %v4884_v56 = vpop.permute.xlu1 %1229 }
 0x232   :  { %3030 = vmatmul.msk.f32.gmra.mxu2 %vm1707_vm1, %v869_v36  ;;  %3081 = vmatmul.msk.f32.gmra.mxu3 %vm1707_vm1, %v920_v53  ;;  %5971 = vst [vmem:[#allocation56_spill] sm:$0xff] %v4884_v56  ;;  %v826_v36 = vld [vmem:[%s5827_s3 + $0x78] sm:$0xff]  ;;  %v849_v53 = vld [vmem:[%s5827_s3 + $0x130] sm:$0xff] }
 0x234   :  { %v4840_v48 = vpop.permute.xlu2 %1419 }
 0x235   :  { %5969 = vst [vmem:[#allocation18_spill] sm:$0xff] %v4840_v48 }
 0x239   :  { %2981 = vmatmul.msk.f32.gmra.mxu0 %vm1707_vm1, %v820_v0  ;;  %3004 = vmatmul.msk.f32.gmra.mxu1 %vm1707_vm1, %v843_v26  ;;  %v876_v0 = vld [vmem:[%s5827_s3 + $0x208] sm:$0xff]  ;;  %v927_v26 = vld [vmem:[%s5827_s3 + $0x3a0] sm:$0xff] }
 0x23a   :  { %3031 = vmatmul.msk.f32.gmra.mxu2 %vm1707_vm1, %v870_v41  ;;  %3082 = vmatmul.msk.f32.gmra.mxu3 %vm1707_vm1, %v921_v35  ;;  %v4902_v41 = vpop.permute.xlu0 %1224  ;;  %v4906_v35 = vpop.permute.xlu1 %1244 }
 0x23b   :  { %5973 = vst [vmem:[#allocation36_spill] sm:$0xff] %v4906_v35 }
 0x23c   :  { %v4864_v14 = vpop.permute.xlu2 %1404 }
 0x23d   :  { %5970 = vst [vmem:[#allocation51_spill] sm:$0xff] %v4864_v14 }
 0x241   :  { %2982 = vmatmul.msk.f32.gmra.mxu0 %vm1707_vm1, %v821_v2  ;;  %3005 = vmatmul.msk.f32.gmra.mxu1 %vm1707_vm1, %v844_v4 }
 0x242   :  { %3032 = vmatmul.msk.f32.gmra.mxu2 %vm1707_vm1, %v871_v18  ;;  %3083 = vmatmul.msk.f32.gmra.mxu3 %vm1707_vm1, %v922_v21  ;;  %v827_v18 = vld [vmem:[%s5827_s3 + $0x80] sm:$0xff]  ;;  %v850_v21 = vld [vmem:[%s5827_s3 + $0x138] sm:$0xff] }
 0x244   :  { %v4886_v28 = vpop.permute.xlu2 %1544 }
 0x245   :  { %5972 = vst [vmem:[#allocation62_spill] sm:$0xff] %v4886_v28 }
 0x249   :  { %2983 = vmatmul.msk.f32.gmra.mxu0 %vm1707_vm1, %v822_v13  ;;  %3006 = vmatmul.msk.f32.gmra.mxu1 %vm1707_vm1, %v845_v37  ;;  %v877_v13 = vld [vmem:[%s5827_s3 + $0x210] sm:$0xff]  ;;  %v928_v37 = vld [vmem:[%s5827_s3 + $0x3a8] sm:$0xff] }
 0x24a   :  { %3033 = vmatmul.msk.f32.gmra.mxu2 %vm1707_vm1, %v872_v39  ;;  %3084 = vmatmul.msk.f32.gmra.mxu3 %vm1707_vm1, %v923_v9  ;;  %v4930_v9 = vpop.permute.xlu0 %1239 }
 0x24b   :  { %5975 = vst [vmem:[#allocation57_spill] sm:$0xff] %v4930_v9 }
 0x24c   :  { %v4924_v39 = vpop.permute.xlu2 %1624 }
 0x251   :  { %2984 = vmatmul.msk.f32.gmra.mxu0 %vm1707_vm1, %v823_v29  ;;  %3007 = vmatmul.msk.f32.gmra.mxu1 %vm1707_vm1, %v846_v24 }
 0x252   :  { %3034 = vmatmul.msk.f32.gmra.mxu2 %vm1707_vm1, %v873_v43  ;;  %3085 = vmatmul.msk.f32.gmra.mxu3 %vm1707_vm1, %v924_v47 }
 0x259   :  { %2985 = vmatmul.msk.f32.gmra.mxu0 %vm1707_vm1, %v824_v51  ;;  %3008 = vmatmul.msk.f32.gmra.mxu1 %vm1707_vm1, %v847_v1  ;;  %v828_v51 = vld [vmem:[%s5827_s3 + $0x88] sm:$0xff]  ;;  %v851_v1 = vld [vmem:[%s5827_s3 + $0x140] sm:$0xff] }
 0x25a   :  { %3035 = vmatmul.msk.f32.gmra.mxu2 %vm1707_vm1, %v874_v54  ;;  %3086 = vmatmul.msk.f32.gmra.mxu3 %vm1707_vm1, %v925_v6  ;;  %v878_v54 = vld [vmem:[%s5827_s3 + $0x218] sm:$0xff]  ;;  %v929_v6 = vld [vmem:[%s5827_s3 + $0x3b0] sm:$0xff] }
 0x261   :  { %2986 = vmatmul.msk.f32.gmra.mxu0 %vm1707_vm1, %v825_v45  ;;  %3009 = vmatmul.msk.f32.gmra.mxu1 %vm1707_vm1, %v848_v63  ;;  %v4952_v45 = vpop.permute.xlu1 %1259  ;;  %v4956_v63 = vpop.permute.xlu2 %1619 }
 0x262   :  { %3036 = vmatmul.msk.f32.gmra.mxu2 %vm1707_vm1, %v875_v46  ;;  %3087 = vmatmul.msk.f32.gmra.mxu3 %vm1707_vm1, %v926_v8  ;;  %5977 = vst [vmem:[#allocation15_spill] sm:$0xff] %v4952_v45 }
 0x269   :  { %2987 = vmatmul.msk.f32.gmra.mxu0 %vm1707_vm1, %v826_v36  ;;  %3010 = vmatmul.msk.f32.gmra.mxu1 %vm1707_vm1, %v849_v53 }
 0x26a   :  { %3037 = vmatmul.msk.f32.gmra.mxu2 %vm1707_vm1, %v876_v0  ;;  %3088 = vmatmul.msk.f32.gmra.mxu3 %vm1707_vm1, %v927_v26  ;;  %v829_v0 = vld [vmem:[%s5827_s3 + $0x90] sm:$0xff]  ;;  %v852_v26 = vld [vmem:[%s5827_s3 + $0x148] sm:$0xff] }
 0x26e   :  { %v4908_v2 = vpop.f32.mrf.mxu0  ;;  %v4910_v4 = vpop.f32.mrf.mxu1 }
 0x26f   :  { %5974 = vst [vmem:[#allocation8_spill] sm:$0xff] %v4910_v4 }
 0x271   :  { %2988 = vmatmul.msk.f32.gmra.mxu0 %vm1707_vm1, %v827_v18  ;;  %3011 = vmatmul.msk.f32.gmra.mxu1 %vm1707_vm1, %v850_v21  ;;  %v879_v18 = vld [vmem:[%s5827_s3 + $0x220] sm:$0xff]  ;;  %v930_v21 = vld [vmem:[%s5827_s3 + $0x3b8] sm:$0xff] }
 0x272   :  { %3038 = vmatmul.msk.f32.gmra.mxu2 %vm1707_vm1, %v877_v13  ;;  %3089 = vmatmul.msk.f32.gmra.mxu3 %vm1707_vm1, %v928_v37  ;;  %v4980_v13 = vpop.permute.xlu0 %1254  ;;  %v4984_v37 = vpop.permute.xlu1 %1274 }
 0x273   :  { %5979 = vst [vmem:[#allocation39_spill] sm:$0xff] %v4980_v13 }
 0x274   :  { %5980 = vst [vmem:[#allocation19_spill] sm:$0xff] %v4984_v37 }
 0x275   :  { %v4932_v29 = vpop.f32.mrf.mxu2  ;;  %v4934_v24 = vpop.f32.mrf.mxu3 }
 0x276   :  { %5976 = vst [vmem:[#allocation10_spill] sm:$0xff] %v4932_v29  ;;  %v4936_v43 = vpop.f32.mrf.mxu0  ;;  %v4938_v47 = vpop.f32.mrf.mxu1 }
 0x279   :  { %2989 = vmatmul.msk.f32.gmra.mxu0 %vm1707_vm1, %v828_v51  ;;  %3012 = vmatmul.msk.f32.gmra.mxu1 %vm1707_vm1, %v851_v1  ;;  %v4988_v51 = vpop.permute.xlu2 %1614 }
 0x27a   :  { %3039 = vmatmul.msk.f32.gmra.mxu2 %vm1707_vm1, %v878_v54  ;;  %3090 = vmatmul.msk.f32.gmra.mxu3 %vm1707_vm1, %v929_v6  ;;  %v5012_v14 = vpop.permute.xlu0 %1269  ;;  %v5016_v48 = vpop.permute.xlu1 %1289 }
 0x27b   :  { %5982 = vst [vmem:[#allocation21_spill] sm:$0xff] %v5012_v14 }
 0x27c   :  { %5983 = vst [vmem:[#allocation28_spill] sm:$0xff] %v5016_v48 }
 0x27d   :  { %v4960_v46 = vpop.f32.mrf.mxu2  ;;  %v4962_v8 = vpop.f32.mrf.mxu3 }
 0x27e   :  { %5978 = vst [vmem:[#allocation32_spill] sm:$0xff] %v4960_v46  ;;  %v4964_v36 = vpop.f32.mrf.mxu0  ;;  %v4966_v53 = vpop.f32.mrf.mxu1 }
 0x281   :  { %2990 = vmatmul.msk.f32.gmra.mxu0 %vm1707_vm1, %v829_v0  ;;  %3013 = vmatmul.msk.f32.gmra.mxu1 %vm1707_vm1, %v852_v26  ;;  %v830_v0 = vld [vmem:[%s5827_s3 + $0x98] sm:$0xff]  ;;  %v853_v26 = vld [vmem:[%s5827_s3 + $0x150] sm:$0xff]  ;;  %v5038_v29 = vpop.permute.xlu2 %1609 }
 0x282   :  { %3040 = vmatmul.msk.f32.gmra.mxu2 %vm1707_vm1, %v879_v18  ;;  %3091 = vmatmul.msk.f32.gmra.mxu3 %vm1707_vm1, %v930_v21  ;;  %v880_v18 = vld [vmem:[%s5827_s3 + $0x228] sm:$0xff]  ;;  %v931_v21 = vld [vmem:[%s5827_s3 + $0x3c0] sm:$0xff]  ;;  %v5044_v46 = vpop.permute.xlu0 %1284 }
 0x283   :  { %5985 = vst [vmem:[#allocation47_spill] sm:$0xff] %v5044_v46 }
 0x285   :  { %v4990_v1 = vpop.f32.mrf.mxu2  ;;  %v4992_v54 = vpop.f32.mrf.mxu3 }
 0x286   :  { %5981 = vst [vmem:[#allocation52_spill] sm:$0xff] %v4990_v1  ;;  %v4994_v6 = vpop.f32.mrf.mxu0  ;;  %v4996_v28 = vpop.f32.mrf.mxu1 }
 0x289   :  { %2991 = vmatmul.msk.f32.gmra.mxu0 %vm1707_vm1, %v830_v0  ;;  %3014 = vmatmul.msk.f32.gmra.mxu1 %vm1707_vm1, %v853_v26  ;;  %v831_v0 = vld [vmem:[%s5827_s3 + $0xa0] sm:$0xff]  ;;  %v854_v26 = vld [vmem:[%s5827_s3 + $0x158] sm:$0xff]  ;;  %v5071_v25 = vpop.permute.xlu2 %1604 }
 0x28a   :  { %3041 = vmatmul.msk.f32.gmra.mxu2 %vm1707_vm1, %v880_v18  ;;  %3092 = vmatmul.msk.f32.gmra.mxu3 %vm1707_vm1, %v931_v21  ;;  %v881_v18 = vld [vmem:[%s5827_s3 + $0x230] sm:$0xff]  ;;  %v932_v21 = vld [vmem:[%s5827_s3 + $0x3c8] sm:$0xff] }
 0x28d   :  { %v5018_v10 = vpop.f32.mrf.mxu2  ;;  %v5020_v60 = vpop.f32.mrf.mxu3 }
 0x28e   :  { %5984 = vst [vmem:[#allocation37_spill] sm:$0xff] %v5018_v10  ;;  %v5022_v40 = vpop.f32.mrf.mxu0  ;;  %v5024_v30 = vpop.f32.mrf.mxu1 }
 0x291   :  { %2992 = vmatmul.msk.f32.gmra.mxu0 %vm1707_vm1, %v831_v0  ;;  %3015 = vmatmul.msk.f32.gmra.mxu1 %vm1707_vm1, %v854_v26  ;;  %v855_v0 = vld [vmem:[%s5827_s3 + $0x160] sm:$0xff]  ;;  %v5103_v9 = vpop.permute.xlu2 %1599 }
 0x292   :  { %3042 = vmatmul.msk.f32.gmra.mxu2 %vm1707_vm1, %v881_v18  ;;  %3093 = vmatmul.msk.f32.gmra.mxu3 %vm1707_vm1, %v932_v21  ;;  %v882_v18 = vld [vmem:[%s5827_s3 + $0x238] sm:$0xff]  ;;  %v933_v21 = vld [vmem:[%s5827_s3 + $0x3d0] sm:$0xff] }
 0x295   :  { %v5046_v61 = vpop.f32.mrf.mxu2  ;;  %v5048_v1 = vpop.f32.mrf.mxu3 }
 0x296   :  { %5986 = vst [vmem:[#allocation58_spill] sm:$0xff] %v5046_v61  ;;  %v2124_v10 = vpop.f32.mrf.mxu0  ;;  %v5050_v42 = vpop.f32.mrf.mxu1 }
 0x297   :  { %v5059_v26 = vadd.f32 %v2124_v10, %v4650_v31  ;;  %v5067_v61 = vpop.permute.xlu1 %1304 }
 0x298   :  { %5987 = vst [vmem:[#allocation60_spill] sm:$0xff] %v5067_v61 }
 0x299   :  { %2993 = vmatmul.msk.f32.gmra.mxu0 %vm1707_vm1, %v832_v57  ;;  %3016 = vmatmul.msk.f32.gmra.mxu1 %vm1707_vm1, %v855_v0  ;;  %v833_v57 = vld [vmem:[%s5827_s3 + $0xb0] sm:$0xff]  ;;  %v856_v0 = vld [vmem:[%s5827_s3 + $0x168] sm:$0xff] }
 0x29a   :  { %3043 = vmatmul.msk.f32.gmra.mxu2 %vm1707_vm1, %v882_v18  ;;  %3094 = vmatmul.msk.f32.gmra.mxu3 %vm1707_vm1, %v933_v21  ;;  %v883_v18 = vld [vmem:[%s5827_s3 + $0x240] sm:$0xff]  ;;  %v934_v21 = vld [vmem:[%s5827_s3 + $0x3d8] sm:$0xff] }
 0x29d   :  { %v5075_v31 = vpop.f32.mrf.mxu2  ;;  %v5077_v10 = vpop.f32.mrf.mxu3 }
 0x29e   :  { %5988 = vst [vmem:[#allocation63_spill] sm:$0xff] %v5075_v31  ;;  %v5079_v19 = vpop.f32.mrf.mxu0  ;;  %v5081_v56 = vpop.f32.mrf.mxu1 }
 0x29f   :  { %v5095_v31 = vpop.permute.xlu0 %1299  ;;  %v5099_v34 = vpop.permute.xlu1 %1319 }
 0x2a0   :  { %5989 = vst [vmem:[#allocation24_spill] sm:$0xff] %v5095_v31  ;;  %v860_v31 = vld [vmem:[%s5827_s3 + $0x188] sm:$0xff] }
 0x2a1   :  { %2994 = vmatmul.msk.f32.gmra.mxu0 %vm1707_vm1, %v833_v57  ;;  %3017 = vmatmul.msk.f32.gmra.mxu1 %vm1707_vm1, %v856_v0  ;;  %5990 = vst [vmem:[#allocation33_spill] sm:$0xff] %v5099_v34  ;;  %v857_v57 = vld [vmem:[%s5827_s3 + $0x170] sm:$0xff]  ;;  %v884_v0 = vld [vmem:[%s5827_s3 + $0x248] sm:$0xff] }
 0x2a2   :  { %3044 = vmatmul.msk.f32.gmra.mxu2 %vm1707_vm1, %v883_v18  ;;  %3095 = vmatmul.msk.f32.gmra.mxu3 %vm1707_vm1, %v934_v21  ;;  %v935_v18 = vld [vmem:[%s5827_s3 + $0x3e0] sm:$0xff] }
 0x2a5   :  { %v5105_v35 = vpop.f32.mrf.mxu2  ;;  %v5107_v16 = vpop.f32.mrf.mxu3 }
 0x2a6   :  { %5991 = vst [vmem:[#allocation40_spill] sm:$0xff] %v5105_v35  ;;  %v5109_v13 = vpop.f32.mrf.mxu0  ;;  %v5111_v45 = vpop.f32.mrf.mxu1 }
 0x2a7   :  { %v5123_v21 = vpop.permute.xlu0 %1314  ;;  %v5127_v34 = vpop.permute.xlu1 %1334 }
 0x2a8   :  { %5992 = vst [vmem:[#allocation43_spill] sm:$0xff] %v5123_v21 }
 0x2a9   :  { %3018 = vmatmul.msk.f32.gmra.mxu1 %vm1707_vm1, %v857_v57  ;;  %5993 = vst [vmem:[#allocation53_spill] sm:$0xff] %v5127_v34  ;;  %v1595_v57 = vpop.permute.xlu2 %1594 }
 0x2aa   :  { %3045 = vmatmul.msk.f32.gmra.mxu2 %vm1707_vm1, %v884_v0  ;;  %3096 = vmatmul.msk.f32.gmra.mxu3 %vm1707_vm1, %v935_v18  ;;  %v885_v0 = vld [vmem:[%s5827_s3 + $0x250] sm:$0xff]  ;;  %v936_v18 = vld [vmem:[%s5827_s3 + $0x3e8] sm:$0xff] }
 0x2ad   :  { %v5129_v35 = vpop.f32.mrf.mxu2  ;;  %v2433_v15 = vpop.f32.mrf.mxu3 }
 0x2ae   :  { %5994 = vst [vmem:[#allocation66_spill] sm:$0xff] %v5129_v35  ;;  %v5131_v14 = vpop.f32.mrf.mxu0  ;;  %v5133_v37 = vpop.f32.mrf.mxu1 }
 0x2af   :  { %v5147_v21 = vpop.permute.xlu0 %1329  ;;  %v5158_v61 = vpop.permute.xlu1 %1349 }
 0x2b0   :  { %5995 = vst [vmem:[#allocation22_spill] sm:$0xff] %v5147_v21 }
 0x2b1   :  { %3019 = vmatmul.msk.f32.gmra.mxu1 %vm1707_vm1, %v858_v27  ;;  %5998 = vst [vmem:[#allocation61_spill] sm:$0xff] %v5158_v61  ;;  %v886_v27 = vld [vmem:[%s5827_s3 + $0x258] sm:$0xff] }
 0x2b2   :  { %3046 = vmatmul.msk.f32.gmra.mxu2 %vm1707_vm1, %v885_v0  ;;  %3097 = vmatmul.msk.f32.gmra.mxu3 %vm1707_vm1, %v936_v18  ;;  %v937_v0 = vld [vmem:[%s5827_s3 + $0x3f0] sm:$0xff]  ;;  %v1590_v18 = vpop.permute.xlu2 %1589 }
 0x2b5   :  { %v5149_v34 = vpop.f32.mrf.mxu2  ;;  %v2436_v35 = vpop.f32.mrf.mxu3 }
 0x2b6   :  { %5996 = vst [vmem:[#allocation29_spill] sm:$0xff] %v5149_v34  ;;  %v5151_v46 = vpop.f32.mrf.mxu0  ;;  %v5153_v48 = vpop.f32.mrf.mxu1 }
 0x2b7   :  { %5997 = vst [vmem:[#allocation48_spill] sm:$0xff] %v5153_v48  ;;  %v5178_v52 = vpop.permute.xlu0 %1344 }
 0x2b8   :  { %6001 = vst [vmem:[#allocation25_spill] sm:$0xff] %v5178_v52 }
 0x2b9   :  { %3020 = vmatmul.msk.f32.gmra.mxu1 %vm1707_vm1, %v859_v59  ;;  %v887_v59 = vld [vmem:[%s5827_s3 + $0x260] sm:$0xff] }
 0x2ba   :  { %3047 = vmatmul.msk.f32.gmra.mxu2 %vm1707_vm1, %v886_v27  ;;  %3098 = vmatmul.msk.f32.gmra.mxu3 %vm1707_vm1, %v937_v0  ;;  %v938_v27 = vld [vmem:[%s5827_s3 + $0x3f8] sm:$0xff]  ;;  %v5186_v0 = vpop.permute.xlu1 %1364 }
 0x2bb   :  { %6002 = vst [vmem:[#allocation44_spill] sm:$0xff] %v5186_v0 }
 0x2bd   :  { %v5169_v21 = vpop.f32.mrf.mxu2  ;;  %v2439_v34 = vpop.f32.mrf.mxu3 }
 0x2be   :  { %5999 = vst [vmem:[#allocation64_spill] sm:$0xff] %v5169_v21  ;;  %v5171_v48 = vpop.f32.mrf.mxu0  ;;  %v5173_v61 = vpop.f32.mrf.mxu1  ;;  %v2440_v11 = vadd.f32 %v2439_v34, %v4956_v63 }
 0x2bf   :  { %6000 = vst [vmem:[#allocation11_spill] sm:$0xff] %v5173_v61  ;;  %v1585_v21 = vpop.permute.xlu2 %1584 }
 0x2c0   :  { %v2603_v4 = vmax.f32 %v2440_v11, 0.0 }
 0x2c1   :  { %3021 = vmatmul.msk.f32.gmra.mxu1 %vm1707_vm1, %v860_v31  ;;  %v888_v31 = vld [vmem:[%s5827_s3 + $0x268] sm:$0xff] }
 0x2c2   :  { %3048 = vmatmul.msk.f32.gmra.mxu2 %vm1707_vm1, %v887_v59  ;;  %3099 = vmatmul.msk.f32.gmra.mxu3 %vm1707_vm1, %v938_v27  ;;  %v2437_v59 = vadd.f32 %v2436_v35, %v4988_v51  ;;  %v5203_v27 = vpop.permute.xlu0 %1359  ;;  %v5207_v34 = vpop.permute.xlu1 %1379  ;;  %v2425_v51 = vadd.f32 %v5048_v1, %v1595_v57 }
 0x2c5   :  { %v5191_v61 = vpop.f32.mrf.mxu2  ;;  %v2442_v52 = vpop.f32.mrf.mxu3 }
 0x2c6   :  { %6003 = vst [vmem:[#allocation9_spill] sm:$0xff] %v5191_v61  ;;  %v2443_v33 = vadd.f32 %v2442_v52, %v4924_v39  ;;  %v5195_v62 = vpop.f32.mrf.mxu0  ;;  %v5197_v22 = vpop.f32.mrf.mxu1  ;;  %v2434_v61 = vadd.f32 %v2433_v15, %v5038_v29  ;;  %v2431_v52 = vadd.f32 %v5107_v16, %v5071_v25  ;;  %v2602_v39 = vmax.f32 %v2437_v59, 0.0  ;;  %v889_v29 = vld [vmem:[%s5827_s3 + $0x270] sm:$0xff] }
 0x2c7   :  { %6004 = vst [vmem:[#allocation12_spill] sm:$0xff] %v5197_v22  ;;  %v1580_v63 = vpop.permute.xlu2 %1579  ;;  %v2422_v25 = vadd.f32 %v5020_v60, %v1590_v18 }
 0x2c8   :  { %v2604_v0 = vmax.f32 %v2443_v33, 0.0  ;;  %v2428_v33 = vadd.f32 %v5077_v10, %v5103_v9  ;;  %v2601_v35 = vmax.f32 %v2434_v61, 0.0  ;;  %v2600_v16 = vmax.f32 %v2431_v52, 0.0  ;;  %v890_v52 = vld [vmem:[%s5827_s3 + $0x278] sm:$0xff] }
 0x2c9   :  { %v2419_v61 = vadd.f32 %v4992_v54, %v1585_v21  ;;  %v2598_v10 = vmax.f32 %v2425_v51, 0.0  ;;  %v2416_v1 = vadd.f32 %v4962_v8, %v1580_v63  ;;  %v2597_v57 = vmax.f32 %v2422_v25, 0.0 }
 0x2ca   :  { %3049 = vmatmul.msk.f32.gmra.mxu2 %vm1707_vm1, %v888_v31  ;;  %2851 = vmatpush.msrb.mxu1 %v2604_v0  ;;  %v5223_v9 = vpop.permute.xlu0 %1384  ;;  %v5226_v0 = vpop.permute.xlu1 %1394 }
 0x2cb   :  { %v2596_v21 = vmax.f32 %v2419_v61, 0.0 }
 0x2cc   :  { %2852 = vmatpush.msrb.mxu1 %v2603_v4  ;;  %v2599_v4 = vmax.f32 %v2428_v33, 0.0 }
 0x2cd   :  { %v5211_v22 = vpop.f32.mrf.mxu2 }
 0x2ce   :  { %2853 = vmatpush.msrb.mxu1 %v2602_v39  ;;  %v2145_v15 = vpop.f32.mrf.mxu0  ;;  %v5215_v11 = vpop.f32.mrf.mxu1  ;;  %v2595_v39 = vmax.f32 %v2416_v1, 0.0  ;;  %v6006_v1 = vld [vmem:[#allocation38_spill] sm:$0xff] }
 0x2cf   :  { %v1575_v18 = vpop.permute.xlu2 %1574 }
 0x2d0   :  { %2854 = vmatpush.msrb.mxu1 %v2601_v35  ;;  %v2413_v54 = vadd.f32 %v4934_v24, %v1575_v18  ;;  %v891_v24 = vld [vmem:[%s5827_s3 + $0x280] sm:$0xff]  ;;  %v892_v18 = vld [vmem:[%s5827_s3 + $0x288] sm:$0xff] }
 0x2d2   :  { %3050 = vmatmul.msk.f32.gmra.mxu2 %vm1707_vm1, %v889_v29  ;;  %2855 = vmatpush.msrb.mxu1 %v2600_v16  ;;  %v2594_v33 = vmax.f32 %v2413_v54, 0.0  ;;  %v5238_v8 = vpop.permute.xlu0 %1389  ;;  %v5244_v51 = vpop.permute.xlu1 %1454 }
 0x2d4   :  { %2856 = vmatpush.msrb.mxu1 %v2599_v4 }
 0x2d5   :  { %v5228_v31 = vpop.f32.mrf.mxu2 }
 0x2d6   :  { %2857 = vmatpush.msrb.mxu1 %v2598_v10  ;;  %v2148_v59 = vpop.f32.mrf.mxu0  ;;  %v5231_v60 = vpop.f32.mrf.mxu1 }
 0x2d7   :  { %v2149_v54 = vadd.f32 %v2148_v59, %v4740_v58  ;;  %v2140_v58 = vadd.f32 %v5171_v48, %v4718_v44  ;;  %v5276_v59 = vpop.f32.mrf.mxu3  ;;  %v2134_v44 = vadd.f32 %v5131_v14, %v4676_v17  ;;  %v894_v17 = vld [vmem:[%s5827_s3 + $0x298] sm:$0xff] }
 0x2d8   :  { %2858 = vmatpush.msrb.mxu1 %v2597_v57  ;;  %6008 = vst [vmem:[#allocation38_spill] sm:$0xff] %v5276_v59 }
 0x2d9   :  { %v2503_v48 = vmax.f32 %v2140_v58, 0.0 }
 0x2da   :  { %3051 = vmatmul.msk.f32.gmra.mxu2 %vm1707_vm1, %v890_v52  ;;  %2859 = vmatpush.msrb.mxu1 %v2596_v21  ;;  %v5254_v61 = vpop.permute.xlu0 %1459  ;;  %v5261_v52 = vpop.permute.xlu1 %1439 }
 0x2dc   :  { %2860 = vmatpush.msrb.mxu1 %v2595_v39  ;;  %v6007_v39 = vld [vmem:[#allocation34_spill] sm:$0xff] }
 0x2dd   :  { %v5240_v63 = vpop.f32.mrf.mxu2 }
 0x2de   :  { %2861 = vmatpush.msrb.mxu1 %v2594_v33  ;;  %v2151_v35 = vpop.f32.mrf.mxu0  ;;  %v5242_v29 = vpop.f32.mrf.mxu1  ;;  %v2146_v33 = vadd.f32 %v2145_v15, %v6007_v39  ;;  %v893_v15 = vld [vmem:[%s5827_s3 + $0x290] sm:$0xff] }
 0x2df   :  { %v2152_v10 = vadd.f32 %v2151_v35, %v4726_v7  ;;  %v2143_v7 = vadd.f32 %v5195_v62, %v4698_v5  ;;  %v2506_v35 = vmax.f32 %v2149_v54, 0.0  ;;  %v6009_v62 = vld [vmem:[#allocation30_spill] sm:$0xff]  ;;  %v5303_v58 = vpop.f32.mrf.mxu3 }
 0x2e0   :  { %6011 = vst [vmem:[#allocation34_spill] sm:$0xff] %v5303_v58 }
 0x2e2   :  { %3052 = vmatmul.msk.f32.gmra.mxu2 %vm1707_vm1, %v891_v24  ;;  %v2507_v24 = vmax.f32 %v2152_v10, 0.0  ;;  %v5281_v5 = vpop.permute.xlu0 %1444  ;;  %v2137_v10 = vadd.f32 %v5151_v46, %v6009_v62  ;;  %v5286_v54 = vpop.permute.xlu1 %1424  ;;  %v6012_v62 = vld [vmem:[#allocation20_spill] sm:$0xff] }
 0x2e4   :  { %v2502_v39 = vmax.f32 %v2137_v10, 0.0  ;;  %v2119_v10 = vadd.f32 %v4994_v6, %v6012_v62  ;;  %v2113_v6 = vadd.f32 %v4936_v43, %v4636_v20  ;;  %v6015_v62 = vld [vmem:[#allocation65_spill] sm:$0xff] }
 0x2e5   :  { %v5250_v16 = vpop.f32.mrf.mxu2 }
 0x2e6   :  { %6005 = vst [vmem:[#allocation68_spill] sm:$0xff] %v5250_v16  ;;  %v2154_v25 = vpop.f32.mrf.mxu0  ;;  %v5252_v4 = vpop.f32.mrf.mxu1 }
 0x2e7   :  { %v2155_v57 = vadd.f32 %v2154_v25, %v6006_v1 }
 0x2e9   :  { %v2508_v21 = vmax.f32 %v2155_v57, 0.0  ;;  %v2505_v57 = vmax.f32 %v2146_v33, 0.0 }
 0x2ea   :  { %3053 = vmatmul.msk.f32.gmra.mxu2 %vm1707_vm1, %v892_v18  ;;  %v2504_v18 = vmax.f32 %v2143_v7, 0.0  ;;  %v6010_v7 = vld [vmem:[#allocation26_spill] sm:$0xff] }
 0x2eb   :  { %2677 = vmatpush.msra.mxu3 %v2508_v21  ;;  %v2131_v21 = vadd.f32 %v5109_v13, %v4694_v23  ;;  %v5306_v23 = vpop.permute.xlu0 %1429  ;;  %v2122_v13 = vadd.f32 %v5022_v40, %v4670_v32  ;;  %v895_v40 = vld [vmem:[%s5827_s3 + $0x2a0] sm:$0xff] }
 0x2ed   :  { %v5268_v25 = vpop.f32.mrf.mxu2  ;;  %2678 = vmatpush.msra.mxu3 %v2507_v24  ;;  %v2500_v14 = vmax.f32 %v2131_v21, 0.0  ;;  %v2497_v32 = vmax.f32 %v2122_v13, 0.0 }
 0x2ee   :  { %v5270_v1 = vpop.f32.mrf.mxu0  ;;  %v5272_v16 = vpop.f32.mrf.mxu1 }
 0x2ef   :  { %2679 = vmatpush.msra.mxu3 %v2506_v35  ;;  %v2128_v35 = vadd.f32 %v5079_v19, %v6010_v7  ;;  %v5310_v19 = vpop.permute.xlu1 %1409  ;;  %v6013_v7 = vld [vmem:[#allocation16_spill] sm:$0xff] }
 0x2f1   :  { %2680 = vmatpush.msra.mxu3 %v2505_v57  ;;  %v2501_v57 = vmax.f32 %v2134_v44, 0.0 }
 0x2f2   :  { %3054 = vmatmul.msk.f32.gmra.mxu2 %vm1707_vm1, %v893_v15  ;;  %v2499_v15 = vmax.f32 %v2128_v35, 0.0  ;;  %v2110_v35 = vadd.f32 %v4908_v2, %v6013_v7 }
 0x2f3   :  { %2681 = vmatpush.msra.mxu3 %v2504_v18  ;;  %v2498_v18 = vmax.f32 %v5059_v26, 0.0  ;;  %v2496_v26 = vmax.f32 %v2119_v10, 0.0  ;;  %v2200_v10 = vadd.f32 %v5111_v45, %v6015_v62  ;;  %v2194_v45 = vadd.f32 %v5050_v42, %v4878_v3  ;;  %v2629_v3 = vld [vmem:[%s5828_s5 + $0x40] sm:$0xff] }
 0x2f4   :  { %v2493_v2 = vmax.f32 %v2110_v35, 0.0 }
 0x2f5   :  { %v5292_v33 = vpop.f32.mrf.mxu2  ;;  %2682 = vmatpush.msra.mxu3 %v2503_v48  ;;  %v2521_v42 = vmax.f32 %v2194_v45, 0.0 }
 0x2f6   :  { %v5294_v24 = vpop.f32.mrf.mxu0  ;;  %v5296_v46 = vpop.f32.mrf.mxu1 }
 0x2f7   :  { %2683 = vmatpush.msra.mxu3 %v2502_v39  ;;  %v2116_v39 = vadd.f32 %v4964_v36, %v4622_v38  ;;  %v5333_v38 = vpop.permute.xlu0 %1414  ;;  %v2494_v36 = vmax.f32 %v2113_v6, 0.0 }
 0x2f9   :  { %2684 = vmatpush.msra.mxu3 %v2501_v57  ;;  %v2495_v57 = vmax.f32 %v2116_v39, 0.0 }
 0x2fa   :  { %3055 = vmatmul.msk.f32.gmra.mxu2 %vm1707_vm1, %v894_v17  ;;  %v5331_v17 = vpop.f32.mrf.mxu3 }
 0x2fb   :  { %2685 = vmatpush.msra.mxu3 %v2500_v14  ;;  %6014 = vst [vmem:[#allocation30_spill] sm:$0xff] %v5331_v17  ;;  %v2203_v14 = vadd.f32 %v5133_v37, %v4902_v41  ;;  %v2621_v41 = vld [vmem:[%s5828_s5] sm:$0xff]  ;;  %v2197_v37 = vadd.f32 %v5081_v56, %v4858_v49 }
 0x2fd   :  { %v5315_v44 = vpop.f32.mrf.mxu2  ;;  %2686 = vmatpush.msra.mxu3 %v2499_v15  ;;  %v5343_v15 = vpop.permute.xlu1 %1704  ;;  %v2524_v39 = vmax.f32 %v2203_v14, 0.0 }
 0x2fe   :  { %v5317_v48 = vpop.f32.mrf.mxu0  ;;  %v5319_v21 = vpop.f32.mrf.mxu1 }
 0x2ff   :  { %2687 = vmatpush.msra.mxu3 %v2498_v18  ;;  %v896_v18 = vld [vmem:[%s5827_s3 + $0x2a8] sm:$0xff] }
 0x301   :  { %2688 = vmatpush.msra.mxu3 %v2497_v32  ;;  %v2523_v32 = vmax.f32 %v2200_v10, 0.0 }
 0x302   :  { %3056 = vmatmul.msk.f32.gmra.mxu2 %vm1707_vm1, %v895_v40  ;;  %v6016_v40 = vld [vmem:[#allocation59_spill] sm:$0xff]  ;;  %v5360_v7 = vpop.f32.mrf.mxu3 }
 0x303   :  { %2689 = vmatpush.msra.mxu3 %v2496_v26  ;;  %v2191_v6 = vadd.f32 %v5024_v30, %v6016_v40  ;;  %v2522_v26 = vmax.f32 %v2197_v37, 0.0  ;;  %6017 = vst [vmem:[#allocation26_spill] sm:$0xff] %v5360_v7  ;;  %v897_v30 = vld [vmem:[%s5827_s3 + $0x2b0] sm:$0xff]  ;;  %v898_v40 = vld [vmem:[%s5827_s3 + $0x2b8] sm:$0xff] }
 0x304   :  { %v6076_v7 = vld [vmem:[#allocation33_spill] sm:$0xff] }
 0x305   :  { %v5337_v13 = vpop.f32.mrf.mxu2  ;;  %2690 = vmatpush.msra.mxu3 %v2495_v57  ;;  %v5366_v57 = vpop.permute.xlu0 %1399  ;;  %v2520_v62 = vmax.f32 %v2191_v6, 0.0 }
 0x306   :  { %v5339_v20 = vpop.f32.mrf.mxu0  ;;  %v5341_v43 = vpop.f32.mrf.mxu1 }
 0x307   :  { %2691 = vmatpush.msra.mxu3 %v2494_v36  ;;  %v2188_v36 = vadd.f32 %v4996_v28, %v4830_v55  ;;  %v5376_v14 = vpop.permute.xlu1 %1539  ;;  %v6019_v55 = vld [vmem:[#allocation55_spill] sm:$0xff] }
 0x308   :  { %6018 = vst [vmem:[#allocation20_spill] sm:$0xff] %v5376_v14  ;;  %v2182_v28 = vadd.f32 %v4938_v47, %v6019_v55  ;;  %v2637_v47 = vld [vmem:[%s5828_s5 + $0x80] sm:$0xff] }
 0x309   :  { %2692 = vmatpush.msra.mxu3 %v2493_v2  ;;  %v2185_v2 = vadd.f32 %v4966_v53, %v4844_v50  ;;  %v2519_v10 = vmax.f32 %v2188_v36, 0.0 }
 0x30a   :  { %3057 = vmatmul.msk.f32.gmra.mxu2 %vm1707_vm1, %v896_v18  ;;  %2693 = vmatmul.f32.vlgmr.msra.gmra.mxu3 %v2621_v41  ;;  %v6020_v18 = vld [vmem:[#allocation8_spill] sm:$0xff]  ;;  %v2517_v50 = vmax.f32 %v2182_v28, 0.0  ;;  %v5387_v53 = vpop.f32.mrf.mxu3  ;;  %v899_v28 = vld [vmem:[%s5827_s3 + $0x2c0] sm:$0xff] }
 0x30b   :  { %2706 = vmatpush.msrb.mxu3 %v2524_v39  ;;  %v2179_v41 = vadd.f32 %v6020_v18, %v4802_v12  ;;  %v2518_v37 = vmax.f32 %v2185_v2, 0.0 }
 0x30d   :  { %v5362_v35 = vpop.f32.mrf.mxu2  ;;  %2707 = vmatpush.msrb.mxu3 %v2523_v32  ;;  %v5395_v6 = vpop.permute.xlu0 %1699  ;;  %v2516_v12 = vmax.f32 %v2179_v41, 0.0  ;;  %v6024_v41 = vld [vmem:[#allocation31_spill] sm:$0xff] }
 0x30e   :  { %v2169_v49 = vpop.f32.mrf.mxu0  ;;  %v5364_v56 = vpop.f32.mrf.mxu1 }
 0x30f   :  { %2708 = vmatpush.msrb.mxu3 %v2522_v26  ;;  %v5398_v26 = vpop.permute.xlu1 %1534 }
 0x310   :  { %6021 = vst [vmem:[#allocation16_spill] sm:$0xff] %v5398_v26 }
 0x311   :  { %2709 = vmatpush.msrb.mxu3 %v2521_v42 }
 0x312   :  { %3058 = vmatmul.msk.f32.gmra.mxu2 %vm1707_vm1, %v897_v30  ;;  %2696 = vmatmul.f32.gmra.mxu3 %v2629_v3  ;;  %v6022_v3 = vld [vmem:[#allocation50_spill] sm:$0xff]  ;;  %v5410_v18 = vpop.f32.mrf.mxu3 }
 0x313   :  { %2710 = vmatpush.msrb.mxu3 %v2520_v62  ;;  %v6023_v62 = vld [vmem:[#allocation46_spill] sm:$0xff] }
 0x315   :  { %v5385_v39 = vpop.f32.mrf.mxu2  ;;  %2711 = vmatpush.msrb.mxu3 %v2519_v10  ;;  %v2645_v10 = vld [vmem:[%s5828_s5 + $0xc0] sm:$0xff] }
 0x316   :  { %v2172_v45 = vpop.f32.mrf.mxu0  ;;  %v2241_v32 = vpop.f32.mrf.mxu1 }
 0x317   :  { %2712 = vmatpush.msrb.mxu3 %v2518_v37  ;;  %v2173_v2 = vadd.f32 %v2172_v45, %v6022_v3  ;;  %v2170_v37 = vadd.f32 %v2169_v49, %v6024_v41  ;;  %v6025_v45 = vld [vmem:[#allocation41_spill] sm:$0xff] }
 0x318   :  { %v6027_v3 = vld [vmem:[#allocation45_spill] sm:$0xff] }
 0x319   :  { %2713 = vmatpush.msrb.mxu3 %v2517_v50  ;;  %v2513_v26 = vmax.f32 %v2170_v37, 0.0 }
 0x31a   :  { %3059 = vmatmul.msk.f32.gmra.mxu2 %vm1707_vm1, %v898_v40  ;;  %2699 = vmatmul.f32.gmra.mxu3 %v2637_v47  ;;  %v5414_v40 = vpop.permute.xlu0 %1694  ;;  %v2167_v47 = vadd.f32 %v5339_v20, %v6025_v45  ;;  %v900_v20 = vld [vmem:[%s5827_s3 + $0x2c8] sm:$0xff]  ;;  %v5432_v37 = vpop.f32.mrf.mxu3 }
 0x31b   :  { %2714 = vmatpush.msrb.mxu3 %v2516_v12  ;;  %v2514_v12 = vmax.f32 %v2173_v2, 0.0  ;;  %v6029_v2 = vld [vmem:[#allocation27_spill] sm:$0xff] }
 0x31c   :  { %v2158_v41 = vadd.f32 %v5270_v1, %v6029_v2 }
 0x31d   :  { %v5400_v36 = vpop.f32.mrf.mxu2 }
 0x31e   :  { %v2175_v42 = vpop.f32.mrf.mxu0  ;;  %v2244_v30 = vpop.f32.mrf.mxu1 }
 0x31f   :  { %v2176_v55 = vadd.f32 %v2175_v42, %v6023_v62  ;;  %v5418_v42 = vpop.permute.xlu1 %1529  ;;  %v2164_v62 = vadd.f32 %v5317_v48, %v6027_v3  ;;  %v6031_v3 = vld [vmem:[#allocation24_spill] sm:$0xff] }
 0x320   :  { %6026 = vst [vmem:[#allocation65_spill] sm:$0xff] %v5418_v42 }
 0x321   :  { %v2515_v50 = vmax.f32 %v2176_v55, 0.0  ;;  %v6028_v55 = vld [vmem:[#allocation54_spill] sm:$0xff] }
 0x322   :  { %3060 = vmatmul.msk.f32.gmra.mxu2 %vm1707_vm1, %v899_v28  ;;  %2702 = vmatmul.f32.gmra.mxu3 %v2645_v10  ;;  %v2161_v28 = vadd.f32 %v5294_v24, %v6028_v55  ;;  %v2512_v10 = vmax.f32 %v2167_v47, 0.0  ;;  %v5434_v45 = vpop.permute.xlu0 %1689  ;;  %v2509_v24 = vmax.f32 %v2158_v41, 0.0  ;;  %v6032_v55 = vld [vmem:[#allocation60_spill] sm:$0xff] }
 0x323   :  { %2715 = vmatpush.msrb.mxu3 %v2515_v50  ;;  %v2511_v50 = vmax.f32 %v2164_v62, 0.0 }
 0x324   :  { %v2510_v48 = vmax.f32 %v2161_v28, 0.0 }
 0x325   :  { %v5422_v14 = vpop.f32.mrf.mxu2  ;;  %2716 = vmatpush.msrb.mxu3 %v2514_v12 }
 0x326   :  { %v2247_v49 = vpop.f32.mrf.mxu1 }
 0x327   :  { %2717 = vmatpush.msrb.mxu3 %v2513_v26  ;;  %v2622_v26 = vld [vmem:[%s5828_s5 + $0x8] sm:$0xff]  ;;  %v5441_v1 = vpop.permute.xlu1 %1524  ;;  %v2248_v62 = vadd.f32 %v2247_v49, %v6031_v3 }
 0x328   :  { %6030 = vst [vmem:[#allocation59_spill] sm:$0xff] %v5441_v1  ;;  %v5451_v1 = vpop.f32.mrf.mxu3  ;;  %v6035_v49 = vld [vmem:[#allocation47_spill] sm:$0xff] }
 0x329   :  { %2718 = vmatpush.msrb.mxu3 %v2512_v10  ;;  %v901_v10 = vld [vmem:[%s5827_s3 + $0x2d0] sm:$0xff]  ;;  %v2539_v42 = vmax.f32 %v2248_v62, 0.0 }
 0x32a   :  { %3061 = vmatmul.msk.f32.gmra.mxu2 %vm1707_vm1, %v900_v20  ;;  %v6033_v20 = vld [vmem:[#allocation5_spill] sm:$0xff] }
 0x32b   :  { %2719 = vmatpush.msrb.mxu3 %v2511_v50  ;;  %v2245_v2 = vadd.f32 %v2244_v30, %v6033_v20  ;;  %v6034_v50 = vld [vmem:[#allocation28_spill] sm:$0xff]  ;;  %v2630_v30 = vld [vmem:[%s5828_s5 + $0x48] sm:$0xff] }
 0x32d   :  { %v5436_v47 = vpop.f32.mrf.mxu2  ;;  %2720 = vmatpush.msrb.mxu3 %v2510_v48  ;;  %v2242_v48 = vadd.f32 %v2241_v32, %v6034_v50  ;;  %v6040_v50 = vld [vmem:[#allocation3_spill] sm:$0xff] }
 0x32e   :  { %v2250_v12 = vpop.f32.mrf.mxu1 }
 0x32f   :  { %v2251_v28 = vadd.f32 %v2250_v12, %v6032_v55  ;;  %2721 = vmatpush.msrb.mxu3 %v2509_v24  ;;  %v2239_v12 = vadd.f32 %v5364_v56, %v6035_v49  ;;  %v2538_v24 = vmax.f32 %v2245_v2, 0.0  ;;  %v6036_v55 = vld [vmem:[#allocation4_spill] sm:$0xff]  ;;  %v2537_v62 = vmax.f32 %v2242_v48, 0.0  ;;  %v5467_v56 = vpop.permute.xlu1 %1519  ;;  %v6039_v2 = vld [vmem:[#allocation21_spill] sm:$0xff] }
 0x330   :  { %2722 = vmatmul.f32.vlgmr.msrb.gmra.mxu3 %v2622_v26  ;;  %v5460_v26 = vpop.permute.xlu0 %1684  ;;  %v2236_v32 = vadd.f32 %v5341_v43, %v6036_v55  ;;  %6037 = vst [vmem:[#allocation55_spill] sm:$0xff] %v5467_v56  ;;  %v2227_v48 = vadd.f32 %v5272_v16, %v6040_v50 }
 0x331   :  { %v2540_v41 = vmax.f32 %v2251_v28, 0.0  ;;  %v902_v28 = vld [vmem:[%s5827_s3 + $0x2d8] sm:$0xff]  ;;  %v2536_v20 = vmax.f32 %v2239_v12, 0.0  ;;  %v6041_v12 = vld [vmem:[#allocation15_spill] sm:$0xff] }
 0x332   :  { %3062 = vmatmul.msk.f32.gmra.mxu2 %vm1707_vm1, %v901_v10  ;;  %v6038_v10 = vld [vmem:[#allocation19_spill] sm:$0xff]  ;;  %v2535_v43 = vmax.f32 %v2236_v32, 0.0 }
 0x333   :  { %2735 = vmatpush.msra.mxu3 %v2540_v41  ;;  %v2230_v41 = vadd.f32 %v5296_v46, %v6039_v2  ;;  %v903_v46 = vld [vmem:[%s5827_s3 + $0x2e0] sm:$0xff]  ;;  %v6042_v32 = vld [vmem:[#allocation39_spill] sm:$0xff] }
 0x335   :  { %v5455_v3 = vpop.f32.mrf.mxu2  ;;  %2736 = vmatpush.msra.mxu3 %v2539_v42  ;;  %v2233_v42 = vadd.f32 %v5319_v21, %v6038_v10  ;;  %v2638_v21 = vld [vmem:[%s5828_s5 + $0x88] sm:$0xff]  ;;  %v2533_v55 = vmax.f32 %v2230_v41, 0.0  ;;  %v2532_v10 = vmax.f32 %v2227_v48, 0.0  ;;  %v6045_v41 = vld [vmem:[#allocation36_spill] sm:$0xff]  ;;  %v6046_v48 = vld [vmem:[#allocation57_spill] sm:$0xff] }
 0x337   :  { %2737 = vmatpush.msra.mxu3 %v2538_v24  ;;  %v2534_v49 = vmax.f32 %v2233_v42, 0.0  ;;  %v5493_v42 = vpop.permute.xlu1 %1514 }
 0x338   :  { %2725 = vmatmul.f32.gmra.mxu3 %v2630_v30  ;;  %v2224_v30 = vadd.f32 %v5252_v4, %v6041_v12  ;;  %v5488_v16 = vpop.permute.xlu0 %1679  ;;  %6043 = vst [vmem:[#allocation8_spill] sm:$0xff] %v5493_v42  ;;  %v6044_v4 = vld [vmem:[#allocation2_spill] sm:$0xff] }
 0x339   :  { %2738 = vmatpush.msra.mxu3 %v2537_v62  ;;  %v5483_v62 = vpop.f32.mrf.mxu3 }
 0x33a   :  { %3063 = vmatmul.msk.f32.gmra.mxu2 %vm1707_vm1, %v902_v28  ;;  %v2221_v28 = vadd.f32 %v5242_v29, %v6042_v32  ;;  %v2531_v2 = vmax.f32 %v2224_v30, 0.0  ;;  %v2646_v29 = vld [vmem:[%s5828_s5 + $0xc8] sm:$0xff] }
 0x33b   :  { %2739 = vmatpush.msra.mxu3 %v2536_v20  ;;  %v2218_v20 = vadd.f32 %v5231_v60, %v6044_v4  ;;  %v904_v60 = vld [vmem:[%s5827_s3 + $0x2e8] sm:$0xff]  ;;  %v6050_v4 = vld [vmem:[#allocation56_spill] sm:$0xff] }
 0x33c   :  { %v2530_v50 = vmax.f32 %v2221_v28, 0.0  ;;  %v6048_v30 = vld [vmem:[#allocation67_spill] sm:$0xff] }
 0x33d   :  { %v5476_v24 = vpop.f32.mrf.mxu2  ;;  %2740 = vmatpush.msra.mxu3 %v2535_v43  ;;  %v2215_v43 = vadd.f32 %v5215_v11, %v6045_v41  ;;  %v6049_v11 = vld [vmem:[#allocation11_spill] sm:$0xff] }
 0x33f   :  { %2741 = vmatpush.msra.mxu3 %v2534_v49  ;;  %v2528_v32 = vmax.f32 %v2215_v43, 0.0 }
 0x340   :  { %2728 = vmatmul.f32.gmra.mxu3 %v2638_v21  ;;  %v6047_v21 = vld [vmem:[#allocation12_spill] sm:$0xff] }
 0x341   :  { %2742 = vmatpush.msra.mxu3 %v2533_v55  ;;  %v2212_v12 = vadd.f32 %v6047_v21, %v6046_v48  ;;  %v2529_v55 = vmax.f32 %v2218_v20, 0.0  ;;  %v5511_v28 = vpop.f32.mrf.mxu3 }
 0x342   :  { %3064 = vmatmul.msk.f32.gmra.mxu2 %vm1707_vm1, %v903_v46  ;;  %v2209_v46 = vadd.f32 %v6049_v11, %v6048_v30  ;;  %v6053_v30 = vld [vmem:[#allocation49_spill] sm:$0xff] }
 0x343   :  { %2743 = vmatpush.msra.mxu3 %v2532_v10  ;;  %v5514_v10 = vpop.permute.xlu0 %1674  ;;  %v2527_v41 = vmax.f32 %v2212_v12, 0.0  ;;  %v2623_v12 = vld [vmem:[%s5828_s5 + $0x10] sm:$0xff]  ;;  %v2293_v11 = vadd.f32 %v5211_v22, %v6053_v30  ;;  %v6060_v30 = vld [vmem:[#allocation7_spill] sm:$0xff] }
 0x344   :  { %v2526_v48 = vmax.f32 %v2209_v46, 0.0  ;;  %v6055_v46 = vld [vmem:[#allocation9_spill] sm:$0xff] }
 0x345   :  { %v5499_v49 = vpop.f32.mrf.mxu2  ;;  %2744 = vmatpush.msra.mxu3 %v2531_v2  ;;  %v6051_v2 = vld [vmem:[#allocation48_spill] sm:$0xff] }
 0x346   :  { %v2206_v20 = vadd.f32 %v6051_v2, %v6050_v4  ;;  %v6056_v2 = vld [vmem:[#allocation44_spill] sm:$0xff] }
 0x347   :  { %2745 = vmatpush.msra.mxu3 %v2530_v50  ;;  %v5518_v50 = vpop.permute.xlu1 %1509 }
 0x348   :  { %2731 = vmatmul.f32.gmra.mxu3 %v2646_v29  ;;  %6052 = vst [vmem:[#allocation50_spill] sm:$0xff] %v5518_v50  ;;  %v2299_v29 = vadd.f32 %v5240_v63, %v5223_v9  ;;  %v2525_v43 = vmax.f32 %v2206_v20, 0.0  ;;  %v6054_v63 = vld [vmem:[#allocation17_spill] sm:$0xff]  ;;  %v6057_v20 = vld [vmem:[#allocation64_spill] sm:$0xff] }
 0x349   :  { %2746 = vmatpush.msra.mxu3 %v2529_v55  ;;  %v2296_v55 = vadd.f32 %v5228_v31, %v5207_v34  ;;  %v2290_v34 = vadd.f32 %v6055_v46, %v6054_v63  ;;  %v6062_v46 = vld [vmem:[#allocation61_spill] sm:$0xff] }
 0x34a   :  { %3065 = vmatmul.msk.f32.gmra.mxu2 %vm1707_vm1, %v904_v60  ;;  %v905_v60 = vld [vmem:[%s5827_s3 + $0x2f0] sm:$0xff]  ;;  %v2556_v9 = vmax.f32 %v2299_v29, 0.0  ;;  %v6059_v29 = vld [vmem:[#allocation29_spill] sm:$0xff] }
 0x34b   :  { %2747 = vmatpush.msra.mxu3 %v2528_v32  ;;  %v2555_v31 = vmax.f32 %v2296_v55, 0.0  ;;  %v5537_v32 = vpop.f32.mrf.mxu3  ;;  %v5539_v4 = vpop.permute.xlu0 %1669  ;;  %v906_v55 = vld [vmem:[%s5827_s3 + $0x2f8] sm:$0xff] }
 0x34d   :  { %v5522_v21 = vpop.f32.mrf.mxu2  ;;  %2748 = vmatpush.msra.mxu3 %v2527_v41  ;;  %v2287_v41 = vadd.f32 %v6057_v20, %v6056_v2  ;;  %v2253_v2 = vpop.f32.mrf.mxu1  ;;  %v6064_v20 = vld [vmem:[#allocation25_spill] sm:$0xff] }
 0x34f   :  { %2749 = vmatpush.msra.mxu3 %v2526_v48  ;;  %v2554_v48 = vmax.f32 %v2293_v11, 0.0  ;;  %v5543_v22 = vpop.permute.xlu1 %1504  ;;  %v2552_v63 = vmax.f32 %v2287_v41, 0.0  ;;  %v6066_v41 = vld [vmem:[#allocation6_spill] sm:$0xff] }
 0x350   :  { %6058 = vst [vmem:[#allocation46_spill] sm:$0xff] %v5543_v22 }
 0x351   :  { %2750 = vmatpush.msra.mxu3 %v2525_v43  ;;  %v2284_v43 = vadd.f32 %v6059_v29, %v5203_v27  ;;  %v6063_v27 = vld [vmem:[#allocation40_spill] sm:$0xff] }
 0x352   :  { %3066 = vmatmul.msk.f32.gmra.mxu2 %vm1707_vm1, %v905_v60  ;;  %2751 = vmatmul.f32.vlgmr.msra.gmra.mxu3 %v2623_v12  ;;  %v2553_v60 = vmax.f32 %v2290_v34, 0.0  ;;  %v2631_v12 = vld [vmem:[%s5828_s5 + $0x50] sm:$0xff]  ;;  %v2278_v34 = vadd.f32 %v6063_v27, %v6062_v46  ;;  %v6070_v46 = vld [vmem:[#allocation37_spill] sm:$0xff] }
 0x353   :  { %2764 = vmatpush.msrb.mxu3 %v2556_v9  ;;  %v6061_v9 = vld [vmem:[#allocation66_spill] sm:$0xff]  ;;  %v5560_v42 = vpop.f32.mrf.mxu3 }
 0x354   :  { %v2281_v11 = vadd.f32 %v6061_v9, %v6060_v30  ;;  %v5562_v30 = vpop.permute.xlu0 %1664  ;;  %v2639_v9 = vld [vmem:[%s5828_s5 + $0x90] sm:$0xff] }
 0x355   :  { %v2343_v50 = vpop.f32.mrf.mxu2  ;;  %2765 = vmatpush.msrb.mxu3 %v2555_v31  ;;  %v2551_v31 = vmax.f32 %v2284_v43, 0.0  ;;  %v907_v43 = vld [vmem:[%s5827_s3 + $0x300] sm:$0xff] }
 0x356   :  { %v2550_v22 = vmax.f32 %v2281_v11, 0.0 }
 0x357   :  { %2766 = vmatpush.msrb.mxu3 %v2554_v48  ;;  %v6065_v48 = vld [vmem:[#allocation63_spill] sm:$0xff]  ;;  %v5572_v11 = vpop.permute.xlu1 %1499 }
 0x358   :  { %v2275_v29 = vadd.f32 %v6065_v48, %v6064_v20  ;;  %6068 = vst [vmem:[#allocation31_spill] sm:$0xff] %v5572_v11  ;;  %v2256_v11 = vpop.f32.mrf.mxu1 }
 0x359   :  { %2767 = vmatpush.msrb.mxu3 %v2553_v60  ;;  %v6067_v60 = vld [vmem:[#allocation58_spill] sm:$0xff] }
 0x35a   :  { %3067 = vmatmul.msk.f32.gmra.mxu2 %vm1707_vm1, %v906_v55  ;;  %2754 = vmatmul.f32.gmra.mxu3 %v2631_v12  ;;  %v2272_v55 = vadd.f32 %v6067_v60, %v6066_v41  ;;  %v2549_v12 = vmax.f32 %v2278_v34, 0.0  ;;  %v6071_v34 = vld [vmem:[#allocation22_spill] sm:$0xff]  ;;  %v6074_v60 = vld [vmem:[#allocation32_spill] sm:$0xff] }
 0x35b   :  { %2768 = vmatpush.msrb.mxu3 %v2552_v63  ;;  %v6069_v63 = vld [vmem:[#allocation53_spill] sm:$0xff]  ;;  %v6073_v41 = vld [vmem:[#allocation42_spill] sm:$0xff] }
 0x35c   :  { %v2269_v27 = vadd.f32 %v6070_v46, %v6069_v63  ;;  %v2547_v48 = vmax.f32 %v2272_v55, 0.0  ;;  %v2263_v59 = vadd.f32 %v6074_v60, %v6073_v41  ;;  %v6077_v63 = vld [vmem:[#allocation10_spill] sm:$0xff]  ;;  %v5585_v46 = vpop.f32.mrf.mxu3  ;;  %v908_v55 = vld [vmem:[%s5827_s3 + $0x308] sm:$0xff] }
 0x35d   :  { %v2346_v56 = vpop.f32.mrf.mxu2  ;;  %2769 = vmatpush.msrb.mxu3 %v2551_v31  ;;  %v2548_v31 = vmax.f32 %v2275_v29, 0.0  ;;  %v2260_v29 = vadd.f32 %v6077_v63, %v6076_v7 }
 0x35e   :  { %v2546_v58 = vmax.f32 %v2269_v27, 0.0  ;;  %v2544_v27 = vmax.f32 %v2263_v59, 0.0  ;;  %v2344_v59 = vadd.f32 %v2343_v50, %v5254_v61 }
 0x35f   :  { %2770 = vmatpush.msrb.mxu3 %v2550_v22  ;;  %v6072_v22 = vld [vmem:[#allocation52_spill] sm:$0xff]  ;;  %v5597_v7 = vpop.permute.xlu1 %1494 }
 0x360   :  { %v2266_v20 = vadd.f32 %v6072_v22, %v6071_v34  ;;  %v6079_v22 = vld [vmem:[#allocation13_spill] sm:$0xff]  ;;  %v2571_v50 = vmax.f32 %v2344_v59, 0.0  ;;  %v6083_v59 = vld [vmem:[#allocation18_spill] sm:$0xff] }
 0x361   :  { %2771 = vmatpush.msrb.mxu3 %v2549_v12 }
 0x362   :  { %3068 = vmatmul.msk.f32.gmra.mxu2 %vm1707_vm1, %v907_v43  ;;  %2757 = vmatmul.f32.gmra.mxu3 %v2639_v9  ;;  %v2545_v12 = vmax.f32 %v2266_v20, 0.0  ;;  %v2647_v43 = vld [vmem:[%s5828_s5 + $0xd0] sm:$0xff]  ;;  %v5593_v9 = vpop.permute.xlu0 %1659  ;;  %v2254_v20 = vadd.f32 %v2253_v2, %v6079_v22 }
 0x363   :  { %2772 = vmatpush.msrb.mxu3 %v2548_v31  ;;  %v6078_v31 = vld [vmem:[#allocation43_spill] sm:$0xff] }
 0x364   :  { %v2257_v34 = vadd.f32 %v2256_v11, %v6078_v31  ;;  %v909_v11 = vld [vmem:[%s5827_s3 + $0x310] sm:$0xff]  ;;  %v5612_v2 = vpop.f32.mrf.mxu3 }
 0x365   :  { %v5581_v17 = vpop.f32.mrf.mxu2  ;;  %2773 = vmatpush.msrb.mxu3 %v2547_v48  ;;  %v6080_v48 = vld [vmem:[#allocation23_spill] sm:$0xff] }
 0x366   :  { %6075 = vst [vmem:[#allocation41_spill] sm:$0xff] %v5581_v17  ;;  %v2347_v41 = vadd.f32 %v2346_v56, %v6080_v48  ;;  %v2542_v60 = vmax.f32 %v2257_v34, 0.0  ;;  %v2541_v17 = vmax.f32 %v2254_v20, 0.0  ;;  %v2624_v56 = vld [vmem:[%s5828_s5 + $0x18] sm:$0xff] }
 0x367   :  { %2774 = vmatpush.msrb.mxu3 %v2546_v58  ;;  %v2543_v58 = vmax.f32 %v2260_v29, 0.0  ;;  %v2341_v29 = vadd.f32 %v5522_v21, %v5244_v51  ;;  %v2335_v51 = vadd.f32 %v5476_v24, %v5281_v5  ;;  %v910_v34 = vld [vmem:[%s5827_s3 + $0x318] sm:$0xff]  ;;  %v2326_v24 = vadd.f32 %v5422_v14, %v5306_v23  ;;  %v911_v14 = vld [vmem:[%s5827_s3 + $0x320] sm:$0xff] }
 0x368   :  { %v2632_v5 = vld [vmem:[%s5828_s5 + $0x58] sm:$0xff] }
 0x369   :  { %2775 = vmatpush.msrb.mxu3 %v2545_v12  ;;  %v2572_v12 = vmax.f32 %v2347_v41, 0.0  ;;  %v2570_v21 = vmax.f32 %v2341_v29, 0.0  ;;  %v2568_v20 = vmax.f32 %v2335_v51, 0.0  ;;  %v2565_v29 = vmax.f32 %v2326_v24, 0.0 }
 0x36a   :  { %3069 = vmatmul.msk.f32.gmra.mxu2 %vm1707_vm1, %v908_v55  ;;  %2760 = vmatmul.f32.gmra.mxu3 %v2647_v43  ;;  %v6081_v55 = vld [vmem:[#allocation35_spill] sm:$0xff]  ;;  %v5617_v43 = vpop.permute.xlu0 %1654  ;;  %v2308_v51 = vadd.f32 %v5292_v33, %v5366_v57 }
 0x36b   :  { %2776 = vmatpush.msrb.mxu3 %v2544_v27  ;;  %v2338_v61 = vadd.f32 %v5499_v49, %v6081_v55  ;;  %v5621_v27 = vpop.permute.xlu1 %1489  ;;  %v6084_v55 = vld [vmem:[#allocation51_spill] sm:$0xff] }
 0x36d   :  { %v5601_v63 = vpop.f32.mrf.mxu2  ;;  %2777 = vmatpush.msrb.mxu3 %v2543_v58  ;;  %v2569_v49 = vmax.f32 %v2338_v61, 0.0  ;;  %v6082_v58 = vld [vmem:[#allocation14_spill] sm:$0xff]  ;;  %v2311_v61 = vadd.f32 %v5315_v44, %v6084_v55  ;;  %v2648_v44 = vld [vmem:[%s5828_s5 + $0xd8] sm:$0xff] }
 0x36e   :  { %v2329_v22 = vadd.f32 %v5436_v47, %v6082_v58 }
 0x36f   :  { %2778 = vmatpush.msrb.mxu3 %v2542_v60 }
 0x370   :  { %v2566_v41 = vmax.f32 %v2329_v22, 0.0  ;;  %v2559_v22 = vmax.f32 %v2308_v51, 0.0 }
 0x371   :  { %2779 = vmatpush.msrb.mxu3 %v2541_v17  ;;  %v2332_v17 = vadd.f32 %v5455_v3, %v5261_v52  ;;  %v2487_v52 = vpop.f32.mrf.mxu3  ;;  %v2323_v3 = vadd.f32 %v5400_v36, %v5286_v54  ;;  %v2317_v54 = vadd.f32 %v5362_v35, %v5333_v38 }
 0x372   :  { %3070 = vmatmul.msk.f32.gmra.mxu2 %vm1707_vm1, %v909_v11  ;;  %2780 = vmatmul.f32.vlgmr.msrb.gmra.mxu3 %v2624_v56  ;;  %v5640_v47 = vpop.permute.xlu0 %1649  ;;  %v2320_v11 = vadd.f32 %v5385_v39, %v6083_v59  ;;  %v2314_v39 = vadd.f32 %v5337_v13, %v5310_v19  ;;  %v2305_v19 = vadd.f32 %v5268_v25, %v5226_v0  ;;  %v2560_v13 = vmax.f32 %v2311_v61, 0.0 }
 0x373   :  { %2793 = vmatpush.msra.mxu3 %v2572_v12  ;;  %v2567_v48 = vmax.f32 %v2332_v17, 0.0  ;;  %v5646_v23 = vpop.permute.xlu1 %1484  ;;  %v2564_v36 = vmax.f32 %v2323_v3, 0.0  ;;  %v2640_v12 = vld [vmem:[%s5828_s5 + $0x98] sm:$0xff]  ;;  %v2482_v3 = vadd.f32 %v5585_v46, %v5434_v45  ;;  %v2473_v45 = vadd.f32 %v5511_v28, %v5514_v10 }
 0x374   :  { %v2563_v56 = vmax.f32 %v2320_v11, 0.0  ;;  %v2558_v57 = vmax.f32 %v2305_v19, 0.0 }
 0x375   :  { %2794 = vmatpush.msra.mxu3 %v2571_v50  ;;  %v5623_v31 = vpop.f32.mrf.mxu2  ;;  %v2562_v50 = vmax.f32 %v2317_v54, 0.0  ;;  %v2617_v11 = vmax.f32 %v2482_v3, 0.0 }
 0x377   :  { %2795 = vmatpush.msra.mxu3 %v2570_v21  ;;  %v2561_v21 = vmax.f32 %v2314_v39, 0.0 }
 0x379   :  { %2796 = vmatpush.msra.mxu3 %v2569_v49  ;;  %v2490_v38 = vpop.f32.mrf.mxu3 }
 0x37a   :  { %3071 = vmatmul.msk.f32.gmra.mxu2 %vm1707_vm1, %v910_v34  ;;  %2783 = vmatmul.f32.gmra.mxu3 %v2632_v5  ;;  %v5665_v17 = vpop.permute.xlu0 %1644  ;;  %v6085_v34 = vld [vmem:[#allocation68_spill] sm:$0xff]  ;;  %v2491_v33 = vadd.f32 %v2490_v38, %v5343_v15  ;;  %v2488_v5 = vadd.f32 %v2487_v52, %v5395_v6  ;;  %v2479_v6 = vadd.f32 %v5560_v42, %v5460_v26  ;;  %v5702_v26 = vpop.permute.xlu2 %1569  ;;  %v6087_v38 = vld [vmem:[#allocation30_spill] sm:$0xff] }
 0x37b   :  { %2797 = vmatpush.msra.mxu3 %v2568_v20  ;;  %v5672_v49 = vpop.permute.xlu1 %1479  ;;  %v2302_v58 = vadd.f32 %v6085_v34, %v5238_v8  ;;  %v2625_v8 = vld [vmem:[%s5828_s5 + $0x20] sm:$0xff]  ;;  %v2470_v42 = vadd.f32 %v5483_v62, %v5539_v4  ;;  %v2461_v62 = vadd.f32 %v5410_v18, %v5617_v43 }
 0x37c   :  { %v2620_v24 = vmax.f32 %v2491_v33, 0.0  ;;  %v2616_v46 = vmax.f32 %v2479_v6, 0.0  ;;  %v6089_v34 = vld [vmem:[#allocation38_spill] sm:$0xff] }
 0x37d   :  { %2798 = vmatpush.msra.mxu3 %v2567_v48  ;;  %v5642_v60 = vpop.f32.mrf.mxu2  ;;  %v2557_v25 = vmax.f32 %v2302_v58, 0.0  ;;  %v2485_v48 = vadd.f32 %v5612_v2, %v5414_v40  ;;  %v2476_v2 = vadd.f32 %v5537_v32, %v5488_v16  ;;  %v2467_v32 = vadd.f32 %v5451_v1, %v5562_v30  ;;  %v2641_v1 = vld [vmem:[%s5828_s5 + $0xa0] sm:$0xff] }
 0x37e   :  { %v2613_v39 = vmax.f32 %v2470_v42, 0.0 }
 0x37f   :  { %2799 = vmatpush.msra.mxu3 %v2566_v41  ;;  %v2619_v41 = vmax.f32 %v2488_v5, 0.0  ;;  %v2618_v52 = vmax.f32 %v2485_v48, 0.0  ;;  %v2615_v54 = vmax.f32 %v2476_v2, 0.0  ;;  %v2612_v4 = vmax.f32 %v2467_v32, 0.0 }
 0x381   :  { %2800 = vmatpush.msra.mxu3 %v2565_v29 }
 0x382   :  { %3072 = vmatmul.msk.f32.gmra.mxu2 %vm1707_vm1, %v911_v14  ;;  %2786 = vmatmul.f32.gmra.mxu3 %v2640_v12  ;;  %v1640_v15 = vpop.permute.xlu0 %1639  ;;  %v2633_v14 = vld [vmem:[%s5828_s5 + $0x60] sm:$0xff]  ;;  %v2464_v12 = vadd.f32 %v5432_v37, %v5593_v9  ;;  %v5721_v61 = vpop.permute.xlu2 %1564 }
 0x383   :  { %2801 = vmatpush.msra.mxu3 %v2564_v36  ;;  %v5689_v59 = vpop.permute.xlu1 %1474  ;;  %v2614_v36 = vmax.f32 %v2473_v45, 0.0  ;;  %v6086_v37 = vld [vmem:[#allocation26_spill] sm:$0xff]  ;;  %v2452_v51 = vadd.f32 %v6087_v38, %v1640_v15  ;;  %v6092_v38 = vld [vmem:[#allocation16_spill] sm:$0xff] }
 0x384   :  { %v2611_v55 = vmax.f32 %v2464_v12, 0.0  ;;  %v2455_v9 = vadd.f32 %v6086_v37, %v5665_v17  ;;  %v6090_v37 = vld [vmem:[#allocation20_spill] sm:$0xff] }
 0x385   :  { %2802 = vmatpush.msra.mxu3 %v2563_v56  ;;  %v5661_v35 = vpop.f32.mrf.mxu2  ;;  %v2458_v56 = vadd.f32 %v5387_v53, %v5640_v47  ;;  %v2607_v58 = vmax.f32 %v2452_v51, 0.0 }
 0x386   :  { %v2608_v47 = vmax.f32 %v2455_v9, 0.0 }
 0x387   :  { %2803 = vmatpush.msra.mxu3 %v2562_v50  ;;  %v2610_v50 = vmax.f32 %v2461_v62, 0.0 }
 0x389   :  { %2804 = vmatpush.msra.mxu3 %v2561_v21  ;;  %v2609_v21 = vmax.f32 %v2458_v56, 0.0 }
 0x38a   :  { %2789 = vmatmul.f32.gmra.mxu3 %v2648_v44  ;;  %v1635_v16 = vpop.permute.xlu0 %1634  ;;  %v2649_v44 = vld [vmem:[%s5828_s5 + $0xe0] sm:$0xff] }
 0x38b   :  { %2805 = vmatpush.msra.mxu3 %v2560_v13  ;;  %v5708_v28 = vpop.permute.xlu1 %1469  ;;  %v6088_v13 = vld [vmem:[#allocation34_spill] sm:$0xff] }
 0x38c   :  { %v2449_v53 = vadd.f32 %v6088_v13, %v1635_v16 }
 0x38d   :  { %2806 = vmatpush.msra.mxu3 %v2559_v22  ;;  %v5677_v20 = vpop.f32.mrf.mxu2  ;;  %v5679_v0 = vpop.f32.mrf.mxu3 }
 0x38e   :  { %v2606_v33 = vmax.f32 %v2449_v53, 0.0 }
 0x38f   :  { %2807 = vmatpush.msra.mxu3 %v2558_v57  ;;  %v5733_v57 = vpop.permute.xlu2 %1559 }
 0x391   :  { %2808 = vmatpush.msra.mxu3 %v2557_v25 }
 0x392   :  { %2809 = vmatmul.f32.vlgmr.msra.gmra.mxu3 %v2625_v8  ;;  %v1630_v18 = vpop.permute.xlu0 %1629 }
 0x393   :  { %2880 = vmatpush.msrb.mxu3 %v2620_v24  ;;  %v2675_v19 = vpop.permute.xlu1 %2674  ;;  %v2446_v17 = vadd.f32 %v6089_v34, %v1630_v18 }
 0x395   :  { %2881 = vmatpush.msrb.mxu3 %v2619_v41  ;;  %v5693_v40 = vpop.f32.mrf.mxu2  ;;  %v2697_v29 = vpop.f32.mrf.mxu3  ;;  %v2605_v5 = vmax.f32 %v2446_v17, 0.0 }
 0x397   :  { %2882 = vmatpush.msrb.mxu3 %v2618_v52  ;;  %v5738_v6 = vpop.permute.xlu2 %1554 }
 0x399   :  { %2883 = vmatpush.msrb.mxu3 %v2617_v11 }
 0x39a   :  { %2812 = vmatmul.f32.gmra.mxu3 %v2633_v14  ;;  %v5735_v24 = vpop.permute.xlu0 %1549 }
 0x39b   :  { %2884 = vmatpush.msrb.mxu3 %v2616_v46  ;;  %v2660_v48 = vpop.permute.xlu1 %2659 }
 0x39c   :  { %v2695_v8 = vadd.f32 %v5679_v0, %v2660_v48  ;;  %v6096_v48 = vld [vmem:[#allocation8_spill] sm:$0xff] }
 0x39d   :  { %2885 = vmatpush.msrb.mxu3 %v2615_v54  ;;  %v5710_v10 = vpop.f32.mrf.mxu2  ;;  %v2700_v30 = vpop.f32.mrf.mxu3 }
 0x39f   :  { %2886 = vmatpush.msrb.mxu3 %v2614_v36  ;;  %v2670_v14 = vpop.permute.xlu2 %2669 }
 0x3a0   :  { %v2701_v42 = vadd.f32 %v2700_v30, %v2670_v14 }
 0x3a1   :  { %2887 = vmatpush.msrb.mxu3 %v2613_v39 }
 0x3a2   :  { %2815 = vmatmul.f32.gmra.mxu3 %v2641_v1  ;;  %v2665_v52 = vpop.permute.xlu0 %2664 }
 0x3a3   :  { %2888 = vmatpush.msrb.mxu3 %v2612_v4  ;;  %v2698_v2 = vadd.f32 %v2697_v29, %v2665_v52  ;;  %v6091_v29 = vld [vmem:[#allocation62_spill] sm:$0xff] }
 0x3a5   :  { %2889 = vmatpush.msrb.mxu3 %v2611_v55  ;;  %v5725_v43 = vpop.f32.mrf.mxu2  ;;  %v2703_v22 = vpop.f32.mrf.mxu3 }
 0x3a6   :  { %v2704_v36 = vadd.f32 %v2703_v22, %v2675_v19  ;;  %v6094_v19 = vld [vmem:[#allocation59_spill] sm:$0xff] }
 0x3a7   :  { %2890 = vmatpush.msrb.mxu3 %v2610_v50 }
 0x3a9   :  { %2891 = vmatpush.msrb.mxu3 %v2609_v21  ;;  %v6093_v21 = vld [vmem:[#allocation65_spill] sm:$0xff] }
 0x3aa   :  { %2818 = vmatmul.f32.gmra.mxu3 %v2649_v44 }
 0x3ab   :  { %2892 = vmatpush.msrb.mxu3 %v2608_v47 }
 0x3ad   :  { %2893 = vmatpush.msrb.mxu3 %v2607_v58  ;;  %v2376_v25 = vpop.f32.mrf.mxu2  ;;  %v6095_v58 = vld [vmem:[#allocation55_spill] sm:$0xff] }
 0x3af   :  { %2894 = vmatpush.msrb.mxu3 %v2606_v33 }
 0x3b1   :  { %2895 = vmatpush.msrb.mxu3 %v2605_v5 }
 0x3b3   :  { %v2723_v15 = vpop.f32.mrf.mxu3 }
 0x3b4   :  { %v2724_v3 = vadd.f32 %v2723_v15, %v2695_v8  ;;  %v2377_v8 = vadd.f32 %v2376_v25, %v6096_v48  ;;  %v2365_v25 = vadd.f32 %v5677_v20, %v5597_v7 }
 0x3b5   :  { %v2379_v41 = vpop.f32.mrf.mxu2 }
 0x3b6   :  { %v2380_v22 = vadd.f32 %v2379_v41, %v6095_v58  ;;  %v6099_v41 = vld [vmem:[#allocation31_spill] sm:$0xff]  ;;  %v2651_v58 = vld [vmem:[%s5828_s5 + $0xf0] sm:$0xff] }
 0x3bb   :  { %v2726_v11 = vpop.f32.mrf.mxu3 }
 0x3bc   :  { %v2727_v45 = vadd.f32 %v2726_v11, %v2698_v2  ;;  %v2583_v2 = vmax.f32 %v2380_v22, 0.0  ;;  %v6098_v11 = vld [vmem:[#allocation46_spill] sm:$0xff] }
 0x3bd   :  { %v2382_v46 = vpop.f32.mrf.mxu2 }
 0x3be   :  { %v2383_v47 = vadd.f32 %v2382_v46, %v6094_v19  ;;  %v2582_v46 = vmax.f32 %v2377_v8, 0.0 }
 0x3c0   :  { %v2584_v15 = vmax.f32 %v2383_v47, 0.0 }
 0x3c3   :  { %v2729_v54 = vpop.f32.mrf.mxu3 }
 0x3c4   :  { %v2730_v16 = vadd.f32 %v2729_v54, %v2701_v42  ;;  %v2368_v54 = vadd.f32 %v5693_v40, %v6099_v41  ;;  %v2359_v40 = vadd.f32 %v5642_v60, %v5646_v23  ;;  %v6100_v60 = vld [vmem:[#allocation41_spill] sm:$0xff] }
 0x3c5   :  { %v2385_v32 = vpop.f32.mrf.mxu2  ;;  %v2350_v23 = vadd.f32 %v6100_v60, %v5708_v28 }
 0x3c6   :  { %v2386_v13 = vadd.f32 %v2385_v32, %v6093_v21  ;;  %v2576_v20 = vmax.f32 %v2359_v40, 0.0 }
 0x3c8   :  { %v2585_v33 = vmax.f32 %v2386_v13, 0.0 }
 0x3cb   :  { %v2732_v12 = vpop.f32.mrf.mxu3 }
 0x3cc   :  { %v2733_v39 = vadd.f32 %v2732_v12, %v2704_v36  ;;  %v2579_v12 = vmax.f32 %v2368_v54, 0.0 }
 0x3cd   :  { %v2388_v62 = vpop.f32.mrf.mxu2 }
 0x3ce   :  { %v2389_v51 = vadd.f32 %v2388_v62, %v6092_v38 }
 0x3d0   :  { %v2586_v44 = vmax.f32 %v2389_v51, 0.0  ;;  %v2634_v51 = vld [vmem:[%s5828_s5 + $0x68] sm:$0xff] }
 0x3d5   :  { %v2391_v0 = vpop.f32.mrf.mxu2  ;;  %v2752_v4 = vpop.f32.mrf.mxu3 }
 0x3d6   :  { %v2753_v1 = vadd.f32 %v2752_v4, %v2724_v3  ;;  %v2392_v9 = vadd.f32 %v2391_v0, %v6090_v37  ;;  %v6097_v3 = vld [vmem:[#allocation50_spill] sm:$0xff]  ;;  %v2356_v0 = vadd.f32 %v5623_v31, %v5672_v49 }
 0x3d7   :  { %v2374_v52 = vadd.f32 %v5725_v43, %v6097_v3  ;;  %v2628_v43 = vld [vmem:[%s5828_s5 + $0x38] sm:$0xff] }
 0x3d8   :  { %v2587_v53 = vmax.f32 %v2392_v9, 0.0  ;;  %2896 = vmatmul.f32.vlgmr.msrb.gmra.mxu3 %v2628_v43  ;;  %v2626_v9 = vld [vmem:[%s5828_s5 + $0x28] sm:$0xff] }
 0x3dd   :  { %v2394_v56 = vpop.f32.mrf.mxu2  ;;  %v2755_v55 = vpop.f32.mrf.mxu3 }
 0x3de   :  { %v2395_v50 = vadd.f32 %v2394_v56, %v6091_v29  ;;  %v2756_v18 = vadd.f32 %v2755_v55, %v2727_v45  ;;  %v2371_v45 = vadd.f32 %v5710_v10, %v6098_v11  ;;  %v2362_v10 = vadd.f32 %v5661_v35, %v5621_v27  ;;  %v2636_v27 = vld [vmem:[%s5828_s5 + $0x78] sm:$0xff] }
 0x3df   :  { %v2353_v35 = vadd.f32 %v5601_v63, %v5689_v59  ;;  %v2575_v55 = vmax.f32 %v2356_v0, 0.0  ;;  %v2644_v63 = vld [vmem:[%s5828_s5 + $0xb8] sm:$0xff] }
 0x3e0   :  { %v2588_v30 = vmax.f32 %v2395_v50, 0.0  ;;  %v2580_v36 = vmax.f32 %v2371_v45, 0.0  ;;  %v2577_v4 = vmax.f32 %v2362_v10, 0.0  ;;  %2899 = vmatmul.f32.gmra.mxu3 %v2636_v27 }
 0x3e1   :  { %v2574_v31 = vmax.f32 %v2353_v35, 0.0 }
 0x3e2   :  { %2822 = vmatpush.msrb.mxu0 %v2588_v30 }
 0x3e4   :  { %2823 = vmatpush.msrb.mxu0 %v2587_v53 }
 0x3e5   :  { %v5745_v34 = vpop.f32.mrf.mxu2  ;;  %v2758_v17 = vpop.f32.mrf.mxu3 }
 0x3e6   :  { %v2759_v5 = vadd.f32 %v2758_v17, %v2730_v16  ;;  %2824 = vmatpush.msrb.mxu0 %v2586_v44  ;;  %v2581_v16 = vmax.f32 %v2374_v52, 0.0  ;;  %v2642_v44 = vld [vmem:[%s5828_s5 + $0xa8] sm:$0xff] }
 0x3e8   :  { %2825 = vmatpush.msrb.mxu0 %v2585_v33  ;;  %2902 = vmatmul.f32.gmra.mxu3 %v2644_v63 }
 0x3ea   :  { %2826 = vmatpush.msrb.mxu0 %v2584_v15 }
 0x3ec   :  { %2827 = vmatpush.msrb.mxu0 %v2583_v2 }
 0x3ed   :  { %v2400_v14 = vpop.f32.mrf.mxu2  ;;  %v2761_v42 = vpop.f32.mrf.mxu3 }
 0x3ee   :  { %v5755_v32 = vadd.f32 %v2761_v42, %v2733_v39  ;;  %2828 = vmatpush.msrb.mxu0 %v2582_v46  ;;  %v2578_v39 = vmax.f32 %v2365_v25, 0.0  ;;  %v2401_v53 = vadd.f32 %v2400_v14, %v5738_v6  ;;  %v2635_v6 = vld [vmem:[%s5828_s5 + $0x70] sm:$0xff] }
 0x3f0   :  { %2829 = vmatpush.msrb.mxu0 %v2581_v16  ;;  %v2590_v47 = vmax.f32 %v2401_v53, 0.0 }
 0x3f2   :  { %2830 = vmatpush.msrb.mxu0 %v2580_v36 }
 0x3f4   :  { %2831 = vmatpush.msrb.mxu0 %v2579_v12 }
 0x3f5   :  { %v2403_v62 = vpop.f32.mrf.mxu2  ;;  %v2781_v56 = vpop.f32.mrf.mxu3 }
 0x3f6   :  { %2832 = vmatpush.msrb.mxu0 %v2578_v39  ;;  %v5768_v7 = vadd.f32 %v2781_v56, %v2753_v1  ;;  %v2573_v1 = vmax.f32 %v2350_v23, 0.0  ;;  %v2404_v21 = vadd.f32 %v2403_v62, %v5733_v57  ;;  %v2627_v57 = vld [vmem:[%s5828_s5 + $0x30] sm:$0xff] }
 0x3f8   :  { %2833 = vmatpush.msrb.mxu0 %v2577_v4  ;;  %v2591_v19 = vmax.f32 %v2404_v21, 0.0 }
 0x3fa   :  { %2834 = vmatpush.msrb.mxu0 %v2576_v20 }
 0x3fc   :  { %2835 = vmatpush.msrb.mxu0 %v2575_v55 }
 0x3fd   :  { %v2406_v49 = vpop.f32.mrf.mxu2  ;;  %v2784_v37 = vpop.f32.mrf.mxu3 }
 0x3fe   :  { %2836 = vmatpush.msrb.mxu0 %v2574_v31  ;;  %v2785_v29 = vadd.f32 %v2784_v37, %v2756_v18  ;;  %v2407_v28 = vadd.f32 %v2406_v49, %v5721_v61  ;;  %v2652_v18 = vld [vmem:[%s5828_s5 + $0xf8] sm:$0xff]  ;;  %v2918_v37 = vpop.permute.xlu2 %2917 }
 0x3ff   :  { %2905 = vmatmul.f32.gmra.mxu3 %v2652_v18 }
 0x400   :  { %2837 = vmatpush.msrb.mxu0 %v2573_v1  ;;  %v2592_v61 = vmax.f32 %v2407_v28, 0.0 }
 0x401   :  { %2838 = vmatmul.f32.vlgmr.msrb.gmra.mxu0 %v2626_v9 }
 0x405   :  { %v2409_v59 = vpop.f32.mrf.mxu2  ;;  %v2787_v38 = vpop.f32.mrf.mxu3 }
 0x406   :  { %v2410_v50 = vadd.f32 %v2409_v59, %v5702_v26  ;;  %v2788_v30 = vadd.f32 %v2787_v38, %v2759_v5  ;;  %v2398_v26 = vadd.f32 %v5745_v34, %v5735_v24  ;;  %v2650_v24 = vld [vmem:[%s5828_s5 + $0xe8] sm:$0xff]  ;;  %v2643_v34 = vld [vmem:[%s5828_s5 + $0xb0] sm:$0xff] }
 0x408   :  { %v2593_v13 = vmax.f32 %v2410_v50, 0.0  ;;  %v2589_v17 = vmax.f32 %v2398_v26, 0.0 }
 0x409   :  { %2841 = vmatmul.f32.gmra.mxu0 %v2634_v51 }
 0x40a   :  { %2862 = vmatpush.msrb.mxu1 %v2593_v13 }
 0x40c   :  { %2863 = vmatpush.msrb.mxu1 %v2592_v61 }
 0x40d   :  { %v2790_v22 = vpop.f32.mrf.mxu3 }
 0x40e   :  { %2864 = vmatpush.msrb.mxu1 %v2591_v19  ;;  %v2791_v41 = vadd.f32 %v2790_v22, %v5755_v32 }
 0x410   :  { %2865 = vmatpush.msrb.mxu1 %v2590_v47 }
 0x411   :  { %2844 = vmatmul.f32.gmra.mxu0 %v2642_v44 }
 0x412   :  { %2866 = vmatpush.msrb.mxu1 %v2589_v17 }
 0x413   :  { %2867 = vmatmul.f32.vlgmr.msrb.gmra.mxu1 %v2627_v57 }
 0x415   :  { %v2810_v33 = vpop.f32.mrf.mxu3 }
 0x416   :  { %v2811_v10 = vadd.f32 %v2810_v33, %v5768_v7  ;;  %v2913_v7 = vld [vmem:[%s5829_s7] sm:$0xf] }
 0x419   :  { %2847 = vmatmul.f32.gmra.mxu0 %v2650_v24 }
 0x41b   :  { %2870 = vmatmul.f32.gmra.mxu1 %v2635_v6 }
 0x41d   :  { %v2813_v5 = vpop.f32.mrf.mxu3 }
 0x41e   :  { %v2814_v43 = vadd.f32 %v2813_v5, %v2785_v29 }
 0x423   :  { %2873 = vmatmul.f32.gmra.mxu1 %v2643_v34 }
 0x425   :  { %v2816_v48 = vpop.f32.mrf.mxu3 }
 0x426   :  { %v2817_v54 = vadd.f32 %v2816_v48, %v2788_v30 }
 0x42b   :  { %2876 = vmatmul.f32.gmra.mxu1 %v2651_v58 }
 0x42d   :  { %v2819_v8 = vpop.f32.mrf.mxu3 }
 0x42e   :  { %v2820_v25 = vadd.f32 %v2819_v8, %v2791_v41 }
 0x45b   :  { %v2897_v3 = vpop.f32.mrf.mxu3 }
 0x463   :  { %v2900_v11 = vpop.f32.mrf.mxu3 }
 0x46b   :  { %v2903_v14 = vpop.f32.mrf.mxu3 }
 0x47e   :  { %v2839_v15 = vpop.f32.mrf.mxu0 }
 0x47f   :  { %v2840_v4 = vadd.f32 %v2839_v15, %v2811_v10 }
 0x482   :  { %v2906_v0 = vpop.f32.mrf.mxu3 }
 0x486   :  { %v2842_v52 = vpop.f32.mrf.mxu0 }
 0x487   :  { %v2843_v12 = vadd.f32 %v2842_v52, %v2814_v43 }
 0x48e   :  { %v2845_v46 = vpop.f32.mrf.mxu0 }
 0x48f   :  { %v2846_v36 = vadd.f32 %v2845_v46, %v2817_v54 }
 0x490   :  { %v2868_v2 = vpop.f32.mrf.mxu1 }
 0x491   :  { %v2869_v35 = vadd.f32 %v2868_v2, %v2840_v4 }
 0x493   :  { %v2898_v55 = vadd.f32 %v2897_v3, %v2869_v35 }
 0x495   :  { %v2909_v1 = vmax.f32 %v2898_v55, 0.0 }
 0x496   :  { %v2848_v16 = vpop.f32.mrf.mxu0 }
 0x497   :  { %v2849_v40 = vadd.f32 %v2848_v16, %v2820_v25 }
 0x498   :  { %v2871_v45 = vpop.f32.mrf.mxu1 }
 0x499   :  { %v2872_v56 = vadd.f32 %v2871_v45, %v2843_v12 }
 0x49b   :  { %v2901_v23 = vadd.f32 %v2900_v11, %v2872_v56 }
 0x49d   :  { %v2910_v49 = vmax.f32 %v2901_v23, 0.0 }
 0x4a0   :  { %v2874_v42 = vpop.f32.mrf.mxu1 }
 0x4a1   :  { %v2875_v39 = vadd.f32 %v2874_v42, %v2846_v36 }
 0x4a3   :  { %v2904_v20 = vadd.f32 %v2903_v14, %v2875_v39 }
 0x4a5   :  { %v2911_v31 = vmax.f32 %v2904_v20, 0.0 }
 0x4a8   :  { %v2877_v62 = vpop.f32.mrf.mxu1 }
 0x4a9   :  { %v2878_v27 = vadd.f32 %v2877_v62, %v2849_v40 }
 0x4ab   :  { %v2907_v60 = vadd.f32 %v2906_v0, %v2878_v27 }
 0x4ad   :  { %v2912_v32 = vmax.f32 %v2907_v60, 0.0 }
 0x4af   :  { %2936 = vmatpush.msra.mxu0 %v2912_v32 }
 0x4b1   :  { %2937 = vmatpush.msra.mxu0 %v2911_v31 }
 0x4b3   :  { %2938 = vmatpush.msra.mxu0 %v2910_v49 }
 0x4b5   :  { %2939 = vmatpush.msra.mxu0 %v2909_v1 }
 0x4b6   :  { %3100 = vmatmul.msk.f32.vlgmr.msra.gmra.mxu0 %vm2920_vm2, %v2913_v7 }
 0x533   :  { %v2941_v9 = vpop.f32.mrf.mxu0 }
 0x534   :  { %v2942_v29 = vadd.f32 %v2941_v9, %v2918_v37 }
 0x536   :  { %v2944_v63 = vmax.f32 %v2942_v29, 0.0 }
 0x538   :  { %v2945_v59 = vmin.f32 %v2944_v63, 23.0 }
 0x53a   :  { %2947 = vst.msk [vmem:[%s5830_s9] sm:$0xf] %vm2946_vm3, %v2945_v59 }

</bundles_post_ra>
